<compile_context>
chip_gen: v6e
topology: v6e:2x2x1
jax: 0.10.0
libtpu: 0.0.40
codegen_flags: <defaults>
</compile_context>

<pallas_src>
import jax
import jax.numpy as jnp
from jax.experimental import pallas as pl
from jax.experimental.pallas import tpu as pltpu


# ----------------------------------------------------------------------------
# small helpers usable inside the kernel
# ----------------------------------------------------------------------------
def _erf(x):
    # Abramowitz & Stegun 7.1.26 rational approximation, |err| <= 1.5e-7.
    a1, a2, a3, a4, a5 = 0.254829592, -0.284496736, 1.421413741, -1.453152027, 1.061405429
    p = 0.3275911
    s = jnp.where(x >= 0.0, 1.0, -1.0)
    ax = jnp.abs(x)
    t = 1.0 / (1.0 + p * ax)
    poly = ((((a5 * t + a4) * t + a3) * t + a2) * t + a1) * t
    return s * (1.0 - poly * jnp.exp(-ax * ax))


def _gelu(x):
    return 0.5 * x * (1.0 + _erf(x * 0.7071067811865476))


def _layer_norm_cf(x, g, b, eps=1e-5):
    # LayerNorm over the channel (sublane) axis of a channel-first (C, T) tile.
    mu = jnp.mean(x, axis=0, keepdims=True)
    var = jnp.mean((x - mu) ** 2, axis=0, keepdims=True)
    return (x - mu) * jax.lax.rsqrt(var + eps) * g + b


# ----------------------------------------------------------------------------
# constant operators (built once in the wrapper, tiny: < 1 MiB total)
# ----------------------------------------------------------------------------
def _build_shift_operators(b, h, w):
    N = h * w
    T = b * N
    m = jnp.arange(T)[:, None]               # source column
    t = jnp.arange(T)[None, :]               # destination column
    same_img = (m // N) == (t // N)

    # batch placement / extraction selectors: perm[i][n, i*N + n] = 1
    n = jnp.arange(N)[:, None]
    perm = jnp.stack(
        [(jnp.arange(T)[None, :] == (i * N + n)).astype(jnp.float32) for i in range(b)],
        axis=0)

    # 1-D sequence shifts d = -2..2 (conv3d / conv5d), zero-padded per image
    s1 = jnp.stack(
        [((m == t + (j - 2)) & same_img).astype(jnp.float32) for j in range(5)],
        axis=0)

    # 3x3 spatial shifts on the row-major flattened h*w grid (conv_fus)
    row = (t % N) // w
    col = (t % N) % w
    s2_list = []
    for ky in range(3):
        for kx in range(3):
            dy, dx = ky - 1, kx - 1
            valid = ((row + dy >= 0) & (row + dy < h) &
                     (col + dx >= 0) & (col + dx < w))
            s2_list.append(((m == t + dy * w + dx) & same_img & valid)
                           .astype(jnp.float32))
    s2 = jnp.stack(s2_list, axis=0)
    return perm, s1, s2


# ----------------------------------------------------------------------------
# the single fused kernel
# ----------------------------------------------------------------------------
def _gmlp_kernel(rgb_ref, t_ref, perm_ref, s1_ref, s2_ref,
                 ln1_g_ref, ln1_b_ref, fc1_w_ref, fc1_b_ref,
                 ln2_g_ref, ln2_b_ref,
                 conv3_w_ref, conv3_b_ref, conv5_w_ref, conv5_b_ref,
                 fc3_w_ref, fc3_b_ref, dw_a_ref, dw_b_ref,
                 pw_w_ref, pw_b_ref,
                 fus_wa_ref, fus_wb_ref, fus_b_ref,
                 bn_g_ref, bn_b_ref,
                 o_ref):
    b, c, N = rgb_ref.shape
    T = b * N
    c4 = fc1_w_ref.shape[0]

    def mm(a, bb):
        return jnp.dot(a, bb, preferred_element_type=jnp.float32)

    def stream(x_ref):
        # fold NCHW -> channel-first merged tokens (c, b*N): lane-dense T lanes
        x = jnp.zeros((c, T), jnp.float32)
        for i in range(b):
            x = x + mm(x_ref[i], perm_ref[i])
        # ln1 -> fc1 -> GELU -> ln2  (all per token / column)
        x = _layer_norm_cf(x, ln1_g_ref[...], ln1_b_ref[...])
        y = mm(fc1_w_ref[...], x) + fc1_b_ref[...]
        y = _gelu(y)
        y = _layer_norm_cf(y, ln2_g_ref[...], ln2_b_ref[...])
        # conv3d / conv5d over the flattened h*w sequence.  The five shifted
        # copies (d = -2..2) are shared between both kernel sizes; shifts are
        # matmuls against masked constant operators (no pads, no slicing).
        ys = [mm(y, s1_ref[j]) for j in range(5)]
        y3 = conv3_b_ref[...] + jnp.zeros((c4, T), jnp.float32)
        for k in range(3):
            y3 = y3 + mm(conv3_w_ref[k], ys[k + 1])        # taps d = -1, 0, 1
        y5 = conv5_b_ref[...] + jnp.zeros((c4, T), jnp.float32)
        for k in range(5):
            y5 = y5 + mm(conv5_w_ref[k], ys[k])            # taps d = -2..2
        return y3, y5

    r3, r5 = stream(rgb_ref)
    t3, t5 = stream(t_ref)

    def branch(r, t):
        rt = r + t + r * t                                  # (c4, T)
        z = mm(fc3_w_ref[...], rt) + fc3_b_ref[...]         # fc3            (c, T)
        z = z * dw_a_ref[...] + dw_b_ref[...]               # dw: depthwise 1x1
        z = mm(pw_w_ref[...], z) + pw_b_ref[...]            # dw: pointwise 1x1
        return z

    z3 = branch(r3, t3)
    z5 = branch(r5, t5)

    # conv_fus: 3x3 conv over cat([z3, z5], channel) as 9 shifted matmuls; the
    # two channel halves are mixed first so only one lane-dense shift matmul
    # per tap is needed.
    acc = fus_b_ref[...] + jnp.zeros((c, T), jnp.float32)
    for j in range(9):
        u = mm(fus_wa_ref[j], z3) + mm(fus_wb_ref[j], z5)   # (c, T)
        acc = acc + mm(u, s2_ref[j])

    # BatchNorm2d (training-mode batch stats, biased variance) + ReLU epilogue:
    # per-channel stats over all b*h*w lane positions.
    mu = jnp.mean(acc, axis=1, keepdims=True)
    var = jnp.mean((acc - mu) ** 2, axis=1, keepdims=True)
    y = (acc - mu) * jax.lax.rsqrt(var + 1e-5) * bn_g_ref[...] + bn_b_ref[...]
    y = jnp.maximum(y, 0.0)

    # scatter back to NCHW-flattened (b, c, h*w) output blocks
    for i in range(b):
        o_ref[i] = jax.lax.dot_general(
            y, perm_ref[i], (((1,), (1,)), ((), ())),
            preferred_element_type=jnp.float32)


# ----------------------------------------------------------------------------
# wrapper: only free metadata reshapes around one pallas_call
# ----------------------------------------------------------------------------
@jax.jit
def gmlp_forward(rgb0, t0, params):
    b, c, h, w = rgb0.shape
    N = h * w
    perm, s1, s2 = _build_shift_operators(b, h, w)

    out = pl.pallas_call(
        _gmlp_kernel,
        out_shape=jax.ShapeDtypeStruct((b, c, N), jnp.float32),
        compiler_params=pltpu.CompilerParams(vmem_limit_bytes=32 * 1024 * 1024),
    )(
        rgb0.reshape(b, c, N), t0.reshape(b, c, N), perm, s1, s2,
        params["ln1_g"], params["ln1_b"], params["fc1_w"], params["fc1_b"],
        params["ln2_g"], params["ln2_b"],
        params["conv3_w"], params["conv3_b"], params["conv5_w"], params["conv5_b"],
        params["fc3_w"], params["fc3_b"], params["dw_alpha"], params["dw_beta"],
        params["pw_w"], params["pw_b"],
        params["fus_wa"], params["fus_wb"], params["fus_b"],
        params["bn_g"], params["bn_b"],
    )
    return out.reshape(b, c, h, w)


# ----------------------------------------------------------------------------
# deterministic parameter init (shapes follow GMLP.__init__; channel-first)
# ----------------------------------------------------------------------------
def init_params(key, dim):
    c = dim
    c4 = dim // 4
    ks = jax.random.split(key, 12)
    f32 = jnp.float32
    rnd = lambda k, shape, s=0.1: jax.random.normal(k, shape, f32) * s
    # conv_fus 3x3 weight, tap-major (j = ky*3 + kx), layout (tap, out, in=2c)
    fus_w = rnd(ks[10], (9, c, 2 * c))
    return dict(
        ln1_g=jnp.ones((c, 1), f32), ln1_b=jnp.zeros((c, 1), f32),
        ln2_g=jnp.ones((c4, 1), f32), ln2_b=jnp.zeros((c4, 1), f32),
        fc1_w=rnd(ks[0], (c4, c)), fc1_b=rnd(ks[1], (c4, 1)),
        fc3_w=rnd(ks[2], (c, c4)), fc3_b=rnd(ks[3], (c, 1)),
        # Conv1d weights tap-major (K, out, in); bias = 1.0 (per nn.init.constant_)
        conv3_w=rnd(ks[4], (3, c4, c4)), conv3_b=jnp.ones((c4, 1), f32),
        conv5_w=rnd(ks[5], (5, c4, c4)), conv5_b=jnp.ones((c4, 1), f32),
        # dw: depthwise 1x1 (per-channel scale/shift) then pointwise 1x1
        dw_alpha=rnd(ks[6], (c, 1)), dw_beta=rnd(ks[7], (c, 1)),
        pw_w=rnd(ks[8], (c, c)), pw_b=rnd(ks[9], (c, 1)),
        # conv_fus channel halves for torch.cat((rt3, rt5), 1), plus its bias
        fus_wa=fus_w[:, :, :c], fus_wb=fus_w[:, :, c:], fus_b=rnd(ks[11], (c, 1)),
        # BatchNorm2d affine (default init)
        bn_g=jnp.ones((c, 1), f32), bn_b=jnp.zeros((c, 1), f32),
    )


if __name__ == "__main__":
    b, dim, h, w = 2, 16, 8, 8
    key = jax.random.PRNGKey(0)
    k1, k2, k3 = jax.random.split(key, 3)
    rgb0 = jax.random.normal(k1, (b, dim, h, w), jnp.float32)
    t0 = jax.random.normal(k2, (b, dim, h, w), jnp.float32)
    params = init_params(k3, dim)

    out = gmlp_forward(rgb0, t0, params)
    out = jax.block_until_ready(out)
    assert out.shape == (b, dim, h, w)
    assert bool(jnp.all(jnp.isfinite(out)))
    print("KERNEL_OK")
</pallas_src>

<mosaic_0001>
module attributes {stable_mosaic.version = 11 : i64} {
  func.func @_gmlp_kernel(%arg0: memref<2x16x64xf32, #tpu.memory_space<vmem>>, %arg1: memref<2x16x64xf32, #tpu.memory_space<vmem>>, %arg2: memref<2x64x128xf32, #tpu.memory_space<vmem>>, %arg3: memref<5x128x128xf32, #tpu.memory_space<vmem>>, %arg4: memref<9x128x128xf32, #tpu.memory_space<vmem>>, %arg5: memref<16x1xf32, #tpu.memory_space<vmem>>, %arg6: memref<16x1xf32, #tpu.memory_space<vmem>>, %arg7: memref<4x16xf32, #tpu.memory_space<vmem>>, %arg8: memref<4x1xf32, #tpu.memory_space<vmem>>, %arg9: memref<4x1xf32, #tpu.memory_space<vmem>>, %arg10: memref<4x1xf32, #tpu.memory_space<vmem>>, %arg11: memref<3x4x4xf32, #tpu.memory_space<vmem>>, %arg12: memref<4x1xf32, #tpu.memory_space<vmem>>, %arg13: memref<5x4x4xf32, #tpu.memory_space<vmem>>, %arg14: memref<4x1xf32, #tpu.memory_space<vmem>>, %arg15: memref<16x4xf32, #tpu.memory_space<vmem>>, %arg16: memref<16x1xf32, #tpu.memory_space<vmem>>, %arg17: memref<16x1xf32, #tpu.memory_space<vmem>>, %arg18: memref<16x1xf32, #tpu.memory_space<vmem>>, %arg19: memref<16x16xf32, #tpu.memory_space<vmem>>, %arg20: memref<16x1xf32, #tpu.memory_space<vmem>>, %arg21: memref<9x16x16xf32, #tpu.memory_space<vmem>>, %arg22: memref<9x16x16xf32, #tpu.memory_space<vmem>>, %arg23: memref<16x1xf32, #tpu.memory_space<vmem>>, %arg24: memref<16x1xf32, #tpu.memory_space<vmem>>, %arg25: memref<16x1xf32, #tpu.memory_space<vmem>>, %arg26: memref<2x16x64xf32, #tpu.memory_space<vmem>>) attributes {dimension_semantics = [], scalar_prefetch = 0 : i64, scratch_operands = 0 : i64, tpu.core_type = #tpu.core_type<tc>} {
    %cst = arith.constant 0.000000e+00 : f32
    %0 = vector.broadcast %cst : f32 to vector<16x128xf32>
    %c0 = arith.constant 0 : index
    %c0_0 = arith.constant 0 : index
    %c0_1 = arith.constant 0 : index
    %1 = vector.load %arg0[%c0, %c0_0, %c0_1] : memref<2x16x64xf32, #tpu.memory_space<vmem>>, vector<1x16x64xf32>
    %2 = vector.shape_cast %1 : vector<1x16x64xf32> to vector<16x64xf32>
    %c0_2 = arith.constant 0 : index
    %c0_3 = arith.constant 0 : index
    %c0_4 = arith.constant 0 : index
    %3 = vector.load %arg2[%c0_2, %c0_3, %c0_4] : memref<2x64x128xf32, #tpu.memory_space<vmem>>, vector<1x64x128xf32>
    %4 = vector.shape_cast %3 : vector<1x64x128xf32> to vector<64x128xf32>
    %cst_5 = arith.constant dense<0.000000e+00> : vector<16x128xf32>
    %5 = tpu.matmul %2, %4, %cst_5 {dimension_numbers = #tpu.dot_dimension_numbers<[1], [0], [0], [1], [0, 0, 1, 1], [], []>} : vector<16x64xf32>, vector<64x128xf32>, vector<16x128xf32> -> vector<16x128xf32>
    %6 = arith.addf %0, %5 : vector<16x128xf32>
    %c1 = arith.constant 1 : index
    %c0_6 = arith.constant 0 : index
    %c0_7 = arith.constant 0 : index
    %7 = vector.load %arg0[%c1, %c0_6, %c0_7] : memref<2x16x64xf32, #tpu.memory_space<vmem>>, vector<1x16x64xf32>
    %8 = vector.shape_cast %7 : vector<1x16x64xf32> to vector<16x64xf32>
    %c1_8 = arith.constant 1 : index
    %c0_9 = arith.constant 0 : index
    %c0_10 = arith.constant 0 : index
    %9 = vector.load %arg2[%c1_8, %c0_9, %c0_10] : memref<2x64x128xf32, #tpu.memory_space<vmem>>, vector<1x64x128xf32>
    %10 = vector.shape_cast %9 : vector<1x64x128xf32> to vector<64x128xf32>
    %cst_11 = arith.constant dense<0.000000e+00> : vector<16x128xf32>
    %11 = tpu.matmul %8, %10, %cst_11 {dimension_numbers = #tpu.dot_dimension_numbers<[1], [0], [0], [1], [0, 0, 1, 1], [], []>} : vector<16x64xf32>, vector<64x128xf32>, vector<16x128xf32> -> vector<16x128xf32>
    %12 = arith.addf %6, %11 : vector<16x128xf32>
    %c0_12 = arith.constant 0 : index
    %c0_13 = arith.constant 0 : index
    %13 = vector.load %arg5[%c0_12, %c0_13] : memref<16x1xf32, #tpu.memory_space<vmem>>, vector<16x1xf32>
    %c0_14 = arith.constant 0 : index
    %c0_15 = arith.constant 0 : index
    %14 = vector.load %arg6[%c0_14, %c0_15] : memref<16x1xf32, #tpu.memory_space<vmem>>, vector<16x1xf32>
    %cst_16 = arith.constant dense<0.000000e+00> : vector<128xf32>
    %15 = vector.multi_reduction <add>, %12, %cst_16 [0] : vector<16x128xf32> to vector<128xf32>
    %16 = vector.shape_cast %15 : vector<128xf32> to vector<1x128xf32>
    %cst_17 = arith.constant 1.600000e+01 : f32
    %17 = vector.broadcast %cst_17 : f32 to vector<1x128xf32>
    %18 = arith.divf %16, %17 : vector<1x128xf32>
    %19 = vector.broadcast %18 : vector<1x128xf32> to vector<16x128xf32>
    %20 = arith.subf %12, %19 : vector<16x128xf32>
    %21 = arith.mulf %20, %20 : vector<16x128xf32>
    %cst_18 = arith.constant dense<0.000000e+00> : vector<128xf32>
    %22 = vector.multi_reduction <add>, %21, %cst_18 [0] : vector<16x128xf32> to vector<128xf32>
    %23 = vector.shape_cast %22 : vector<128xf32> to vector<1x128xf32>
    %cst_19 = arith.constant 1.600000e+01 : f32
    %24 = vector.broadcast %cst_19 : f32 to vector<1x128xf32>
    %25 = arith.divf %23, %24 : vector<1x128xf32>
    %26 = vector.broadcast %18 : vector<1x128xf32> to vector<16x128xf32>
    %27 = arith.subf %12, %26 : vector<16x128xf32>
    %cst_20 = arith.constant 9.99999974E-6 : f32
    %28 = vector.broadcast %cst_20 : f32 to vector<1x128xf32>
    %29 = arith.addf %25, %28 : vector<1x128xf32>
    %30 = math.rsqrt %29 : vector<1x128xf32>
    %31 = vector.broadcast %30 : vector<1x128xf32> to vector<16x128xf32>
    %32 = arith.mulf %27, %31 : vector<16x128xf32>
    %33 = vector.broadcast %13 : vector<16x1xf32> to vector<16x128xf32>
    %34 = arith.mulf %32, %33 : vector<16x128xf32>
    %35 = vector.broadcast %14 : vector<16x1xf32> to vector<16x128xf32>
    %36 = arith.addf %34, %35 : vector<16x128xf32>
    %c0_21 = arith.constant 0 : index
    %c0_22 = arith.constant 0 : index
    %37 = vector.load %arg7[%c0_21, %c0_22] : memref<4x16xf32, #tpu.memory_space<vmem>>, vector<4x16xf32>
    %cst_23 = arith.constant dense<0.000000e+00> : vector<4x128xf32>
    %38 = tpu.matmul %37, %36, %cst_23 {dimension_numbers = #tpu.dot_dimension_numbers<[1], [0], [0], [1], [0, 0, 1, 1], [], []>} : vector<4x16xf32>, vector<16x128xf32>, vector<4x128xf32> -> vector<4x128xf32>
    %c0_24 = arith.constant 0 : index
    %c0_25 = arith.constant 0 : index
    %39 = vector.load %arg8[%c0_24, %c0_25] : memref<4x1xf32, #tpu.memory_space<vmem>>, vector<4x1xf32>
    %40 = vector.broadcast %39 : vector<4x1xf32> to vector<4x128xf32>
    %41 = arith.addf %38, %40 : vector<4x128xf32>
    %cst_26 = arith.constant 5.000000e-01 : f32
    %42 = vector.broadcast %cst_26 : f32 to vector<4x128xf32>
    %43 = arith.mulf %42, %41 : vector<4x128xf32>
    %cst_27 = arith.constant 0.707106769 : f32
    %44 = vector.broadcast %cst_27 : f32 to vector<4x128xf32>
    %45 = arith.mulf %41, %44 : vector<4x128xf32>
    %cst_28 = arith.constant 0.000000e+00 : f32
    %46 = vector.broadcast %cst_28 : f32 to vector<4x128xf32>
    %47 = arith.cmpf oge, %45, %46 : vector<4x128xf32>
    %cst_29 = arith.constant 1.000000e+00 : f32
    %cst_30 = arith.constant -1.000000e+00 : f32
    %48 = vector.broadcast %cst_29 : f32 to vector<4x128xf32>
    %49 = vector.broadcast %cst_30 : f32 to vector<4x128xf32>
    %50 = arith.select %47, %48, %49 : vector<4x128xi1>, vector<4x128xf32>
    %51 = math.absf %45 : vector<4x128xf32>
    %cst_31 = arith.constant 0.327591091 : f32
    %52 = vector.broadcast %cst_31 : f32 to vector<4x128xf32>
    %53 = arith.mulf %52, %51 : vector<4x128xf32>
    %cst_32 = arith.constant 1.000000e+00 : f32
    %54 = vector.broadcast %cst_32 : f32 to vector<4x128xf32>
    %55 = arith.addf %54, %53 : vector<4x128xf32>
    %cst_33 = arith.constant 1.000000e+00 : f32
    %56 = vector.broadcast %cst_33 : f32 to vector<4x128xf32>
    %57 = arith.divf %56, %55 : vector<4x128xf32>
    %cst_34 = arith.constant 1.06140542 : f32
    %58 = vector.broadcast %cst_34 : f32 to vector<4x128xf32>
    %59 = arith.mulf %58, %57 : vector<4x128xf32>
    %cst_35 = arith.constant -1.45315206 : f32
    %60 = vector.broadcast %cst_35 : f32 to vector<4x128xf32>
    %61 = arith.addf %59, %60 : vector<4x128xf32>
    %62 = arith.mulf %61, %57 : vector<4x128xf32>
    %cst_36 = arith.constant 1.42141378 : f32
    %63 = vector.broadcast %cst_36 : f32 to vector<4x128xf32>
    %64 = arith.addf %62, %63 : vector<4x128xf32>
    %65 = arith.mulf %64, %57 : vector<4x128xf32>
    %cst_37 = arith.constant -0.284496725 : f32
    %66 = vector.broadcast %cst_37 : f32 to vector<4x128xf32>
    %67 = arith.addf %65, %66 : vector<4x128xf32>
    %68 = arith.mulf %67, %57 : vector<4x128xf32>
    %cst_38 = arith.constant 0.254829586 : f32
    %69 = vector.broadcast %cst_38 : f32 to vector<4x128xf32>
    %70 = arith.addf %68, %69 : vector<4x128xf32>
    %71 = arith.mulf %70, %57 : vector<4x128xf32>
    %cst_39 = arith.constant 0.000000e+00 : f32
    %72 = vector.broadcast %cst_39 : f32 to vector<4x128xf32>
    %73 = arith.subf %72, %51 : vector<4x128xf32>
    %74 = arith.mulf %73, %51 : vector<4x128xf32>
    %75 = math.exp %74 : vector<4x128xf32>
    %76 = arith.mulf %71, %75 : vector<4x128xf32>
    %cst_40 = arith.constant 1.000000e+00 : f32
    %77 = vector.broadcast %cst_40 : f32 to vector<4x128xf32>
    %78 = arith.subf %77, %76 : vector<4x128xf32>
    %79 = arith.mulf %50, %78 : vector<4x128xf32>
    %cst_41 = arith.constant 1.000000e+00 : f32
    %80 = vector.broadcast %cst_41 : f32 to vector<4x128xf32>
    %81 = arith.addf %80, %79 : vector<4x128xf32>
    %82 = arith.mulf %43, %81 : vector<4x128xf32>
    %c0_42 = arith.constant 0 : index
    %c0_43 = arith.constant 0 : index
    %83 = vector.load %arg9[%c0_42, %c0_43] : memref<4x1xf32, #tpu.memory_space<vmem>>, vector<4x1xf32>
    %c0_44 = arith.constant 0 : index
    %c0_45 = arith.constant 0 : index
    %84 = vector.load %arg10[%c0_44, %c0_45] : memref<4x1xf32, #tpu.memory_space<vmem>>, vector<4x1xf32>
    %cst_46 = arith.constant dense<0.000000e+00> : vector<128xf32>
    %85 = vector.multi_reduction <add>, %82, %cst_46 [0] : vector<4x128xf32> to vector<128xf32>
    %86 = vector.shape_cast %85 : vector<128xf32> to vector<1x128xf32>
    %cst_47 = arith.constant 4.000000e+00 : f32
    %87 = vector.broadcast %cst_47 : f32 to vector<1x128xf32>
    %88 = arith.divf %86, %87 : vector<1x128xf32>
    %89 = vector.broadcast %88 : vector<1x128xf32> to vector<4x128xf32>
    %90 = arith.subf %82, %89 : vector<4x128xf32>
    %91 = arith.mulf %90, %90 : vector<4x128xf32>
    %cst_48 = arith.constant dense<0.000000e+00> : vector<128xf32>
    %92 = vector.multi_reduction <add>, %91, %cst_48 [0] : vector<4x128xf32> to vector<128xf32>
    %93 = vector.shape_cast %92 : vector<128xf32> to vector<1x128xf32>
    %cst_49 = arith.constant 4.000000e+00 : f32
    %94 = vector.broadcast %cst_49 : f32 to vector<1x128xf32>
    %95 = arith.divf %93, %94 : vector<1x128xf32>
    %96 = vector.broadcast %88 : vector<1x128xf32> to vector<4x128xf32>
    %97 = arith.subf %82, %96 : vector<4x128xf32>
    %cst_50 = arith.constant 9.99999974E-6 : f32
    %98 = vector.broadcast %cst_50 : f32 to vector<1x128xf32>
    %99 = arith.addf %95, %98 : vector<1x128xf32>
    %100 = math.rsqrt %99 : vector<1x128xf32>
    %101 = vector.broadcast %100 : vector<1x128xf32> to vector<4x128xf32>
    %102 = arith.mulf %97, %101 : vector<4x128xf32>
    %103 = vector.broadcast %83 : vector<4x1xf32> to vector<4x128xf32>
    %104 = arith.mulf %102, %103 : vector<4x128xf32>
    %105 = vector.broadcast %84 : vector<4x1xf32> to vector<4x128xf32>
    %106 = arith.addf %104, %105 : vector<4x128xf32>
    %c0_51 = arith.constant 0 : index
    %c0_52 = arith.constant 0 : index
    %c0_53 = arith.constant 0 : index
    %107 = vector.load %arg3[%c0_51, %c0_52, %c0_53] : memref<5x128x128xf32, #tpu.memory_space<vmem>>, vector<1x128x128xf32>
    %108 = vector.shape_cast %107 : vector<1x128x128xf32> to vector<128x128xf32>
    %cst_54 = arith.constant dense<0.000000e+00> : vector<4x128xf32>
    %109 = tpu.matmul %106, %108, %cst_54 {dimension_numbers = #tpu.dot_dimension_numbers<[1], [0], [0], [1], [0, 0, 1, 1], [], []>} : vector<4x128xf32>, vector<128x128xf32>, vector<4x128xf32> -> vector<4x128xf32>
    %c1_55 = arith.constant 1 : index
    %c0_56 = arith.constant 0 : index
    %c0_57 = arith.constant 0 : index
    %110 = vector.load %arg3[%c1_55, %c0_56, %c0_57] : memref<5x128x128xf32, #tpu.memory_space<vmem>>, vector<1x128x128xf32>
    %111 = vector.shape_cast %110 : vector<1x128x128xf32> to vector<128x128xf32>
    %cst_58 = arith.constant dense<0.000000e+00> : vector<4x128xf32>
    %112 = tpu.matmul %106, %111, %cst_58 {dimension_numbers = #tpu.dot_dimension_numbers<[1], [0], [0], [1], [0, 0, 1, 1], [], []>} : vector<4x128xf32>, vector<128x128xf32>, vector<4x128xf32> -> vector<4x128xf32>
    %c2 = arith.constant 2 : index
    %c0_59 = arith.constant 0 : index
    %c0_60 = arith.constant 0 : index
    %113 = vector.load %arg3[%c2, %c0_59, %c0_60] : memref<5x128x128xf32, #tpu.memory_space<vmem>>, vector<1x128x128xf32>
    %114 = vector.shape_cast %113 : vector<1x128x128xf32> to vector<128x128xf32>
    %cst_61 = arith.constant dense<0.000000e+00> : vector<4x128xf32>
    %115 = tpu.matmul %106, %114, %cst_61 {dimension_numbers = #tpu.dot_dimension_numbers<[1], [0], [0], [1], [0, 0, 1, 1], [], []>} : vector<4x128xf32>, vector<128x128xf32>, vector<4x128xf32> -> vector<4x128xf32>
    %c3 = arith.constant 3 : index
    %c0_62 = arith.constant 0 : index
    %c0_63 = arith.constant 0 : index
    %116 = vector.load %arg3[%c3, %c0_62, %c0_63] : memref<5x128x128xf32, #tpu.memory_space<vmem>>, vector<1x128x128xf32>
    %117 = vector.shape_cast %116 : vector<1x128x128xf32> to vector<128x128xf32>
    %cst_64 = arith.constant dense<0.000000e+00> : vector<4x128xf32>
    %118 = tpu.matmul %106, %117, %cst_64 {dimension_numbers = #tpu.dot_dimension_numbers<[1], [0], [0], [1], [0, 0, 1, 1], [], []>} : vector<4x128xf32>, vector<128x128xf32>, vector<4x128xf32> -> vector<4x128xf32>
    %c4 = arith.constant 4 : index
    %c0_65 = arith.constant 0 : index
    %c0_66 = arith.constant 0 : index
    %119 = vector.load %arg3[%c4, %c0_65, %c0_66] : memref<5x128x128xf32, #tpu.memory_space<vmem>>, vector<1x128x128xf32>
    %120 = vector.shape_cast %119 : vector<1x128x128xf32> to vector<128x128xf32>
    %cst_67 = arith.constant dense<0.000000e+00> : vector<4x128xf32>
    %121 = tpu.matmul %106, %120, %cst_67 {dimension_numbers = #tpu.dot_dimension_numbers<[1], [0], [0], [1], [0, 0, 1, 1], [], []>} : vector<4x128xf32>, vector<128x128xf32>, vector<4x128xf32> -> vector<4x128xf32>
    %c0_68 = arith.constant 0 : index
    %c0_69 = arith.constant 0 : index
    %122 = vector.load %arg12[%c0_68, %c0_69] : memref<4x1xf32, #tpu.memory_space<vmem>>, vector<4x1xf32>
    %cst_70 = arith.constant 0.000000e+00 : f32
    %123 = vector.broadcast %cst_70 : f32 to vector<4x128xf32>
    %124 = vector.broadcast %122 : vector<4x1xf32> to vector<4x128xf32>
    %125 = arith.addf %124, %123 : vector<4x128xf32>
    %c0_71 = arith.constant 0 : index
    %c0_72 = arith.constant 0 : index
    %c0_73 = arith.constant 0 : index
    %126 = vector.load %arg11[%c0_71, %c0_72, %c0_73] : memref<3x4x4xf32, #tpu.memory_space<vmem>>, vector<1x4x4xf32>
    %127 = vector.shape_cast %126 : vector<1x4x4xf32> to vector<4x4xf32>
    %cst_74 = arith.constant dense<0.000000e+00> : vector<4x128xf32>
    %128 = tpu.matmul %127, %112, %cst_74 {dimension_numbers = #tpu.dot_dimension_numbers<[1], [0], [0], [1], [0, 0, 1, 1], [], []>} : vector<4x4xf32>, vector<4x128xf32>, vector<4x128xf32> -> vector<4x128xf32>
    %129 = arith.addf %125, %128 : vector<4x128xf32>
    %c1_75 = arith.constant 1 : index
    %c0_76 = arith.constant 0 : index
    %c0_77 = arith.constant 0 : index
    %130 = vector.load %arg11[%c1_75, %c0_76, %c0_77] : memref<3x4x4xf32, #tpu.memory_space<vmem>>, vector<1x4x4xf32>
    %131 = vector.shape_cast %130 : vector<1x4x4xf32> to vector<4x4xf32>
    %cst_78 = arith.constant dense<0.000000e+00> : vector<4x128xf32>
    %132 = tpu.matmul %131, %115, %cst_78 {dimension_numbers = #tpu.dot_dimension_numbers<[1], [0], [0], [1], [0, 0, 1, 1], [], []>} : vector<4x4xf32>, vector<4x128xf32>, vector<4x128xf32> -> vector<4x128xf32>
    %133 = arith.addf %129, %132 : vector<4x128xf32>
    %c2_79 = arith.constant 2 : index
    %c0_80 = arith.constant 0 : index
    %c0_81 = arith.constant 0 : index
    %134 = vector.load %arg11[%c2_79, %c0_80, %c0_81] : memref<3x4x4xf32, #tpu.memory_space<vmem>>, vector<1x4x4xf32>
    %135 = vector.shape_cast %134 : vector<1x4x4xf32> to vector<4x4xf32>
    %cst_82 = arith.constant dense<0.000000e+00> : vector<4x128xf32>
    %136 = tpu.matmul %135, %118, %cst_82 {dimension_numbers = #tpu.dot_dimension_numbers<[1], [0], [0], [1], [0, 0, 1, 1], [], []>} : vector<4x4xf32>, vector<4x128xf32>, vector<4x128xf32> -> vector<4x128xf32>
    %137 = arith.addf %133, %136 : vector<4x128xf32>
    %c0_83 = arith.constant 0 : index
    %c0_84 = arith.constant 0 : index
    %138 = vector.load %arg14[%c0_83, %c0_84] : memref<4x1xf32, #tpu.memory_space<vmem>>, vector<4x1xf32>
    %cst_85 = arith.constant 0.000000e+00 : f32
    %139 = vector.broadcast %cst_85 : f32 to vector<4x128xf32>
    %140 = vector.broadcast %138 : vector<4x1xf32> to vector<4x128xf32>
    %141 = arith.addf %140, %139 : vector<4x128xf32>
    %c0_86 = arith.constant 0 : index
    %c0_87 = arith.constant 0 : index
    %c0_88 = arith.constant 0 : index
    %142 = vector.load %arg13[%c0_86, %c0_87, %c0_88] : memref<5x4x4xf32, #tpu.memory_space<vmem>>, vector<1x4x4xf32>
    %143 = vector.shape_cast %142 : vector<1x4x4xf32> to vector<4x4xf32>
    %cst_89 = arith.constant dense<0.000000e+00> : vector<4x128xf32>
    %144 = tpu.matmul %143, %109, %cst_89 {dimension_numbers = #tpu.dot_dimension_numbers<[1], [0], [0], [1], [0, 0, 1, 1], [], []>} : vector<4x4xf32>, vector<4x128xf32>, vector<4x128xf32> -> vector<4x128xf32>
    %145 = arith.addf %141, %144 : vector<4x128xf32>
    %c1_90 = arith.constant 1 : index
    %c0_91 = arith.constant 0 : index
    %c0_92 = arith.constant 0 : index
    %146 = vector.load %arg13[%c1_90, %c0_91, %c0_92] : memref<5x4x4xf32, #tpu.memory_space<vmem>>, vector<1x4x4xf32>
    %147 = vector.shape_cast %146 : vector<1x4x4xf32> to vector<4x4xf32>
    %cst_93 = arith.constant dense<0.000000e+00> : vector<4x128xf32>
    %148 = tpu.matmul %147, %112, %cst_93 {dimension_numbers = #tpu.dot_dimension_numbers<[1], [0], [0], [1], [0, 0, 1, 1], [], []>} : vector<4x4xf32>, vector<4x128xf32>, vector<4x128xf32> -> vector<4x128xf32>
    %149 = arith.addf %145, %148 : vector<4x128xf32>
    %c2_94 = arith.constant 2 : index
    %c0_95 = arith.constant 0 : index
    %c0_96 = arith.constant 0 : index
    %150 = vector.load %arg13[%c2_94, %c0_95, %c0_96] : memref<5x4x4xf32, #tpu.memory_space<vmem>>, vector<1x4x4xf32>
    %151 = vector.shape_cast %150 : vector<1x4x4xf32> to vector<4x4xf32>
    %cst_97 = arith.constant dense<0.000000e+00> : vector<4x128xf32>
    %152 = tpu.matmul %151, %115, %cst_97 {dimension_numbers = #tpu.dot_dimension_numbers<[1], [0], [0], [1], [0, 0, 1, 1], [], []>} : vector<4x4xf32>, vector<4x128xf32>, vector<4x128xf32> -> vector<4x128xf32>
    %153 = arith.addf %149, %152 : vector<4x128xf32>
    %c3_98 = arith.constant 3 : index
    %c0_99 = arith.constant 0 : index
    %c0_100 = arith.constant 0 : index
    %154 = vector.load %arg13[%c3_98, %c0_99, %c0_100] : memref<5x4x4xf32, #tpu.memory_space<vmem>>, vector<1x4x4xf32>
    %155 = vector.shape_cast %154 : vector<1x4x4xf32> to vector<4x4xf32>
    %cst_101 = arith.constant dense<0.000000e+00> : vector<4x128xf32>
    %156 = tpu.matmul %155, %118, %cst_101 {dimension_numbers = #tpu.dot_dimension_numbers<[1], [0], [0], [1], [0, 0, 1, 1], [], []>} : vector<4x4xf32>, vector<4x128xf32>, vector<4x128xf32> -> vector<4x128xf32>
    %157 = arith.addf %153, %156 : vector<4x128xf32>
    %c4_102 = arith.constant 4 : index
    %c0_103 = arith.constant 0 : index
    %c0_104 = arith.constant 0 : index
    %158 = vector.load %arg13[%c4_102, %c0_103, %c0_104] : memref<5x4x4xf32, #tpu.memory_space<vmem>>, vector<1x4x4xf32>
    %159 = vector.shape_cast %158 : vector<1x4x4xf32> to vector<4x4xf32>
    %cst_105 = arith.constant dense<0.000000e+00> : vector<4x128xf32>
    %160 = tpu.matmul %159, %121, %cst_105 {dimension_numbers = #tpu.dot_dimension_numbers<[1], [0], [0], [1], [0, 0, 1, 1], [], []>} : vector<4x4xf32>, vector<4x128xf32>, vector<4x128xf32> -> vector<4x128xf32>
    %161 = arith.addf %157, %160 : vector<4x128xf32>
    %cst_106 = arith.constant 0.000000e+00 : f32
    %162 = vector.broadcast %cst_106 : f32 to vector<16x128xf32>
    %c0_107 = arith.constant 0 : index
    %c0_108 = arith.constant 0 : index
    %c0_109 = arith.constant 0 : index
    %163 = vector.load %arg1[%c0_107, %c0_108, %c0_109] : memref<2x16x64xf32, #tpu.memory_space<vmem>>, vector<1x16x64xf32>
    %164 = vector.shape_cast %163 : vector<1x16x64xf32> to vector<16x64xf32>
    %c0_110 = arith.constant 0 : index
    %c0_111 = arith.constant 0 : index
    %c0_112 = arith.constant 0 : index
    %165 = vector.load %arg2[%c0_110, %c0_111, %c0_112] : memref<2x64x128xf32, #tpu.memory_space<vmem>>, vector<1x64x128xf32>
    %166 = vector.shape_cast %165 : vector<1x64x128xf32> to vector<64x128xf32>
    %cst_113 = arith.constant dense<0.000000e+00> : vector<16x128xf32>
    %167 = tpu.matmul %164, %166, %cst_113 {dimension_numbers = #tpu.dot_dimension_numbers<[1], [0], [0], [1], [0, 0, 1, 1], [], []>} : vector<16x64xf32>, vector<64x128xf32>, vector<16x128xf32> -> vector<16x128xf32>
    %168 = arith.addf %162, %167 : vector<16x128xf32>
    %c1_114 = arith.constant 1 : index
    %c0_115 = arith.constant 0 : index
    %c0_116 = arith.constant 0 : index
    %169 = vector.load %arg1[%c1_114, %c0_115, %c0_116] : memref<2x16x64xf32, #tpu.memory_space<vmem>>, vector<1x16x64xf32>
    %170 = vector.shape_cast %169 : vector<1x16x64xf32> to vector<16x64xf32>
    %c1_117 = arith.constant 1 : index
    %c0_118 = arith.constant 0 : index
    %c0_119 = arith.constant 0 : index
    %171 = vector.load %arg2[%c1_117, %c0_118, %c0_119] : memref<2x64x128xf32, #tpu.memory_space<vmem>>, vector<1x64x128xf32>
    %172 = vector.shape_cast %171 : vector<1x64x128xf32> to vector<64x128xf32>
    %cst_120 = arith.constant dense<0.000000e+00> : vector<16x128xf32>
    %173 = tpu.matmul %170, %172, %cst_120 {dimension_numbers = #tpu.dot_dimension_numbers<[1], [0], [0], [1], [0, 0, 1, 1], [], []>} : vector<16x64xf32>, vector<64x128xf32>, vector<16x128xf32> -> vector<16x128xf32>
    %174 = arith.addf %168, %173 : vector<16x128xf32>
    %c0_121 = arith.constant 0 : index
    %c0_122 = arith.constant 0 : index
    %175 = vector.load %arg5[%c0_121, %c0_122] : memref<16x1xf32, #tpu.memory_space<vmem>>, vector<16x1xf32>
    %c0_123 = arith.constant 0 : index
    %c0_124 = arith.constant 0 : index
    %176 = vector.load %arg6[%c0_123, %c0_124] : memref<16x1xf32, #tpu.memory_space<vmem>>, vector<16x1xf32>
    %cst_125 = arith.constant dense<0.000000e+00> : vector<128xf32>
    %177 = vector.multi_reduction <add>, %174, %cst_125 [0] : vector<16x128xf32> to vector<128xf32>
    %178 = vector.shape_cast %177 : vector<128xf32> to vector<1x128xf32>
    %cst_126 = arith.constant 1.600000e+01 : f32
    %179 = vector.broadcast %cst_126 : f32 to vector<1x128xf32>
    %180 = arith.divf %178, %179 : vector<1x128xf32>
    %181 = vector.broadcast %180 : vector<1x128xf32> to vector<16x128xf32>
    %182 = arith.subf %174, %181 : vector<16x128xf32>
    %183 = arith.mulf %182, %182 : vector<16x128xf32>
    %cst_127 = arith.constant dense<0.000000e+00> : vector<128xf32>
    %184 = vector.multi_reduction <add>, %183, %cst_127 [0] : vector<16x128xf32> to vector<128xf32>
    %185 = vector.shape_cast %184 : vector<128xf32> to vector<1x128xf32>
    %cst_128 = arith.constant 1.600000e+01 : f32
    %186 = vector.broadcast %cst_128 : f32 to vector<1x128xf32>
    %187 = arith.divf %185, %186 : vector<1x128xf32>
    %188 = vector.broadcast %180 : vector<1x128xf32> to vector<16x128xf32>
    %189 = arith.subf %174, %188 : vector<16x128xf32>
    %cst_129 = arith.constant 9.99999974E-6 : f32
    %190 = vector.broadcast %cst_129 : f32 to vector<1x128xf32>
    %191 = arith.addf %187, %190 : vector<1x128xf32>
    %192 = math.rsqrt %191 : vector<1x128xf32>
    %193 = vector.broadcast %192 : vector<1x128xf32> to vector<16x128xf32>
    %194 = arith.mulf %189, %193 : vector<16x128xf32>
    %195 = vector.broadcast %175 : vector<16x1xf32> to vector<16x128xf32>
    %196 = arith.mulf %194, %195 : vector<16x128xf32>
    %197 = vector.broadcast %176 : vector<16x1xf32> to vector<16x128xf32>
    %198 = arith.addf %196, %197 : vector<16x128xf32>
    %c0_130 = arith.constant 0 : index
    %c0_131 = arith.constant 0 : index
    %199 = vector.load %arg7[%c0_130, %c0_131] : memref<4x16xf32, #tpu.memory_space<vmem>>, vector<4x16xf32>
    %cst_132 = arith.constant dense<0.000000e+00> : vector<4x128xf32>
    %200 = tpu.matmul %199, %198, %cst_132 {dimension_numbers = #tpu.dot_dimension_numbers<[1], [0], [0], [1], [0, 0, 1, 1], [], []>} : vector<4x16xf32>, vector<16x128xf32>, vector<4x128xf32> -> vector<4x128xf32>
    %c0_133 = arith.constant 0 : index
    %c0_134 = arith.constant 0 : index
    %201 = vector.load %arg8[%c0_133, %c0_134] : memref<4x1xf32, #tpu.memory_space<vmem>>, vector<4x1xf32>
    %202 = vector.broadcast %201 : vector<4x1xf32> to vector<4x128xf32>
    %203 = arith.addf %200, %202 : vector<4x128xf32>
    %cst_135 = arith.constant 5.000000e-01 : f32
    %204 = vector.broadcast %cst_135 : f32 to vector<4x128xf32>
    %205 = arith.mulf %204, %203 : vector<4x128xf32>
    %cst_136 = arith.constant 0.707106769 : f32
    %206 = vector.broadcast %cst_136 : f32 to vector<4x128xf32>
    %207 = arith.mulf %203, %206 : vector<4x128xf32>
    %cst_137 = arith.constant 0.000000e+00 : f32
    %208 = vector.broadcast %cst_137 : f32 to vector<4x128xf32>
    %209 = arith.cmpf oge, %207, %208 : vector<4x128xf32>
    %cst_138 = arith.constant 1.000000e+00 : f32
    %cst_139 = arith.constant -1.000000e+00 : f32
    %210 = vector.broadcast %cst_138 : f32 to vector<4x128xf32>
    %211 = vector.broadcast %cst_139 : f32 to vector<4x128xf32>
    %212 = arith.select %209, %210, %211 : vector<4x128xi1>, vector<4x128xf32>
    %213 = math.absf %207 : vector<4x128xf32>
    %cst_140 = arith.constant 0.327591091 : f32
    %214 = vector.broadcast %cst_140 : f32 to vector<4x128xf32>
    %215 = arith.mulf %214, %213 : vector<4x128xf32>
    %cst_141 = arith.constant 1.000000e+00 : f32
    %216 = vector.broadcast %cst_141 : f32 to vector<4x128xf32>
    %217 = arith.addf %216, %215 : vector<4x128xf32>
    %cst_142 = arith.constant 1.000000e+00 : f32
    %218 = vector.broadcast %cst_142 : f32 to vector<4x128xf32>
    %219 = arith.divf %218, %217 : vector<4x128xf32>
    %cst_143 = arith.constant 1.06140542 : f32
    %220 = vector.broadcast %cst_143 : f32 to vector<4x128xf32>
    %221 = arith.mulf %220, %219 : vector<4x128xf32>
    %cst_144 = arith.constant -1.45315206 : f32
    %222 = vector.broadcast %cst_144 : f32 to vector<4x128xf32>
    %223 = arith.addf %221, %222 : vector<4x128xf32>
    %224 = arith.mulf %223, %219 : vector<4x128xf32>
    %cst_145 = arith.constant 1.42141378 : f32
    %225 = vector.broadcast %cst_145 : f32 to vector<4x128xf32>
    %226 = arith.addf %224, %225 : vector<4x128xf32>
    %227 = arith.mulf %226, %219 : vector<4x128xf32>
    %cst_146 = arith.constant -0.284496725 : f32
    %228 = vector.broadcast %cst_146 : f32 to vector<4x128xf32>
    %229 = arith.addf %227, %228 : vector<4x128xf32>
    %230 = arith.mulf %229, %219 : vector<4x128xf32>
    %cst_147 = arith.constant 0.254829586 : f32
    %231 = vector.broadcast %cst_147 : f32 to vector<4x128xf32>
    %232 = arith.addf %230, %231 : vector<4x128xf32>
    %233 = arith.mulf %232, %219 : vector<4x128xf32>
    %cst_148 = arith.constant 0.000000e+00 : f32
    %234 = vector.broadcast %cst_148 : f32 to vector<4x128xf32>
    %235 = arith.subf %234, %213 : vector<4x128xf32>
    %236 = arith.mulf %235, %213 : vector<4x128xf32>
    %237 = math.exp %236 : vector<4x128xf32>
    %238 = arith.mulf %233, %237 : vector<4x128xf32>
    %cst_149 = arith.constant 1.000000e+00 : f32
    %239 = vector.broadcast %cst_149 : f32 to vector<4x128xf32>
    %240 = arith.subf %239, %238 : vector<4x128xf32>
    %241 = arith.mulf %212, %240 : vector<4x128xf32>
    %cst_150 = arith.constant 1.000000e+00 : f32
    %242 = vector.broadcast %cst_150 : f32 to vector<4x128xf32>
    %243 = arith.addf %242, %241 : vector<4x128xf32>
    %244 = arith.mulf %205, %243 : vector<4x128xf32>
    %c0_151 = arith.constant 0 : index
    %c0_152 = arith.constant 0 : index
    %245 = vector.load %arg9[%c0_151, %c0_152] : memref<4x1xf32, #tpu.memory_space<vmem>>, vector<4x1xf32>
    %c0_153 = arith.constant 0 : index
    %c0_154 = arith.constant 0 : index
    %246 = vector.load %arg10[%c0_153, %c0_154] : memref<4x1xf32, #tpu.memory_space<vmem>>, vector<4x1xf32>
    %cst_155 = arith.constant dense<0.000000e+00> : vector<128xf32>
    %247 = vector.multi_reduction <add>, %244, %cst_155 [0] : vector<4x128xf32> to vector<128xf32>
    %248 = vector.shape_cast %247 : vector<128xf32> to vector<1x128xf32>
    %cst_156 = arith.constant 4.000000e+00 : f32
    %249 = vector.broadcast %cst_156 : f32 to vector<1x128xf32>
    %250 = arith.divf %248, %249 : vector<1x128xf32>
    %251 = vector.broadcast %250 : vector<1x128xf32> to vector<4x128xf32>
    %252 = arith.subf %244, %251 : vector<4x128xf32>
    %253 = arith.mulf %252, %252 : vector<4x128xf32>
    %cst_157 = arith.constant dense<0.000000e+00> : vector<128xf32>
    %254 = vector.multi_reduction <add>, %253, %cst_157 [0] : vector<4x128xf32> to vector<128xf32>
    %255 = vector.shape_cast %254 : vector<128xf32> to vector<1x128xf32>
    %cst_158 = arith.constant 4.000000e+00 : f32
    %256 = vector.broadcast %cst_158 : f32 to vector<1x128xf32>
    %257 = arith.divf %255, %256 : vector<1x128xf32>
    %258 = vector.broadcast %250 : vector<1x128xf32> to vector<4x128xf32>
    %259 = arith.subf %244, %258 : vector<4x128xf32>
    %cst_159 = arith.constant 9.99999974E-6 : f32
    %260 = vector.broadcast %cst_159 : f32 to vector<1x128xf32>
    %261 = arith.addf %257, %260 : vector<1x128xf32>
    %262 = math.rsqrt %261 : vector<1x128xf32>
    %263 = vector.broadcast %262 : vector<1x128xf32> to vector<4x128xf32>
    %264 = arith.mulf %259, %263 : vector<4x128xf32>
    %265 = vector.broadcast %245 : vector<4x1xf32> to vector<4x128xf32>
    %266 = arith.mulf %264, %265 : vector<4x128xf32>
    %267 = vector.broadcast %246 : vector<4x1xf32> to vector<4x128xf32>
    %268 = arith.addf %266, %267 : vector<4x128xf32>
    %c0_160 = arith.constant 0 : index
    %c0_161 = arith.constant 0 : index
    %c0_162 = arith.constant 0 : index
    %269 = vector.load %arg3[%c0_160, %c0_161, %c0_162] : memref<5x128x128xf32, #tpu.memory_space<vmem>>, vector<1x128x128xf32>
    %270 = vector.shape_cast %269 : vector<1x128x128xf32> to vector<128x128xf32>
    %cst_163 = arith.constant dense<0.000000e+00> : vector<4x128xf32>
    %271 = tpu.matmul %268, %270, %cst_163 {dimension_numbers = #tpu.dot_dimension_numbers<[1], [0], [0], [1], [0, 0, 1, 1], [], []>} : vector<4x128xf32>, vector<128x128xf32>, vector<4x128xf32> -> vector<4x128xf32>
    %c1_164 = arith.constant 1 : index
    %c0_165 = arith.constant 0 : index
    %c0_166 = arith.constant 0 : index
    %272 = vector.load %arg3[%c1_164, %c0_165, %c0_166] : memref<5x128x128xf32, #tpu.memory_space<vmem>>, vector<1x128x128xf32>
    %273 = vector.shape_cast %272 : vector<1x128x128xf32> to vector<128x128xf32>
    %cst_167 = arith.constant dense<0.000000e+00> : vector<4x128xf32>
    %274 = tpu.matmul %268, %273, %cst_167 {dimension_numbers = #tpu.dot_dimension_numbers<[1], [0], [0], [1], [0, 0, 1, 1], [], []>} : vector<4x128xf32>, vector<128x128xf32>, vector<4x128xf32> -> vector<4x128xf32>
    %c2_168 = arith.constant 2 : index
    %c0_169 = arith.constant 0 : index
    %c0_170 = arith.constant 0 : index
    %275 = vector.load %arg3[%c2_168, %c0_169, %c0_170] : memref<5x128x128xf32, #tpu.memory_space<vmem>>, vector<1x128x128xf32>
    %276 = vector.shape_cast %275 : vector<1x128x128xf32> to vector<128x128xf32>
    %cst_171 = arith.constant dense<0.000000e+00> : vector<4x128xf32>
    %277 = tpu.matmul %268, %276, %cst_171 {dimension_numbers = #tpu.dot_dimension_numbers<[1], [0], [0], [1], [0, 0, 1, 1], [], []>} : vector<4x128xf32>, vector<128x128xf32>, vector<4x128xf32> -> vector<4x128xf32>
    %c3_172 = arith.constant 3 : index
    %c0_173 = arith.constant 0 : index
    %c0_174 = arith.constant 0 : index
    %278 = vector.load %arg3[%c3_172, %c0_173, %c0_174] : memref<5x128x128xf32, #tpu.memory_space<vmem>>, vector<1x128x128xf32>
    %279 = vector.shape_cast %278 : vector<1x128x128xf32> to vector<128x128xf32>
    %cst_175 = arith.constant dense<0.000000e+00> : vector<4x128xf32>
    %280 = tpu.matmul %268, %279, %cst_175 {dimension_numbers = #tpu.dot_dimension_numbers<[1], [0], [0], [1], [0, 0, 1, 1], [], []>} : vector<4x128xf32>, vector<128x128xf32>, vector<4x128xf32> -> vector<4x128xf32>
    %c4_176 = arith.constant 4 : index
    %c0_177 = arith.constant 0 : index
    %c0_178 = arith.constant 0 : index
    %281 = vector.load %arg3[%c4_176, %c0_177, %c0_178] : memref<5x128x128xf32, #tpu.memory_space<vmem>>, vector<1x128x128xf32>
    %282 = vector.shape_cast %281 : vector<1x128x128xf32> to vector<128x128xf32>
    %cst_179 = arith.constant dense<0.000000e+00> : vector<4x128xf32>
    %283 = tpu.matmul %268, %282, %cst_179 {dimension_numbers = #tpu.dot_dimension_numbers<[1], [0], [0], [1], [0, 0, 1, 1], [], []>} : vector<4x128xf32>, vector<128x128xf32>, vector<4x128xf32> -> vector<4x128xf32>
    %c0_180 = arith.constant 0 : index
    %c0_181 = arith.constant 0 : index
    %284 = vector.load %arg12[%c0_180, %c0_181] : memref<4x1xf32, #tpu.memory_space<vmem>>, vector<4x1xf32>
    %cst_182 = arith.constant 0.000000e+00 : f32
    %285 = vector.broadcast %cst_182 : f32 to vector<4x128xf32>
    %286 = vector.broadcast %284 : vector<4x1xf32> to vector<4x128xf32>
    %287 = arith.addf %286, %285 : vector<4x128xf32>
    %c0_183 = arith.constant 0 : index
    %c0_184 = arith.constant 0 : index
    %c0_185 = arith.constant 0 : index
    %288 = vector.load %arg11[%c0_183, %c0_184, %c0_185] : memref<3x4x4xf32, #tpu.memory_space<vmem>>, vector<1x4x4xf32>
    %289 = vector.shape_cast %288 : vector<1x4x4xf32> to vector<4x4xf32>
    %cst_186 = arith.constant dense<0.000000e+00> : vector<4x128xf32>
    %290 = tpu.matmul %289, %274, %cst_186 {dimension_numbers = #tpu.dot_dimension_numbers<[1], [0], [0], [1], [0, 0, 1, 1], [], []>} : vector<4x4xf32>, vector<4x128xf32>, vector<4x128xf32> -> vector<4x128xf32>
    %291 = arith.addf %287, %290 : vector<4x128xf32>
    %c1_187 = arith.constant 1 : index
    %c0_188 = arith.constant 0 : index
    %c0_189 = arith.constant 0 : index
    %292 = vector.load %arg11[%c1_187, %c0_188, %c0_189] : memref<3x4x4xf32, #tpu.memory_space<vmem>>, vector<1x4x4xf32>
    %293 = vector.shape_cast %292 : vector<1x4x4xf32> to vector<4x4xf32>
    %cst_190 = arith.constant dense<0.000000e+00> : vector<4x128xf32>
    %294 = tpu.matmul %293, %277, %cst_190 {dimension_numbers = #tpu.dot_dimension_numbers<[1], [0], [0], [1], [0, 0, 1, 1], [], []>} : vector<4x4xf32>, vector<4x128xf32>, vector<4x128xf32> -> vector<4x128xf32>
    %295 = arith.addf %291, %294 : vector<4x128xf32>
    %c2_191 = arith.constant 2 : index
    %c0_192 = arith.constant 0 : index
    %c0_193 = arith.constant 0 : index
    %296 = vector.load %arg11[%c2_191, %c0_192, %c0_193] : memref<3x4x4xf32, #tpu.memory_space<vmem>>, vector<1x4x4xf32>
    %297 = vector.shape_cast %296 : vector<1x4x4xf32> to vector<4x4xf32>
    %cst_194 = arith.constant dense<0.000000e+00> : vector<4x128xf32>
    %298 = tpu.matmul %297, %280, %cst_194 {dimension_numbers = #tpu.dot_dimension_numbers<[1], [0], [0], [1], [0, 0, 1, 1], [], []>} : vector<4x4xf32>, vector<4x128xf32>, vector<4x128xf32> -> vector<4x128xf32>
    %299 = arith.addf %295, %298 : vector<4x128xf32>
    %c0_195 = arith.constant 0 : index
    %c0_196 = arith.constant 0 : index
    %300 = vector.load %arg14[%c0_195, %c0_196] : memref<4x1xf32, #tpu.memory_space<vmem>>, vector<4x1xf32>
    %cst_197 = arith.constant 0.000000e+00 : f32
    %301 = vector.broadcast %cst_197 : f32 to vector<4x128xf32>
    %302 = vector.broadcast %300 : vector<4x1xf32> to vector<4x128xf32>
    %303 = arith.addf %302, %301 : vector<4x128xf32>
    %c0_198 = arith.constant 0 : index
    %c0_199 = arith.constant 0 : index
    %c0_200 = arith.constant 0 : index
    %304 = vector.load %arg13[%c0_198, %c0_199, %c0_200] : memref<5x4x4xf32, #tpu.memory_space<vmem>>, vector<1x4x4xf32>
    %305 = vector.shape_cast %304 : vector<1x4x4xf32> to vector<4x4xf32>
    %cst_201 = arith.constant dense<0.000000e+00> : vector<4x128xf32>
    %306 = tpu.matmul %305, %271, %cst_201 {dimension_numbers = #tpu.dot_dimension_numbers<[1], [0], [0], [1], [0, 0, 1, 1], [], []>} : vector<4x4xf32>, vector<4x128xf32>, vector<4x128xf32> -> vector<4x128xf32>
    %307 = arith.addf %303, %306 : vector<4x128xf32>
    %c1_202 = arith.constant 1 : index
    %c0_203 = arith.constant 0 : index
    %c0_204 = arith.constant 0 : index
    %308 = vector.load %arg13[%c1_202, %c0_203, %c0_204] : memref<5x4x4xf32, #tpu.memory_space<vmem>>, vector<1x4x4xf32>
    %309 = vector.shape_cast %308 : vector<1x4x4xf32> to vector<4x4xf32>
    %cst_205 = arith.constant dense<0.000000e+00> : vector<4x128xf32>
    %310 = tpu.matmul %309, %274, %cst_205 {dimension_numbers = #tpu.dot_dimension_numbers<[1], [0], [0], [1], [0, 0, 1, 1], [], []>} : vector<4x4xf32>, vector<4x128xf32>, vector<4x128xf32> -> vector<4x128xf32>
    %311 = arith.addf %307, %310 : vector<4x128xf32>
    %c2_206 = arith.constant 2 : index
    %c0_207 = arith.constant 0 : index
    %c0_208 = arith.constant 0 : index
    %312 = vector.load %arg13[%c2_206, %c0_207, %c0_208] : memref<5x4x4xf32, #tpu.memory_space<vmem>>, vector<1x4x4xf32>
    %313 = vector.shape_cast %312 : vector<1x4x4xf32> to vector<4x4xf32>
    %cst_209 = arith.constant dense<0.000000e+00> : vector<4x128xf32>
    %314 = tpu.matmul %313, %277, %cst_209 {dimension_numbers = #tpu.dot_dimension_numbers<[1], [0], [0], [1], [0, 0, 1, 1], [], []>} : vector<4x4xf32>, vector<4x128xf32>, vector<4x128xf32> -> vector<4x128xf32>
    %315 = arith.addf %311, %314 : vector<4x128xf32>
    %c3_210 = arith.constant 3 : index
    %c0_211 = arith.constant 0 : index
    %c0_212 = arith.constant 0 : index
    %316 = vector.load %arg13[%c3_210, %c0_211, %c0_212] : memref<5x4x4xf32, #tpu.memory_space<vmem>>, vector<1x4x4xf32>
    %317 = vector.shape_cast %316 : vector<1x4x4xf32> to vector<4x4xf32>
    %cst_213 = arith.constant dense<0.000000e+00> : vector<4x128xf32>
    %318 = tpu.matmul %317, %280, %cst_213 {dimension_numbers = #tpu.dot_dimension_numbers<[1], [0], [0], [1], [0, 0, 1, 1], [], []>} : vector<4x4xf32>, vector<4x128xf32>, vector<4x128xf32> -> vector<4x128xf32>
    %319 = arith.addf %315, %318 : vector<4x128xf32>
    %c4_214 = arith.constant 4 : index
    %c0_215 = arith.constant 0 : index
    %c0_216 = arith.constant 0 : index
    %320 = vector.load %arg13[%c4_214, %c0_215, %c0_216] : memref<5x4x4xf32, #tpu.memory_space<vmem>>, vector<1x4x4xf32>
    %321 = vector.shape_cast %320 : vector<1x4x4xf32> to vector<4x4xf32>
    %cst_217 = arith.constant dense<0.000000e+00> : vector<4x128xf32>
    %322 = tpu.matmul %321, %283, %cst_217 {dimension_numbers = #tpu.dot_dimension_numbers<[1], [0], [0], [1], [0, 0, 1, 1], [], []>} : vector<4x4xf32>, vector<4x128xf32>, vector<4x128xf32> -> vector<4x128xf32>
    %323 = arith.addf %319, %322 : vector<4x128xf32>
    %324 = arith.addf %137, %299 : vector<4x128xf32>
    %325 = arith.mulf %137, %299 : vector<4x128xf32>
    %326 = arith.addf %324, %325 : vector<4x128xf32>
    %c0_218 = arith.constant 0 : index
    %c0_219 = arith.constant 0 : index
    %327 = vector.load %arg15[%c0_218, %c0_219] : memref<16x4xf32, #tpu.memory_space<vmem>>, vector<16x4xf32>
    %cst_220 = arith.constant dense<0.000000e+00> : vector<16x128xf32>
    %328 = tpu.matmul %327, %326, %cst_220 {dimension_numbers = #tpu.dot_dimension_numbers<[1], [0], [0], [1], [0, 0, 1, 1], [], []>} : vector<16x4xf32>, vector<4x128xf32>, vector<16x128xf32> -> vector<16x128xf32>
    %c0_221 = arith.constant 0 : index
    %c0_222 = arith.constant 0 : index
    %329 = vector.load %arg16[%c0_221, %c0_222] : memref<16x1xf32, #tpu.memory_space<vmem>>, vector<16x1xf32>
    %330 = vector.broadcast %329 : vector<16x1xf32> to vector<16x128xf32>
    %331 = arith.addf %328, %330 : vector<16x128xf32>
    %c0_223 = arith.constant 0 : index
    %c0_224 = arith.constant 0 : index
    %332 = vector.load %arg17[%c0_223, %c0_224] : memref<16x1xf32, #tpu.memory_space<vmem>>, vector<16x1xf32>
    %333 = vector.broadcast %332 : vector<16x1xf32> to vector<16x128xf32>
    %334 = arith.mulf %331, %333 : vector<16x128xf32>
    %c0_225 = arith.constant 0 : index
    %c0_226 = arith.constant 0 : index
    %335 = vector.load %arg18[%c0_225, %c0_226] : memref<16x1xf32, #tpu.memory_space<vmem>>, vector<16x1xf32>
    %336 = vector.broadcast %335 : vector<16x1xf32> to vector<16x128xf32>
    %337 = arith.addf %334, %336 : vector<16x128xf32>
    %c0_227 = arith.constant 0 : index
    %c0_228 = arith.constant 0 : index
    %338 = vector.load %arg19[%c0_227, %c0_228] : memref<16x16xf32, #tpu.memory_space<vmem>>, vector<16x16xf32>
    %cst_229 = arith.constant dense<0.000000e+00> : vector<16x128xf32>
    %339 = tpu.matmul %338, %337, %cst_229 {dimension_numbers = #tpu.dot_dimension_numbers<[1], [0], [0], [1], [0, 0, 1, 1], [], []>} : vector<16x16xf32>, vector<16x128xf32>, vector<16x128xf32> -> vector<16x128xf32>
    %c0_230 = arith.constant 0 : index
    %c0_231 = arith.constant 0 : index
    %340 = vector.load %arg20[%c0_230, %c0_231] : memref<16x1xf32, #tpu.memory_space<vmem>>, vector<16x1xf32>
    %341 = vector.broadcast %340 : vector<16x1xf32> to vector<16x128xf32>
    %342 = arith.addf %339, %341 : vector<16x128xf32>
    %343 = arith.addf %161, %323 : vector<4x128xf32>
    %344 = arith.mulf %161, %323 : vector<4x128xf32>
    %345 = arith.addf %343, %344 : vector<4x128xf32>
    %c0_232 = arith.constant 0 : index
    %c0_233 = arith.constant 0 : index
    %346 = vector.load %arg15[%c0_232, %c0_233] : memref<16x4xf32, #tpu.memory_space<vmem>>, vector<16x4xf32>
    %cst_234 = arith.constant dense<0.000000e+00> : vector<16x128xf32>
    %347 = tpu.matmul %346, %345, %cst_234 {dimension_numbers = #tpu.dot_dimension_numbers<[1], [0], [0], [1], [0, 0, 1, 1], [], []>} : vector<16x4xf32>, vector<4x128xf32>, vector<16x128xf32> -> vector<16x128xf32>
    %c0_235 = arith.constant 0 : index
    %c0_236 = arith.constant 0 : index
    %348 = vector.load %arg16[%c0_235, %c0_236] : memref<16x1xf32, #tpu.memory_space<vmem>>, vector<16x1xf32>
    %349 = vector.broadcast %348 : vector<16x1xf32> to vector<16x128xf32>
    %350 = arith.addf %347, %349 : vector<16x128xf32>
    %c0_237 = arith.constant 0 : index
    %c0_238 = arith.constant 0 : index
    %351 = vector.load %arg17[%c0_237, %c0_238] : memref<16x1xf32, #tpu.memory_space<vmem>>, vector<16x1xf32>
    %352 = vector.broadcast %351 : vector<16x1xf32> to vector<16x128xf32>
    %353 = arith.mulf %350, %352 : vector<16x128xf32>
    %c0_239 = arith.constant 0 : index
    %c0_240 = arith.constant 0 : index
    %354 = vector.load %arg18[%c0_239, %c0_240] : memref<16x1xf32, #tpu.memory_space<vmem>>, vector<16x1xf32>
    %355 = vector.broadcast %354 : vector<16x1xf32> to vector<16x128xf32>
    %356 = arith.addf %353, %355 : vector<16x128xf32>
    %c0_241 = arith.constant 0 : index
    %c0_242 = arith.constant 0 : index
    %357 = vector.load %arg19[%c0_241, %c0_242] : memref<16x16xf32, #tpu.memory_space<vmem>>, vector<16x16xf32>
    %cst_243 = arith.constant dense<0.000000e+00> : vector<16x128xf32>
    %358 = tpu.matmul %357, %356, %cst_243 {dimension_numbers = #tpu.dot_dimension_numbers<[1], [0], [0], [1], [0, 0, 1, 1], [], []>} : vector<16x16xf32>, vector<16x128xf32>, vector<16x128xf32> -> vector<16x128xf32>
    %c0_244 = arith.constant 0 : index
    %c0_245 = arith.constant 0 : index
    %359 = vector.load %arg20[%c0_244, %c0_245] : memref<16x1xf32, #tpu.memory_space<vmem>>, vector<16x1xf32>
    %360 = vector.broadcast %359 : vector<16x1xf32> to vector<16x128xf32>
    %361 = arith.addf %358, %360 : vector<16x128xf32>
    %c0_246 = arith.constant 0 : index
    %c0_247 = arith.constant 0 : index
    %362 = vector.load %arg23[%c0_246, %c0_247] : memref<16x1xf32, #tpu.memory_space<vmem>>, vector<16x1xf32>
    %cst_248 = arith.constant 0.000000e+00 : f32
    %363 = vector.broadcast %cst_248 : f32 to vector<16x128xf32>
    %364 = vector.broadcast %362 : vector<16x1xf32> to vector<16x128xf32>
    %365 = arith.addf %364, %363 : vector<16x128xf32>
    %c0_249 = arith.constant 0 : index
    %c0_250 = arith.constant 0 : index
    %c0_251 = arith.constant 0 : index
    %366 = vector.load %arg21[%c0_249, %c0_250, %c0_251] : memref<9x16x16xf32, #tpu.memory_space<vmem>>, vector<1x16x16xf32>
    %367 = vector.shape_cast %366 : vector<1x16x16xf32> to vector<16x16xf32>
    %cst_252 = arith.constant dense<0.000000e+00> : vector<16x128xf32>
    %368 = tpu.matmul %367, %342, %cst_252 {dimension_numbers = #tpu.dot_dimension_numbers<[1], [0], [0], [1], [0, 0, 1, 1], [], []>} : vector<16x16xf32>, vector<16x128xf32>, vector<16x128xf32> -> vector<16x128xf32>
    %c0_253 = arith.constant 0 : index
    %c0_254 = arith.constant 0 : index
    %c0_255 = arith.constant 0 : index
    %369 = vector.load %arg22[%c0_253, %c0_254, %c0_255] : memref<9x16x16xf32, #tpu.memory_space<vmem>>, vector<1x16x16xf32>
    %370 = vector.shape_cast %369 : vector<1x16x16xf32> to vector<16x16xf32>
    %cst_256 = arith.constant dense<0.000000e+00> : vector<16x128xf32>
    %371 = tpu.matmul %370, %361, %cst_256 {dimension_numbers = #tpu.dot_dimension_numbers<[1], [0], [0], [1], [0, 0, 1, 1], [], []>} : vector<16x16xf32>, vector<16x128xf32>, vector<16x128xf32> -> vector<16x128xf32>
    %372 = arith.addf %368, %371 : vector<16x128xf32>
    %c0_257 = arith.constant 0 : index
    %c0_258 = arith.constant 0 : index
    %c0_259 = arith.constant 0 : index
    %373 = vector.load %arg4[%c0_257, %c0_258, %c0_259] : memref<9x128x128xf32, #tpu.memory_space<vmem>>, vector<1x128x128xf32>
    %374 = vector.shape_cast %373 : vector<1x128x128xf32> to vector<128x128xf32>
    %cst_260 = arith.constant dense<0.000000e+00> : vector<16x128xf32>
    %375 = tpu.matmul %372, %374, %cst_260 {dimension_numbers = #tpu.dot_dimension_numbers<[1], [0], [0], [1], [0, 0, 1, 1], [], []>} : vector<16x128xf32>, vector<128x128xf32>, vector<16x128xf32> -> vector<16x128xf32>
    %376 = arith.addf %365, %375 : vector<16x128xf32>
    %c1_261 = arith.constant 1 : index
    %c0_262 = arith.constant 0 : index
    %c0_263 = arith.constant 0 : index
    %377 = vector.load %arg21[%c1_261, %c0_262, %c0_263] : memref<9x16x16xf32, #tpu.memory_space<vmem>>, vector<1x16x16xf32>
    %378 = vector.shape_cast %377 : vector<1x16x16xf32> to vector<16x16xf32>
    %cst_264 = arith.constant dense<0.000000e+00> : vector<16x128xf32>
    %379 = tpu.matmul %378, %342, %cst_264 {dimension_numbers = #tpu.dot_dimension_numbers<[1], [0], [0], [1], [0, 0, 1, 1], [], []>} : vector<16x16xf32>, vector<16x128xf32>, vector<16x128xf32> -> vector<16x128xf32>
    %c1_265 = arith.constant 1 : index
    %c0_266 = arith.constant 0 : index
    %c0_267 = arith.constant 0 : index
    %380 = vector.load %arg22[%c1_265, %c0_266, %c0_267] : memref<9x16x16xf32, #tpu.memory_space<vmem>>, vector<1x16x16xf32>
    %381 = vector.shape_cast %380 : vector<1x16x16xf32> to vector<16x16xf32>
    %cst_268 = arith.constant dense<0.000000e+00> : vector<16x128xf32>
    %382 = tpu.matmul %381, %361, %cst_268 {dimension_numbers = #tpu.dot_dimension_numbers<[1], [0], [0], [1], [0, 0, 1, 1], [], []>} : vector<16x16xf32>, vector<16x128xf32>, vector<16x128xf32> -> vector<16x128xf32>
    %383 = arith.addf %379, %382 : vector<16x128xf32>
    %c1_269 = arith.constant 1 : index
    %c0_270 = arith.constant 0 : index
    %c0_271 = arith.constant 0 : index
    %384 = vector.load %arg4[%c1_269, %c0_270, %c0_271] : memref<9x128x128xf32, #tpu.memory_space<vmem>>, vector<1x128x128xf32>
    %385 = vector.shape_cast %384 : vector<1x128x128xf32> to vector<128x128xf32>
    %cst_272 = arith.constant dense<0.000000e+00> : vector<16x128xf32>
    %386 = tpu.matmul %383, %385, %cst_272 {dimension_numbers = #tpu.dot_dimension_numbers<[1], [0], [0], [1], [0, 0, 1, 1], [], []>} : vector<16x128xf32>, vector<128x128xf32>, vector<16x128xf32> -> vector<16x128xf32>
    %387 = arith.addf %376, %386 : vector<16x128xf32>
    %c2_273 = arith.constant 2 : index
    %c0_274 = arith.constant 0 : index
    %c0_275 = arith.constant 0 : index
    %388 = vector.load %arg21[%c2_273, %c0_274, %c0_275] : memref<9x16x16xf32, #tpu.memory_space<vmem>>, vector<1x16x16xf32>
    %389 = vector.shape_cast %388 : vector<1x16x16xf32> to vector<16x16xf32>
    %cst_276 = arith.constant dense<0.000000e+00> : vector<16x128xf32>
    %390 = tpu.matmul %389, %342, %cst_276 {dimension_numbers = #tpu.dot_dimension_numbers<[1], [0], [0], [1], [0, 0, 1, 1], [], []>} : vector<16x16xf32>, vector<16x128xf32>, vector<16x128xf32> -> vector<16x128xf32>
    %c2_277 = arith.constant 2 : index
    %c0_278 = arith.constant 0 : index
    %c0_279 = arith.constant 0 : index
    %391 = vector.load %arg22[%c2_277, %c0_278, %c0_279] : memref<9x16x16xf32, #tpu.memory_space<vmem>>, vector<1x16x16xf32>
    %392 = vector.shape_cast %391 : vector<1x16x16xf32> to vector<16x16xf32>
    %cst_280 = arith.constant dense<0.000000e+00> : vector<16x128xf32>
    %393 = tpu.matmul %392, %361, %cst_280 {dimension_numbers = #tpu.dot_dimension_numbers<[1], [0], [0], [1], [0, 0, 1, 1], [], []>} : vector<16x16xf32>, vector<16x128xf32>, vector<16x128xf32> -> vector<16x128xf32>
    %394 = arith.addf %390, %393 : vector<16x128xf32>
    %c2_281 = arith.constant 2 : index
    %c0_282 = arith.constant 0 : index
    %c0_283 = arith.constant 0 : index
    %395 = vector.load %arg4[%c2_281, %c0_282, %c0_283] : memref<9x128x128xf32, #tpu.memory_space<vmem>>, vector<1x128x128xf32>
    %396 = vector.shape_cast %395 : vector<1x128x128xf32> to vector<128x128xf32>
    %cst_284 = arith.constant dense<0.000000e+00> : vector<16x128xf32>
    %397 = tpu.matmul %394, %396, %cst_284 {dimension_numbers = #tpu.dot_dimension_numbers<[1], [0], [0], [1], [0, 0, 1, 1], [], []>} : vector<16x128xf32>, vector<128x128xf32>, vector<16x128xf32> -> vector<16x128xf32>
    %398 = arith.addf %387, %397 : vector<16x128xf32>
    %c3_285 = arith.constant 3 : index
    %c0_286 = arith.constant 0 : index
    %c0_287 = arith.constant 0 : index
    %399 = vector.load %arg21[%c3_285, %c0_286, %c0_287] : memref<9x16x16xf32, #tpu.memory_space<vmem>>, vector<1x16x16xf32>
    %400 = vector.shape_cast %399 : vector<1x16x16xf32> to vector<16x16xf32>
    %cst_288 = arith.constant dense<0.000000e+00> : vector<16x128xf32>
    %401 = tpu.matmul %400, %342, %cst_288 {dimension_numbers = #tpu.dot_dimension_numbers<[1], [0], [0], [1], [0, 0, 1, 1], [], []>} : vector<16x16xf32>, vector<16x128xf32>, vector<16x128xf32> -> vector<16x128xf32>
    %c3_289 = arith.constant 3 : index
    %c0_290 = arith.constant 0 : index
    %c0_291 = arith.constant 0 : index
    %402 = vector.load %arg22[%c3_289, %c0_290, %c0_291] : memref<9x16x16xf32, #tpu.memory_space<vmem>>, vector<1x16x16xf32>
    %403 = vector.shape_cast %402 : vector<1x16x16xf32> to vector<16x16xf32>
    %cst_292 = arith.constant dense<0.000000e+00> : vector<16x128xf32>
    %404 = tpu.matmul %403, %361, %cst_292 {dimension_numbers = #tpu.dot_dimension_numbers<[1], [0], [0], [1], [0, 0, 1, 1], [], []>} : vector<16x16xf32>, vector<16x128xf32>, vector<16x128xf32> -> vector<16x128xf32>
    %405 = arith.addf %401, %404 : vector<16x128xf32>
    %c3_293 = arith.constant 3 : index
    %c0_294 = arith.constant 0 : index
    %c0_295 = arith.constant 0 : index
    %406 = vector.load %arg4[%c3_293, %c0_294, %c0_295] : memref<9x128x128xf32, #tpu.memory_space<vmem>>, vector<1x128x128xf32>
    %407 = vector.shape_cast %406 : vector<1x128x128xf32> to vector<128x128xf32>
    %cst_296 = arith.constant dense<0.000000e+00> : vector<16x128xf32>
    %408 = tpu.matmul %405, %407, %cst_296 {dimension_numbers = #tpu.dot_dimension_numbers<[1], [0], [0], [1], [0, 0, 1, 1], [], []>} : vector<16x128xf32>, vector<128x128xf32>, vector<16x128xf32> -> vector<16x128xf32>
    %409 = arith.addf %398, %408 : vector<16x128xf32>
    %c4_297 = arith.constant 4 : index
    %c0_298 = arith.constant 0 : index
    %c0_299 = arith.constant 0 : index
    %410 = vector.load %arg21[%c4_297, %c0_298, %c0_299] : memref<9x16x16xf32, #tpu.memory_space<vmem>>, vector<1x16x16xf32>
    %411 = vector.shape_cast %410 : vector<1x16x16xf32> to vector<16x16xf32>
    %cst_300 = arith.constant dense<0.000000e+00> : vector<16x128xf32>
    %412 = tpu.matmul %411, %342, %cst_300 {dimension_numbers = #tpu.dot_dimension_numbers<[1], [0], [0], [1], [0, 0, 1, 1], [], []>} : vector<16x16xf32>, vector<16x128xf32>, vector<16x128xf32> -> vector<16x128xf32>
    %c4_301 = arith.constant 4 : index
    %c0_302 = arith.constant 0 : index
    %c0_303 = arith.constant 0 : index
    %413 = vector.load %arg22[%c4_301, %c0_302, %c0_303] : memref<9x16x16xf32, #tpu.memory_space<vmem>>, vector<1x16x16xf32>
    %414 = vector.shape_cast %413 : vector<1x16x16xf32> to vector<16x16xf32>
    %cst_304 = arith.constant dense<0.000000e+00> : vector<16x128xf32>
    %415 = tpu.matmul %414, %361, %cst_304 {dimension_numbers = #tpu.dot_dimension_numbers<[1], [0], [0], [1], [0, 0, 1, 1], [], []>} : vector<16x16xf32>, vector<16x128xf32>, vector<16x128xf32> -> vector<16x128xf32>
    %416 = arith.addf %412, %415 : vector<16x128xf32>
    %c4_305 = arith.constant 4 : index
    %c0_306 = arith.constant 0 : index
    %c0_307 = arith.constant 0 : index
    %417 = vector.load %arg4[%c4_305, %c0_306, %c0_307] : memref<9x128x128xf32, #tpu.memory_space<vmem>>, vector<1x128x128xf32>
    %418 = vector.shape_cast %417 : vector<1x128x128xf32> to vector<128x128xf32>
    %cst_308 = arith.constant dense<0.000000e+00> : vector<16x128xf32>
    %419 = tpu.matmul %416, %418, %cst_308 {dimension_numbers = #tpu.dot_dimension_numbers<[1], [0], [0], [1], [0, 0, 1, 1], [], []>} : vector<16x128xf32>, vector<128x128xf32>, vector<16x128xf32> -> vector<16x128xf32>
    %420 = arith.addf %409, %419 : vector<16x128xf32>
    %c5 = arith.constant 5 : index
    %c0_309 = arith.constant 0 : index
    %c0_310 = arith.constant 0 : index
    %421 = vector.load %arg21[%c5, %c0_309, %c0_310] : memref<9x16x16xf32, #tpu.memory_space<vmem>>, vector<1x16x16xf32>
    %422 = vector.shape_cast %421 : vector<1x16x16xf32> to vector<16x16xf32>
    %cst_311 = arith.constant dense<0.000000e+00> : vector<16x128xf32>
    %423 = tpu.matmul %422, %342, %cst_311 {dimension_numbers = #tpu.dot_dimension_numbers<[1], [0], [0], [1], [0, 0, 1, 1], [], []>} : vector<16x16xf32>, vector<16x128xf32>, vector<16x128xf32> -> vector<16x128xf32>
    %c5_312 = arith.constant 5 : index
    %c0_313 = arith.constant 0 : index
    %c0_314 = arith.constant 0 : index
    %424 = vector.load %arg22[%c5_312, %c0_313, %c0_314] : memref<9x16x16xf32, #tpu.memory_space<vmem>>, vector<1x16x16xf32>
    %425 = vector.shape_cast %424 : vector<1x16x16xf32> to vector<16x16xf32>
    %cst_315 = arith.constant dense<0.000000e+00> : vector<16x128xf32>
    %426 = tpu.matmul %425, %361, %cst_315 {dimension_numbers = #tpu.dot_dimension_numbers<[1], [0], [0], [1], [0, 0, 1, 1], [], []>} : vector<16x16xf32>, vector<16x128xf32>, vector<16x128xf32> -> vector<16x128xf32>
    %427 = arith.addf %423, %426 : vector<16x128xf32>
    %c5_316 = arith.constant 5 : index
    %c0_317 = arith.constant 0 : index
    %c0_318 = arith.constant 0 : index
    %428 = vector.load %arg4[%c5_316, %c0_317, %c0_318] : memref<9x128x128xf32, #tpu.memory_space<vmem>>, vector<1x128x128xf32>
    %429 = vector.shape_cast %428 : vector<1x128x128xf32> to vector<128x128xf32>
    %cst_319 = arith.constant dense<0.000000e+00> : vector<16x128xf32>
    %430 = tpu.matmul %427, %429, %cst_319 {dimension_numbers = #tpu.dot_dimension_numbers<[1], [0], [0], [1], [0, 0, 1, 1], [], []>} : vector<16x128xf32>, vector<128x128xf32>, vector<16x128xf32> -> vector<16x128xf32>
    %431 = arith.addf %420, %430 : vector<16x128xf32>
    %c6 = arith.constant 6 : index
    %c0_320 = arith.constant 0 : index
    %c0_321 = arith.constant 0 : index
    %432 = vector.load %arg21[%c6, %c0_320, %c0_321] : memref<9x16x16xf32, #tpu.memory_space<vmem>>, vector<1x16x16xf32>
    %433 = vector.shape_cast %432 : vector<1x16x16xf32> to vector<16x16xf32>
    %cst_322 = arith.constant dense<0.000000e+00> : vector<16x128xf32>
    %434 = tpu.matmul %433, %342, %cst_322 {dimension_numbers = #tpu.dot_dimension_numbers<[1], [0], [0], [1], [0, 0, 1, 1], [], []>} : vector<16x16xf32>, vector<16x128xf32>, vector<16x128xf32> -> vector<16x128xf32>
    %c6_323 = arith.constant 6 : index
    %c0_324 = arith.constant 0 : index
    %c0_325 = arith.constant 0 : index
    %435 = vector.load %arg22[%c6_323, %c0_324, %c0_325] : memref<9x16x16xf32, #tpu.memory_space<vmem>>, vector<1x16x16xf32>
    %436 = vector.shape_cast %435 : vector<1x16x16xf32> to vector<16x16xf32>
    %cst_326 = arith.constant dense<0.000000e+00> : vector<16x128xf32>
    %437 = tpu.matmul %436, %361, %cst_326 {dimension_numbers = #tpu.dot_dimension_numbers<[1], [0], [0], [1], [0, 0, 1, 1], [], []>} : vector<16x16xf32>, vector<16x128xf32>, vector<16x128xf32> -> vector<16x128xf32>
    %438 = arith.addf %434, %437 : vector<16x128xf32>
    %c6_327 = arith.constant 6 : index
    %c0_328 = arith.constant 0 : index
    %c0_329 = arith.constant 0 : index
    %439 = vector.load %arg4[%c6_327, %c0_328, %c0_329] : memref<9x128x128xf32, #tpu.memory_space<vmem>>, vector<1x128x128xf32>
    %440 = vector.shape_cast %439 : vector<1x128x128xf32> to vector<128x128xf32>
    %cst_330 = arith.constant dense<0.000000e+00> : vector<16x128xf32>
    %441 = tpu.matmul %438, %440, %cst_330 {dimension_numbers = #tpu.dot_dimension_numbers<[1], [0], [0], [1], [0, 0, 1, 1], [], []>} : vector<16x128xf32>, vector<128x128xf32>, vector<16x128xf32> -> vector<16x128xf32>
    %442 = arith.addf %431, %441 : vector<16x128xf32>
    %c7 = arith.constant 7 : index
    %c0_331 = arith.constant 0 : index
    %c0_332 = arith.constant 0 : index
    %443 = vector.load %arg21[%c7, %c0_331, %c0_332] : memref<9x16x16xf32, #tpu.memory_space<vmem>>, vector<1x16x16xf32>
    %444 = vector.shape_cast %443 : vector<1x16x16xf32> to vector<16x16xf32>
    %cst_333 = arith.constant dense<0.000000e+00> : vector<16x128xf32>
    %445 = tpu.matmul %444, %342, %cst_333 {dimension_numbers = #tpu.dot_dimension_numbers<[1], [0], [0], [1], [0, 0, 1, 1], [], []>} : vector<16x16xf32>, vector<16x128xf32>, vector<16x128xf32> -> vector<16x128xf32>
    %c7_334 = arith.constant 7 : index
    %c0_335 = arith.constant 0 : index
    %c0_336 = arith.constant 0 : index
    %446 = vector.load %arg22[%c7_334, %c0_335, %c0_336] : memref<9x16x16xf32, #tpu.memory_space<vmem>>, vector<1x16x16xf32>
    %447 = vector.shape_cast %446 : vector<1x16x16xf32> to vector<16x16xf32>
    %cst_337 = arith.constant dense<0.000000e+00> : vector<16x128xf32>
    %448 = tpu.matmul %447, %361, %cst_337 {dimension_numbers = #tpu.dot_dimension_numbers<[1], [0], [0], [1], [0, 0, 1, 1], [], []>} : vector<16x16xf32>, vector<16x128xf32>, vector<16x128xf32> -> vector<16x128xf32>
    %449 = arith.addf %445, %448 : vector<16x128xf32>
    %c7_338 = arith.constant 7 : index
    %c0_339 = arith.constant 0 : index
    %c0_340 = arith.constant 0 : index
    %450 = vector.load %arg4[%c7_338, %c0_339, %c0_340] : memref<9x128x128xf32, #tpu.memory_space<vmem>>, vector<1x128x128xf32>
    %451 = vector.shape_cast %450 : vector<1x128x128xf32> to vector<128x128xf32>
    %cst_341 = arith.constant dense<0.000000e+00> : vector<16x128xf32>
    %452 = tpu.matmul %449, %451, %cst_341 {dimension_numbers = #tpu.dot_dimension_numbers<[1], [0], [0], [1], [0, 0, 1, 1], [], []>} : vector<16x128xf32>, vector<128x128xf32>, vector<16x128xf32> -> vector<16x128xf32>
    %453 = arith.addf %442, %452 : vector<16x128xf32>
    %c8 = arith.constant 8 : index
    %c0_342 = arith.constant 0 : index
    %c0_343 = arith.constant 0 : index
    %454 = vector.load %arg21[%c8, %c0_342, %c0_343] : memref<9x16x16xf32, #tpu.memory_space<vmem>>, vector<1x16x16xf32>
    %455 = vector.shape_cast %454 : vector<1x16x16xf32> to vector<16x16xf32>
    %cst_344 = arith.constant dense<0.000000e+00> : vector<16x128xf32>
    %456 = tpu.matmul %455, %342, %cst_344 {dimension_numbers = #tpu.dot_dimension_numbers<[1], [0], [0], [1], [0, 0, 1, 1], [], []>} : vector<16x16xf32>, vector<16x128xf32>, vector<16x128xf32> -> vector<16x128xf32>
    %c8_345 = arith.constant 8 : index
    %c0_346 = arith.constant 0 : index
    %c0_347 = arith.constant 0 : index
    %457 = vector.load %arg22[%c8_345, %c0_346, %c0_347] : memref<9x16x16xf32, #tpu.memory_space<vmem>>, vector<1x16x16xf32>
    %458 = vector.shape_cast %457 : vector<1x16x16xf32> to vector<16x16xf32>
    %cst_348 = arith.constant dense<0.000000e+00> : vector<16x128xf32>
    %459 = tpu.matmul %458, %361, %cst_348 {dimension_numbers = #tpu.dot_dimension_numbers<[1], [0], [0], [1], [0, 0, 1, 1], [], []>} : vector<16x16xf32>, vector<16x128xf32>, vector<16x128xf32> -> vector<16x128xf32>
    %460 = arith.addf %456, %459 : vector<16x128xf32>
    %c8_349 = arith.constant 8 : index
    %c0_350 = arith.constant 0 : index
    %c0_351 = arith.constant 0 : index
    %461 = vector.load %arg4[%c8_349, %c0_350, %c0_351] : memref<9x128x128xf32, #tpu.memory_space<vmem>>, vector<1x128x128xf32>
    %462 = vector.shape_cast %461 : vector<1x128x128xf32> to vector<128x128xf32>
    %cst_352 = arith.constant dense<0.000000e+00> : vector<16x128xf32>
    %463 = tpu.matmul %460, %462, %cst_352 {dimension_numbers = #tpu.dot_dimension_numbers<[1], [0], [0], [1], [0, 0, 1, 1], [], []>} : vector<16x128xf32>, vector<128x128xf32>, vector<16x128xf32> -> vector<16x128xf32>
    %464 = arith.addf %453, %463 : vector<16x128xf32>
    %cst_353 = arith.constant dense<0.000000e+00> : vector<16xf32>
    %465 = vector.multi_reduction <add>, %464, %cst_353 [1] : vector<16x128xf32> to vector<16xf32>
    %466 = vector.shape_cast %465 : vector<16xf32> to vector<16x1xf32>
    %cst_354 = arith.constant 1.280000e+02 : f32
    %467 = vector.broadcast %cst_354 : f32 to vector<16x1xf32>
    %468 = arith.divf %466, %467 : vector<16x1xf32>
    %469 = vector.broadcast %468 : vector<16x1xf32> to vector<16x128xf32>
    %470 = arith.subf %464, %469 : vector<16x128xf32>
    %471 = arith.mulf %470, %470 : vector<16x128xf32>
    %cst_355 = arith.constant dense<0.000000e+00> : vector<16xf32>
    %472 = vector.multi_reduction <add>, %471, %cst_355 [1] : vector<16x128xf32> to vector<16xf32>
    %473 = vector.shape_cast %472 : vector<16xf32> to vector<16x1xf32>
    %cst_356 = arith.constant 1.280000e+02 : f32
    %474 = vector.broadcast %cst_356 : f32 to vector<16x1xf32>
    %475 = arith.divf %473, %474 : vector<16x1xf32>
    %476 = vector.broadcast %468 : vector<16x1xf32> to vector<16x128xf32>
    %477 = arith.subf %464, %476 : vector<16x128xf32>
    %cst_357 = arith.constant 9.99999974E-6 : f32
    %478 = vector.broadcast %cst_357 : f32 to vector<16x1xf32>
    %479 = arith.addf %475, %478 : vector<16x1xf32>
    %480 = math.rsqrt %479 : vector<16x1xf32>
    %481 = vector.broadcast %480 : vector<16x1xf32> to vector<16x128xf32>
    %482 = arith.mulf %477, %481 : vector<16x128xf32>
    %c0_358 = arith.constant 0 : index
    %c0_359 = arith.constant 0 : index
    %483 = vector.load %arg24[%c0_358, %c0_359] : memref<16x1xf32, #tpu.memory_space<vmem>>, vector<16x1xf32>
    %484 = vector.broadcast %483 : vector<16x1xf32> to vector<16x128xf32>
    %485 = arith.mulf %482, %484 : vector<16x128xf32>
    %c0_360 = arith.constant 0 : index
    %c0_361 = arith.constant 0 : index
    %486 = vector.load %arg25[%c0_360, %c0_361] : memref<16x1xf32, #tpu.memory_space<vmem>>, vector<16x1xf32>
    %487 = vector.broadcast %486 : vector<16x1xf32> to vector<16x128xf32>
    %488 = arith.addf %485, %487 : vector<16x128xf32>
    %cst_362 = arith.constant 0.000000e+00 : f32
    %489 = vector.broadcast %cst_362 : f32 to vector<16x128xf32>
    %490 = arith.maximumf %488, %489 : vector<16x128xf32>
    %c0_363 = arith.constant 0 : index
    %c0_364 = arith.constant 0 : index
    %c0_365 = arith.constant 0 : index
    %491 = vector.load %arg2[%c0_363, %c0_364, %c0_365] : memref<2x64x128xf32, #tpu.memory_space<vmem>>, vector<1x64x128xf32>
    %492 = vector.shape_cast %491 : vector<1x64x128xf32> to vector<64x128xf32>
    %cst_366 = arith.constant dense<0.000000e+00> : vector<16x64xf32>
    %493 = tpu.matmul %490, %492, %cst_366 {dimension_numbers = #tpu.dot_dimension_numbers<[1], [1], [0], [0], [0, 0, 1, 0], [], []>} : vector<16x128xf32>, vector<64x128xf32>, vector<16x64xf32> -> vector<16x64xf32>
    %c0_367 = arith.constant 0 : index
    %c0_368 = arith.constant 0 : index
    %c0_369 = arith.constant 0 : index
    %494 = vector.load %arg26[%c0_367, %c0_368, %c0_369] : memref<2x16x64xf32, #tpu.memory_space<vmem>>, vector<1x16x64xf32>
    %495 = vector.shape_cast %494 : vector<1x16x64xf32> to vector<16x64xf32>
    %496 = vector.shape_cast %493 : vector<16x64xf32> to vector<1x16x64xf32>
    tpu.vector_store %arg26[%c0_367, %c0_368, %c0_369], %496 {strides = array<i32>} : memref<2x16x64xf32, #tpu.memory_space<vmem>>, vector<1x16x64xf32>,
    %c1_370 = arith.constant 1 : index
    %c0_371 = arith.constant 0 : index
    %c0_372 = arith.constant 0 : index
    %497 = vector.load %arg2[%c1_370, %c0_371, %c0_372] : memref<2x64x128xf32, #tpu.memory_space<vmem>>, vector<1x64x128xf32>
    %498 = vector.shape_cast %497 : vector<1x64x128xf32> to vector<64x128xf32>
    %cst_373 = arith.constant dense<0.000000e+00> : vector<16x64xf32>
    %499 = tpu.matmul %490, %498, %cst_373 {dimension_numbers = #tpu.dot_dimension_numbers<[1], [1], [0], [0], [0, 0, 1, 0], [], []>} : vector<16x128xf32>, vector<64x128xf32>, vector<16x64xf32> -> vector<16x64xf32>
    %c1_374 = arith.constant 1 : index
    %c0_375 = arith.constant 0 : index
    %c0_376 = arith.constant 0 : index
    %500 = vector.load %arg26[%c1_374, %c0_375, %c0_376] : memref<2x16x64xf32, #tpu.memory_space<vmem>>, vector<1x16x64xf32>
    %501 = vector.shape_cast %500 : vector<1x16x64xf32> to vector<16x64xf32>
    %502 = vector.shape_cast %499 : vector<16x64xf32> to vector<1x16x64xf32>
    tpu.vector_store %arg26[%c1_374, %c0_375, %c0_376], %502 {strides = array<i32>} : memref<2x16x64xf32, #tpu.memory_space<vmem>>, vector<1x16x64xf32>,
    return
  }
}

</mosaic_0001>

<bundles_post_ra>
// kernel: gmlp_forward.1
= control target key start
LH: loop header
LB: loop body
LE: loop exit
PB: predicated region body
PF: predicated region fallthrough
CT: control target
= control target key end

     0   :  { %vm105_vm0 = vcmask 523264   ;;  %v7670_v2 = vmov 0   ;;  %v9811_v40 = vmov 0.0   ;;  %vm7672_vm1 = vmmov 0   ;;  %s9773_s2 = inlined_call_operand.vmem [shape: f32[2,64,128], index: 2, kind: input, shape index: {}]   ;;  %s9774_s0 = inlined_call_operand.vmem [shape: f32[2,16,64], index: 0, kind: input, shape index: {}]   ;;  %s9775_s5 = inlined_call_operand.vmem [shape: f32[16,1], index: 5, kind: input, shape index: {}]   ;;  %s9776_s6 = inlined_call_operand.vmem [shape: f32[16,1], index: 6, kind: input, shape index: {}]   ;;  %s9777_s8 = inlined_call_operand.vmem [shape: f32[4,1], index: 8, kind: input, shape index: {}]   ;;  %s9778_s9 = inlined_call_operand.vmem [shape: f32[4,1], index: 9, kind: input, shape index: {}]   ;;  %s9779_s10 = inlined_call_operand.vmem [shape: f32[4,1], index: 10, kind: input, shape index: {}]   ;;  %s9780_s12 = inlined_call_operand.vmem [shape: f32[4,1], index: 12, kind: input, shape index: {}]   ;;  %s9781_s14 = inlined_call_operand.vmem [shape: f32[4,1], index: 14, kind: input, shape index: {}]   ;;  %s9782_s16 = inlined_call_operand.vmem [shape: f32[16,1], index: 16, kind: input, shape index: {}]   ;;  %s9783_s17 = inlined_call_operand.vmem [shape: f32[16,1], index: 17, kind: input, shape index: {}]   ;;  %s9784_s18 = inlined_call_operand.vmem [shape: f32[16,1], index: 18, kind: input, shape index: {}]   ;;  %s9785_s20 = inlined_call_operand.vmem [shape: f32[16,1], index: 20, kind: input, shape index: {}]   ;;  %s9786_s23 = inlined_call_operand.vmem [shape: f32[16,1], index: 23, kind: input, shape index: {}]   ;;  %s9787_s7 = inlined_call_operand.vmem [shape: f32[4,16], index: 7, kind: input, shape index: {}]   ;;  %s9788_s3 = inlined_call_operand.vmem [shape: f32[5,128,128], index: 3, kind: input, shape index: {}]   ;;  %s9789_s1 = inlined_call_operand.vmem [shape: f32[2,16,64], index: 1, kind: input, shape index: {}]   ;;  %s9790_s11 = inlined_call_operand.vmem [shape: f32[3,4,4], index: 11, kind: input, shape index: {}]   ;;  %s9791_s13 = inlined_call_operand.vmem [shape: f32[5,4,4], index: 13, kind: input, shape index: {}]   ;;  %s9792_s15 = inlined_call_operand.vmem [shape: f32[16,4], index: 15, kind: input, shape index: {}]   ;;  %s9793_s19 = inlined_call_operand.vmem [shape: f32[16,16], index: 19, kind: input, shape index: {}]   ;;  %s9794_s21 = inlined_call_operand.vmem [shape: f32[9,16,16], index: 21, kind: input, shape index: {}]   ;;  %s9795_s22 = inlined_call_operand.vmem [shape: f32[9,16,16], index: 22, kind: input, shape index: {}]   ;;  %s9796_s4 = inlined_call_operand.vmem [shape: f32[9,128,128], index: 4, kind: input, shape index: {}]   ;;  %s9797_s24 = inlined_call_operand.vmem [shape: f32[16,1], index: 24, kind: input, shape index: {}]   ;;  %s9798_s25 = inlined_call_operand.vmem [shape: f32[16,1], index: 25, kind: input, shape index: {}]   ;;  %s9799_s26 = inlined_call_operand.vmem [shape: f32[2,16,64], index: 26, kind: output, shape index: {}]  }
   0x1   :  { %9854 = sst [smem:[#allocation47_spill]] %s9773_s2  ;;  %7640 = vset.pattern.permute.xlu0 %v7670_v2  ;;  %7641 = vset.pattern.permute.xlu1 %v7670_v2  ;;  %v2900_v33 = vld [vmem:[%s9784_s18 + $0x8] sm:$0xff]  ;;  %v2899_v35 = vld [vmem:[%s9784_s18] sm:$0xff]  ;;  %vm328_vm2 = vcmask 130048   ;;  %vm431_vm4 = vcmask 1043456   ;;  %vm908_vm5 = vcmask 31744  }
   0x2   :  { %9855 = sst [smem:[#allocation48_spill]] %s9774_s0  ;;  %v2916_v36 = vld [vmem:[%s9785_s20 + $0x8] sm:$0xff]  ;;  %v2915_v37 = vld [vmem:[%s9785_s20] sm:$0xff]  ;;  %6651 = vmatprep.subr.mxu0 %v9811_v40  ;;  %6655 = vmatprep.mubr.msk.f32.mxu0 %vm7672_vm1, %v9811_v40 }
   0x3   :  { %9856 = sst [smem:[#allocation49_spill]] %s9775_s5  ;;  %v3168_v38 = vld [vmem:[%s9786_s23] sm:$0xff]  ;;  %v3169_v39 = vld [vmem:[%s9786_s23 + $0x8] sm:$0xff] }
   0x4   :  { %9857 = sst [smem:[#allocation50_spill]] %s9776_s6 }
   0x5   :  { %9858 = sst [smem:[#allocation51_spill]] %s9777_s8 }
   0x6   :  { %9859 = sst [smem:[#allocation52_spill]] %s9778_s9 }
   0x7   :  { %9860 = sst [smem:[#allocation53_spill]] %s9779_s10 }
   0x8   :  { %9861 = sst [smem:[#allocation54_spill]] %s9780_s12 }
   0x9   :  { %9862 = sst [smem:[#allocation55_spill]] %s9781_s14 }
   0xa   :  { %9863 = sst [smem:[#allocation56_spill]] %s9782_s16 }
   0xb   :  { %9864 = sst [smem:[#allocation57_spill]] %s9783_s17 }
   0xc   :  { %s9865_s12 = sld [smem:[#allocation47_spill]] }
   0xd   :  { %s9866_s30 = sld [smem:[#allocation48_spill]] }
   0xe   :  { %s9867_s6 = sld [smem:[#allocation49_spill]] }
   0xf   :  { %s9868_s8 = sld [smem:[#allocation50_spill]] }
  0x10   :  { %s9870_s16 = sld [smem:[#allocation52_spill]] }
  0x11   :  { %s9871_s29 = sld [smem:[#allocation53_spill]] }
  0x12   :  { %v7812_v0 = vld [vmem:[%s9865_s12 + $0x78] sm:$0xff]  ;;  %v7817_v1 = vld [vmem:[%s9865_s12 + $0x70] sm:$0xff]  ;;  %v7824_v3 = vld [vmem:[%s9865_s12 + $0x68] sm:$0xff]  ;;  %s9872_s5 = sld [smem:[#allocation54_spill]] }
  0x13   :  { %6613 = vmatprep.subr.mxu1 %v7812_v0  ;;  %v5757_v4 = vld [vmem:[%s9866_s30 + $0x10] sm:$0xff]  ;;  %v7835_v5 = vld [vmem:[%s9865_s12 + $0x60] sm:$0xff]  ;;  %v7842_v6 = vld [vmem:[%s9865_s12 + $0x58] sm:$0xff]  ;;  %s9873_s28 = sld [smem:[#allocation55_spill]] }
  0x14   :  { %6614 = vmatpush3.msra.mxu1 %v7812_v0  ;;  %6629 = vmatprep.mubr.msk.f32.mxu1 %vm105_vm0, %v5757_v4  ;;  %v269_v7 = vld [vmem:[%s9867_s6 + $0x8] sm:$0xff]  ;;  %v7855_v9 = vld [vmem:[%s9865_s12 + $0x50] sm:$0xff]  ;;  %v268_v10 = vld [vmem:[%s9867_s6] sm:$0xff]  ;;  %s9875_s6 = sld [smem:[#allocation57_spill]] }
  0x15   :  { %6615 = vmatprep.subr.mxu1 %v7817_v1  ;;  %304 = vperm.xlu0 %7640, %v269_v7   ;;  %v271_v8 = vld [vmem:[%s9868_s8 + $0x8] sm:$0xff]  ;;  %v270_v11 = vld [vmem:[%s9868_s8] sm:$0xff]  ;;  %s9869_s8 = sld [smem:[#allocation51_spill]]  ;;  %v5758_v16 = vld [vmem:[%s9866_s30 + $0x18] sm:$0xff] }
  0x16   :  { %6616 = vmatpush3.msra.mxu1 %v7817_v1  ;;  %316 = vperm.xlu1 %7641, %v271_v8   ;;  %v7868_v12 = vld [vmem:[%s9865_s12 + $0x48] sm:$0xff]  ;;  %v7875_v13 = vld [vmem:[%s9865_s12 + $0x40] sm:$0xff]  ;;  %v7891_v17 = vld [vmem:[%s9865_s12 + $0x38] sm:$0xff] }
  0x17   :  { %6617 = vmatprep.subr.mxu1 %v7824_v3  ;;  %v429_v15 = vld [vmem:[%s9870_s16] sm:$0xf]  ;;  %v7901_v19 = vld [vmem:[%s9865_s12 + $0x30] sm:$0xff]  ;;  %v7915_v22 = vld [vmem:[%s9865_s12 + $0x28] sm:$0xff] }
  0x18   :  { %6618 = vmatpush3.msra.mxu1 %v7824_v3  ;;  %v83_v18 = vld [vmem:[%s9866_s30] sm:$0xff]  ;;  %v7936_v26 = vld [vmem:[%s9865_s12 + $0x18] sm:$0xff]  ;;  %v7943_v27 = vld [vmem:[%s9865_s12 + $0x10] sm:$0xff] }
  0x19   :  { %6619 = vmatprep.subr.mxu1 %v7835_v5  ;;  %299 = vperm.xlu0 %7640, %v268_v10   ;;  %v430_v20 = vld [vmem:[%s9871_s29] sm:$0xf]  ;;  %s9874_s29 = sld [smem:[#allocation56_spill]]  ;;  %v7956_v30 = vld [vmem:[%s9865_s12 + $0x8] sm:$0xff] }
  0x1a   :  { %6620 = vmatpush3.msra.mxu1 %v7835_v5  ;;  %311 = vperm.xlu1 %7641, %v270_v11   ;;  %v900_v21 = vld [vmem:[%s9872_s5] sm:$0xf]  ;;  %v2886_v29 = vld [vmem:[%s9875_s6 + $0x8] sm:$0xff] }
  0x1b   :  { %6621 = vmatprep.subr.mxu1 %v7842_v6  ;;  %v322_v14 = vld [vmem:[%s9869_s8] sm:$0xf]  ;;  %v84_v34 = vld [vmem:[%s9866_s30 + $0x8] sm:$0xff] }
  0x1c   :  { %6622 = vmatpush3.msra.mxu1 %v7842_v6  ;;  %v7923_v23 = vld [vmem:[%s9865_s12 + $0x20] sm:$0xff] }
  0x1d   :  { %6623 = vmatprep.subr.mxu1 %v7855_v9  ;;  %325 = vperm.xlu0 %7640, %v322_v14   ;;  %v1144_v24 = vld [vmem:[%s9873_s28] sm:$0xf] }
  0x1e   :  { %6624 = vmatpush3.msra.mxu1 %v7855_v9  ;;  %456 = vperm.xlu1 %7641, %v429_v15   ;;  %v7963_v31 = vld [vmem:[%s9865_s12] sm:$0xff] }
  0x1f   :  { %6625 = vmatprep.subr.mxu1 %v7868_v12  ;;  %v2790_v25 = vld [vmem:[%s9874_s29 + $0x8] sm:$0xff]  ;;  %v2789_v28 = vld [vmem:[%s9874_s29] sm:$0xff] }
  0x20   :  { %6626 = vmatpush3.msra.mxu1 %v7868_v12  ;;  %v2885_v32 = vld [vmem:[%s9875_s6] sm:$0xff] }
  0x21   :  { %6627 = vmatprep.subr.mxu1 %v7875_v13  ;;  %462 = vperm.xlu0 %7640, %v430_v20  }
  0x22   :  { %6628 = vmatpush3.msra.mxu1 %v7875_v13  ;;  %903 = vperm.xlu1 %7641, %v900_v21  }
  0x23   :  { %6630 = vmatmul.mubr.msk.f32.vlgmr.msra.gmra.mxu1 %vm105_vm0, %v5758_v16  ;;  %6632 = vmatprep.subr.mxu1 %v7891_v17 }
  0x24   :  { %6633 = vmatpush3.msra.mxu1 %v7891_v17  ;;  %6648 = vmatprep.mubr.msk.f32.mxu1 %vm105_vm0, %v83_v18 }
  0x25   :  { %6634 = vmatprep.subr.mxu1 %v7901_v19  ;;  %1147 = vperm.xlu0 %7640, %v1144_v24  }
  0x26   :  { %6635 = vmatpush3.msra.mxu1 %v7901_v19  ;;  %2798 = vperm.xlu1 %7641, %v2790_v25  }
  0x27   :  { %6636 = vmatprep.subr.mxu1 %v7915_v22 }
  0x28   :  { %6637 = vmatpush3.msra.mxu1 %v7915_v22 }
  0x29   :  { %6638 = vmatprep.subr.mxu1 %v7923_v23  ;;  %2793 = vperm.xlu0 %7640, %v2789_v28  }
  0x2a   :  { %6639 = vmatpush3.msra.mxu1 %v7923_v23  ;;  %2894 = vperm.xlu1 %7641, %v2886_v29   ;;  %v8015_v29 = vld [vmem:[%s9787_s7] sm:$0xf] }
  0x2b   :  { %6640 = vmatprep.subr.mxu1 %v7936_v26 }
  0x2c   :  { %6641 = vmatpush3.msra.mxu1 %v7936_v26 }
  0x2d   :  { %6642 = vmatprep.subr.mxu1 %v7943_v27  ;;  %2889 = vperm.xlu0 %7640, %v2885_v32   ;;  %v8026_v32 = vld [vmem:[%s9788_s3 + $0x78] sm:$0xff] }
  0x2e   :  { %6643 = vmatpush3.msra.mxu1 %v7943_v27  ;;  %2908 = vperm.xlu1 %7641, %v2900_v33   ;;  %v8031_v33 = vld [vmem:[%s9788_s3 + $0xf8] sm:$0xff] }
  0x2f   :  { %6644 = vmatprep.subr.mxu1 %v7956_v30 }
  0x30   :  { %6645 = vmatpush3.msra.mxu1 %v7956_v30 }
  0x31   :  { %6646 = vmatprep.subr.mxu1 %v7963_v31  ;;  %2903 = vperm.xlu0 %7640, %v2899_v35   ;;  %v8045_v35 = vld [vmem:[%s9788_s3 + $0xf0] sm:$0xff] }
  0x32   :  { %6647 = vmatpush3.msra.mxu1 %v7963_v31  ;;  %2924 = vperm.xlu1 %7641, %v2916_v36   ;;  %v8054_v36 = vld [vmem:[%s9788_s3 + $0x68] sm:$0xff] }
  0x33   :  { %6649 = vmatmul.mubr.msk.f32.vlgmr.msra.gmra.mxu1 %vm105_vm0, %v84_v34  ;;  %6658 = vmatprep.subr.mxu1 %v9811_v40  ;;  %v8040_v34 = vld [vmem:[%s9788_s3 + $0x70] sm:$0xff] }
  0x34   :  { %6690 = vmatprep.mubr.msk.f32.mxu1 %vm7672_vm1, %v9811_v40  ;;  %6659 = vmatpush3.msra.mxu1 %v8026_v32 }
  0x35   :  { %2919 = vperm.xlu0 %7640, %v2915_v37   ;;  %6660 = vmatprep.subr.mxu1 %v9811_v40  ;;  %v8059_v37 = vld [vmem:[%s9788_s3 + $0xe8] sm:$0xff] }
  0x36   :  { %3172 = vperm.xlu1 %7641, %v3168_v38   ;;  %6661 = vmatpush3.msra.mxu1 %v8040_v34  ;;  %v8068_v38 = vld [vmem:[%s9788_s3 + $0x60] sm:$0xff] }
  0x37   :  { %6662 = vmatprep.subr.mxu1 %v9811_v40 }
  0x38   :  { %6663 = vmatpush3.msra.mxu1 %v8054_v36 }
  0x39   :  { %3177 = vperm.xlu0 %7640, %v3169_v39   ;;  %6664 = vmatprep.subr.mxu1 %v9811_v40  ;;  %v8073_v39 = vld [vmem:[%s9788_s3 + $0xe0] sm:$0xff] }
  0x3a   :  { %6665 = vmatpush3.msra.mxu1 %v8068_v38 }
  0x3b   :  { %6666 = vmatprep.subr.mxu1 %v9811_v40 }
  0x90   :  { %v8000_v10 = vpop.permute.xlu0 %304 }
  0x91   :  { %v8002_v14 = vpop.permute.xlu1 %316 }
  0x94   :  { %v8004_v18 = vpop.permute.xlu0 %299 }
  0x95   :  { %v8009_v25 = vpop.permute.xlu1 %311 }
  0xe3   :  { %v6631_v41 = vpop.f32.mrf.mxu1 }
  0xe5   :  { %v178_v42 = vpop.f32.mrf.mxu1 }
  0xf3   :  { %v6650_v43 = vpop.f32.mrf.mxu1 }
  0xf4   :  { %v265_v45 = vadd.f32 %v6650_v43, %v6631_v41  ;;  %v8082_v41 = vld [vmem:[%s9788_s3 + $0x58] sm:$0xff]  ;;  %v8096_v43 = vld [vmem:[%s9788_s3 + $0x50] sm:$0xff] }
  0xf5   :  { %v259_v44 = vpop.f32.mrf.mxu1  ;;  %6667 = vmatpush3.msra.mxu1 %v8082_v41 }
  0xf6   :  { %v260_v46 = vadd.f32 %v259_v44, %v178_v42  ;;  %v8087_v42 = vld [vmem:[%s9788_s3 + $0xd8] sm:$0xff]  ;;  %6668 = vmatprep.subr.mxu1 %v9811_v40  ;;  %v8101_v44 = vld [vmem:[%s9788_s3 + $0xd0] sm:$0xff] }
  0xf7   :  { %9876 = vst [vmem:[#allocation2_spill] sm:$0xff] %v8101_v44  ;;  %6669 = vmatpush3.msra.mxu1 %v8096_v43 }
  0xf8   :  { %v272_v47 = vadd.f32 %v265_v45, %v260_v46  ;;  %6670 = vmatprep.subr.mxu1 %v9811_v40 }
  0xfa   :  { %v273_v48 = vrot.slane %v272_v47, 4 }
  0xfc   :  { %v274_v49 = vadd.f32 %v273_v48, %v272_v47  ;;  %v8124_v47 = vld [vmem:[%s9788_s3 + $0x40] sm:$0xff] }
  0xfd   :  { %v8129_v48 = vld [vmem:[%s9788_s3 + $0xc0] sm:$0xff] }
  0xfe   :  { %v275_v50 = vrot.slane %v274_v49, 2  ;;  %9878 = vst [vmem:[#allocation4_spill] sm:$0xff] %v8129_v48 }
 0x100   :  { %v276_v51 = vadd.f32 %v275_v50, %v274_v49  ;;  %v8138_v49 = vld [vmem:[%s9788_s3 + $0x38] sm:$0xff] }
 0x101   :  { %v8143_v50 = vld [vmem:[%s9788_s3 + $0xb8] sm:$0xff] }
 0x102   :  { %v277_v52 = vrot.slane %v276_v51, 1  ;;  %9879 = vst [vmem:[#allocation5_spill] sm:$0xff] %v8143_v50 }
 0x104   :  { %v278_v53 = vadd.f32 %v277_v52, %v276_v51  ;;  %v8152_v51 = vld [vmem:[%s9788_s3 + $0x30] sm:$0xff] }
 0x105   :  { %v8157_v52 = vld [vmem:[%s9788_s3 + $0xb0] sm:$0xff] }
 0x106   :  { %v280_v54 = vmul.f32 0.0625, %v278_v53  ;;  %9880 = vst [vmem:[#allocation6_spill] sm:$0xff] %v8157_v52  ;;  %v8166_v53 = vld [vmem:[%s9788_s3 + $0x28] sm:$0xff] }
 0x108   :  { %v281_v55 = vsub.f32 %v260_v46, %v280_v54  ;;  %v282_v56 = vsub.f32 %v265_v45, %v280_v54  ;;  %v8110_v45 = vld [vmem:[%s9788_s3 + $0x48] sm:$0xff] }
 0x109   :  { %v8115_v46 = vld [vmem:[%s9788_s3 + $0xc8] sm:$0xff]  ;;  %6671 = vmatpush3.msra.mxu1 %v8110_v45 }
 0x10a   :  { %v283_v57 = vmul.f32 %v281_v55, %v281_v55  ;;  %v284_v58 = vmul.f32 %v282_v56, %v282_v56  ;;  %9877 = vst [vmem:[#allocation3_spill] sm:$0xff] %v8115_v46  ;;  %6672 = vmatprep.subr.mxu1 %v9811_v40  ;;  %v8171_v54 = vld [vmem:[%s9788_s3 + $0xa8] sm:$0xff] }
 0x10b   :  { %6673 = vmatpush3.msra.mxu1 %v8124_v47  ;;  %9881 = vst [vmem:[#allocation7_spill] sm:$0xff] %v8171_v54 }
 0x10c   :  { %v285_v59 = vadd.f32 %v284_v58, %v283_v57  ;;  %6674 = vmatprep.subr.mxu1 %v9811_v40  ;;  %v8194_v57 = vld [vmem:[%s9788_s3 + $0x18] sm:$0xff] }
 0x10d   :  { %6675 = vmatpush3.msra.mxu1 %v8138_v49  ;;  %v8199_v58 = vld [vmem:[%s9788_s3 + $0x98] sm:$0xff] }
 0x10e   :  { %v286_v60 = vrot.slane %v285_v59, 4  ;;  %6676 = vmatprep.subr.mxu1 %v9811_v40  ;;  %9883 = vst [vmem:[#allocation9_spill] sm:$0xff] %v8199_v58 }
 0x10f   :  { %6677 = vmatpush3.msra.mxu1 %v8152_v51 }
 0x110   :  { %v287_v61 = vadd.f32 %v286_v60, %v285_v59  ;;  %6678 = vmatprep.subr.mxu1 %v9811_v40  ;;  %v8208_v59 = vld [vmem:[%s9788_s3 + $0x10] sm:$0xff] }
 0x111   :  { %6679 = vmatpush3.msra.mxu1 %v8166_v53  ;;  %v8213_v60 = vld [vmem:[%s9788_s3 + $0x90] sm:$0xff] }
 0x112   :  { %v288_v62 = vrot.slane %v287_v61, 2  ;;  %6680 = vmatprep.subr.mxu1 %v9811_v40  ;;  %9884 = vst [vmem:[#allocation10_spill] sm:$0xff] %v8213_v60 }
 0x114   :  { %v289_v63 = vadd.f32 %v288_v62, %v287_v61  ;;  %v8222_v61 = vld [vmem:[%s9788_s3 + $0x8] sm:$0xff] }
 0x115   :  { %v8227_v62 = vld [vmem:[%s9788_s3 + $0x88] sm:$0xff] }
 0x116   :  { %v290_v2 = vrot.slane %v289_v63, 1  ;;  %9885 = vst [vmem:[#allocation11_spill] sm:$0xff] %v8227_v62 }
 0x118   :  { %v291_v4 = vadd.f32 %v290_v2, %v289_v63  ;;  %v8234_v63 = vld [vmem:[%s9788_s3] sm:$0xff] }
 0x119   :  { %v8239_v2 = vld [vmem:[%s9788_s3 + $0x80] sm:$0xff] }
 0x11a   :  { %v292_v7 = vmul.f32 0.0625, %v291_v4  ;;  %9886 = vst [vmem:[#allocation12_spill] sm:$0xff] %v8239_v2  ;;  %v8247_v4 = vpop.permute.xlu0 %325 }
 0x11b   :  { %9887 = vst [vmem:[#allocation13_spill] sm:$0xff] %v8247_v4 }
 0x11c   :  { %v293_v8 = vadd.f32 1e-05, %v292_v7 }
 0x11e   :  { %7642 = vrsqrt.f32 %v293_v8 }
 0x12b   :  { %v7643_v11 = vpop.eup %7642 }
 0x12c   :  { %v296_v15 = vmul.f32 %v7643_v11, %v282_v56  ;;  %v295_v16 = vmul.f32 %v7643_v11, %v281_v55  ;;  %v8180_v55 = vld [vmem:[%s9788_s3 + $0x20] sm:$0xff] }
 0x12d   :  { %v8185_v56 = vld [vmem:[%s9788_s3 + $0xa0] sm:$0xff]  ;;  %6681 = vmatpush3.msra.mxu1 %v8180_v55 }
 0x12e   :  { %v308_v20 = vmul.f32 %v8000_v10, %v296_v15  ;;  %v307_v21 = vmul.f32 %v8004_v18, %v295_v16  ;;  %9882 = vst [vmem:[#allocation8_spill] sm:$0xff] %v8185_v56  ;;  %6682 = vmatprep.subr.mxu1 %v9811_v40 }
 0x12f   :  { %6683 = vmatpush3.msra.mxu1 %v8194_v57 }
 0x130   :  { %v320_v24 = vadd.f32 %v8002_v14, %v308_v20  ;;  %v319_v28 = vadd.f32 %v8009_v25, %v307_v21  ;;  %6684 = vmatprep.subr.mxu1 %v9811_v40 }
 0x131   :  { %6685 = vmatpush3.msra.mxu1 %v8208_v59 }
 0x132   :  { %6652 = vmatpush3.msra.mxu0 %v320_v24  ;;  %6686 = vmatprep.subr.mxu1 %v9811_v40 }
 0x133   :  { %6653 = vmatprep.subr.mxu0 %v9811_v40  ;;  %6687 = vmatpush3.msra.mxu1 %v8222_v61 }
 0x134   :  { %6654 = vmatpush3.msra.mxu0 %v319_v28  ;;  %6688 = vmatprep.subr.mxu1 %v9811_v40 }
 0x135   :  { %6656 = vmatmul.mubr.msk.f32.vlgmr.msra.gmra.mxu0 %vm328_vm2, %v8015_v29  ;;  %6693 = vmatprep.subr.mxu0 %v9811_v40 }
 0x136   :  { %6725 = vmatprep.mubr.msk.f32.mxu0 %vm7672_vm1, %v9811_v40  ;;  %6694 = vmatpush3.msra.mxu0 %v8031_v33 }
 0x137   :  { %6695 = vmatprep.subr.mxu0 %v9811_v40  ;;  %6689 = vmatpush3.msra.mxu1 %v8234_v63 }
 0x138   :  { %6696 = vmatpush3.msra.mxu0 %v8045_v35  ;;  %6728 = vmatprep.subr.mxu1 %v9811_v40 }
 0x139   :  { %6697 = vmatprep.subr.mxu0 %v9811_v40 }
 0x13a   :  { %6698 = vmatpush3.msra.mxu0 %v8059_v37 }
 0x13b   :  { %6699 = vmatprep.subr.mxu0 %v9811_v40 }
 0x13c   :  { %6700 = vmatpush3.msra.mxu0 %v8073_v39 }
 0x13d   :  { %6701 = vmatprep.subr.mxu0 %v9811_v40 }
 0x13e   :  { %6702 = vmatpush3.msra.mxu0 %v8087_v42 }
 0x13f   :  { %6703 = vmatprep.subr.mxu0 %v9811_v40 }
 0x140   :  { %6704 = vmatpush3.msra.mxu0 %v8101_v44 }
 0x141   :  { %6705 = vmatprep.subr.mxu0 %v9811_v40 }
 0x142   :  { %6706 = vmatpush3.msra.mxu0 %v8115_v46 }
 0x143   :  { %6707 = vmatprep.subr.mxu0 %v9811_v40 }
 0x144   :  { %6708 = vmatpush3.msra.mxu0 %v8129_v48 }
 0x145   :  { %6709 = vmatprep.subr.mxu0 %v9811_v40 }
 0x146   :  { %6710 = vmatpush3.msra.mxu0 %v8143_v50 }
 0x147   :  { %6711 = vmatprep.subr.mxu0 %v9811_v40 }
 0x148   :  { %6712 = vmatpush3.msra.mxu0 %v8157_v52 }
 0x149   :  { %6713 = vmatprep.subr.mxu0 %v9811_v40 }
 0x14a   :  { %6714 = vmatpush3.msra.mxu0 %v8171_v54 }
 0x14b   :  { %6715 = vmatprep.subr.mxu0 %v9811_v40 }
 0x14c   :  { %6716 = vmatpush3.msra.mxu0 %v8185_v56 }
 0x14d   :  { %6717 = vmatprep.subr.mxu0 %v9811_v40 }
 0x14e   :  { %6718 = vmatpush3.msra.mxu0 %v8199_v58 }
 0x14f   :  { %6719 = vmatprep.subr.mxu0 %v9811_v40 }
 0x150   :  { %6720 = vmatpush3.msra.mxu0 %v8213_v60 }
 0x151   :  { %6721 = vmatprep.subr.mxu0 %v9811_v40 }
 0x152   :  { %6722 = vmatpush3.msra.mxu0 %v8227_v62 }
 0x153   :  { %6723 = vmatprep.subr.mxu0 %v9811_v40 }
 0x154   :  { %6724 = vmatpush3.msra.mxu0 %v8239_v2 }
 0x155   :  { %6763 = vmatprep.subr.mxu0 %v9811_v40 }
 0x1f5   :  { %v398_v7 = vpop.f32.mrf.mxu0 }
 0x1f6   :  { %v399_v8 = vadd.f32 %v398_v7, %v8247_v4 }
 0x1f7   :  { %v6657_v11 = vpop.f32.mrf.mxu0 }
 0x1f8   :  { %v403_v15 = vmul.f32 0.70710677, %v399_v8 }
 0x1fa   :  { %v406_v16 = vand.u32 2147483647, %v403_v15  ;;  %vm404_vm3 = vcmp.ge.f32.partialorder %v403_v15, 0.0 }
 0x1fc   :  { %v407_v20 = vmul.f32 0.3275911, %v406_v16  ;;  %v420_v24 = vsub.f32 0.0, %v406_v16 }
 0x1fe   :  { %v408_v21 = vadd.f32 1.0, %v407_v20  ;;  %v421_v28 = vmul.f32 %v420_v24, %v406_v16  ;;  %v9820_v20 = vmov -1.0   ;;  %v402_v24 = vmul.f32 0.5, %v399_v8 }
 0x200   :  { %7644 = vrcp.f32 %v408_v21  ;;  %v422_v2 = vmul.f32 1.442695, %v421_v28  ;;  %v405_v21 = vsel %vm404_vm3, 1.0, %v9820_v20  ;;  %v8379_v20 = vld [vmem:[%s9788_s3 + $0x1b8] sm:$0xff] }
 0x201   :  { %9894 = vst [vmem:[#allocation19_spill] sm:$0xff] %v8379_v20 }
 0x202   :  { %7646 = vpow2.f32 %v422_v2 }
 0x20d   :  { %v7645_v62 = vpop.eup %7644 }
 0x20e   :  { %v411_v60 = vmul.f32 1.0614054, %v7645_v62 }
 0x20f   :  { %v7647_v11 = vpop.eup %7646 }
 0x210   :  { %v412_v58 = vadd.f32 -1.4531521, %v411_v60 }
 0x212   :  { %v413_v56 = vmul.f32 %v7645_v62, %v412_v58 }
 0x214   :  { %v414_v40 = vadd.f32 1.4214138, %v413_v56 }
 0x216   :  { %v415_v54 = vmul.f32 %v7645_v62, %v414_v40 }
 0x218   :  { %v416_v52 = vadd.f32 -0.28449672, %v415_v54 }
 0x21a   :  { %v417_v50 = vmul.f32 %v7645_v62, %v416_v52 }
 0x21c   :  { %v418_v48 = vadd.f32 0.2548296, %v417_v50 }
 0x21e   :  { %v419_v7 = vmul.f32 %v7645_v62, %v418_v48 }
 0x220   :  { %v424_v4 = vmul.f32 %v7647_v11, %v419_v7 }
 0x222   :  { %v425_v46 = vsub.f32 1.0, %v424_v4 }
 0x224   :  { %v426_v16 = vmul.f32 %v425_v46, %v405_v21 }
 0x226   :  { %v427_v44 = vadd.f32 1.0, %v426_v16 }
 0x228   :  { %v428_v60 = vmul.f32 %v427_v44, %v402_v24 }
 0x22a   :  { %v432_v58 = vsel %vm431_vm4, %v428_v60, 0.0 }
 0x22b   :  { %v433_v56 = vrot.slane %v432_v58, 4 }
 0x22d   :  { %v434_v40 = vadd.f32 %v433_v56, %v432_v58  ;;  %v8253_v56 = vpop.permute.xlu1 %456 }
 0x22f   :  { %v435_v54 = vrot.slane %v434_v40, 2 }
 0x231   :  { %v436_v52 = vadd.f32 %v435_v54, %v434_v40  ;;  %v8256_v54 = vpop.permute.xlu0 %462 }
 0x233   :  { %v437_v50 = vrot.slane %v436_v52, 1 }
 0x235   :  { %v438_v48 = vadd.f32 %v437_v50, %v436_v52  ;;  %v8264_v52 = vld [vmem:[%s9788_s3 + $0x178] sm:$0xff] }
 0x236   :  { %v8269_v50 = vld [vmem:[%s9788_s3 + $0x1f8] sm:$0xff] }
 0x237   :  { %v440_v62 = vmul.f32 0.25, %v438_v48  ;;  %v8276_v48 = vld [vmem:[%s9788_s3 + $0x170] sm:$0xff] }
 0x239   :  { %v441_v2 = vsub.f32 %v428_v60, %v440_v62  ;;  %v8281_v62 = vld [vmem:[%s9788_s3 + $0x1f0] sm:$0xff] }
 0x23b   :  { %v442_v15 = vmul.f32 %v441_v2, %v441_v2 }
 0x23d   :  { %v443_v4 = vsel %vm431_vm4, %v442_v15, 0.0  ;;  %v8290_v15 = vld [vmem:[%s9788_s3 + $0x168] sm:$0xff] }
 0x23e   :  { %v444_v28 = vrot.slane %v443_v4, 4 }
 0x240   :  { %v445_v7 = vadd.f32 %v444_v28, %v443_v4  ;;  %v8295_v4 = vld [vmem:[%s9788_s3 + $0x1e8] sm:$0xff]  ;;  %v8304_v28 = vld [vmem:[%s9788_s3 + $0x160] sm:$0xff] }
 0x242   :  { %v446_v46 = vrot.slane %v445_v7, 2 }
 0x244   :  { %v447_v8 = vadd.f32 %v446_v46, %v445_v7  ;;  %v8309_v7 = vld [vmem:[%s9788_s3 + $0x1e0] sm:$0xff]  ;;  %v8318_v46 = vld [vmem:[%s9788_s3 + $0x158] sm:$0xff] }
 0x246   :  { %v448_v11 = vrot.slane %v447_v8, 1 }
 0x248   :  { %v449_v21 = vadd.f32 %v448_v11, %v447_v8  ;;  %v8323_v8 = vld [vmem:[%s9788_s3 + $0x1d8] sm:$0xff]  ;;  %v8332_v11 = vld [vmem:[%s9788_s3 + $0x150] sm:$0xff] }
 0x24a   :  { %v450_v44 = vmul.f32 0.25, %v449_v21  ;;  %v8337_v21 = vld [vmem:[%s9788_s3 + $0x1d0] sm:$0xff] }
 0x24c   :  { %v451_v16 = vadd.f32 1e-05, %v450_v44  ;;  %v8346_v44 = vld [vmem:[%s9788_s3 + $0x148] sm:$0xff] }
 0x24d   :  { %9889 = vst [vmem:[#allocation14_spill] sm:$0xff] %v8346_v44 }
 0x24e   :  { %7648 = vrsqrt.f32 %v451_v16  ;;  %v8351_v16 = vld [vmem:[%s9788_s3 + $0x1c8] sm:$0xff] }
 0x24f   :  { %9890 = vst [vmem:[#allocation15_spill] sm:$0xff] %v8351_v16 }
 0x25b   :  { %v7649_v24 = vpop.eup %7648 }
 0x25c   :  { %v453_v58 = vmul.f32 %v7649_v24, %v441_v2  ;;  %v9888_v2 = vmov 0.0   ;;  %v8360_v24 = vld [vmem:[%s9788_s3 + $0x140] sm:$0xff] }
 0x25d   :  { %9891 = vst [vmem:[#allocation16_spill] sm:$0xff] %v8360_v24 }
 0x25e   :  { %v459_v40 = vmul.f32 %v8253_v56, %v453_v58  ;;  %v8365_v58 = vld [vmem:[%s9788_s3 + $0x1c0] sm:$0xff] }
 0x25f   :  { %9892 = vst [vmem:[#allocation17_spill] sm:$0xff] %v8365_v58 }
 0x260   :  { %v8259_v60 = vadd.f32 %v8256_v54, %v459_v40  ;;  %v8374_v40 = vld [vmem:[%s9788_s3 + $0x138] sm:$0xff] }
 0x261   :  { %9893 = vst [vmem:[#allocation18_spill] sm:$0xff] %v8374_v40 }
 0x262   :  { %6691 = vmatmul.mubr.f32.vlgmr.msra.gmra.mxu1 %v8259_v60  ;;  %6726 = vmatmul.mubr.f32.vlgmr.msra.gmra.mxu0 %v8259_v60 }
 0x263   :  { %6729 = vmatpush3.msra.mxu1 %v8264_v52  ;;  %6764 = vmatpush3.msra.mxu0 %v8269_v50 }
 0x264   :  { %6730 = vmatprep.subr.mxu1 %v9888_v2  ;;  %6765 = vmatprep.subr.mxu0 %v9888_v2 }
 0x265   :  { %6731 = vmatpush3.msra.mxu1 %v8276_v48  ;;  %6766 = vmatpush3.msra.mxu0 %v8281_v62 }
 0x266   :  { %6732 = vmatprep.subr.mxu1 %v9888_v2  ;;  %6767 = vmatprep.subr.mxu0 %v9888_v2 }
 0x267   :  { %6733 = vmatpush3.msra.mxu1 %v8290_v15  ;;  %6768 = vmatpush3.msra.mxu0 %v8295_v4 }
 0x268   :  { %6734 = vmatprep.subr.mxu1 %v9888_v2  ;;  %6769 = vmatprep.subr.mxu0 %v9888_v2 }
 0x269   :  { %6735 = vmatpush3.msra.mxu1 %v8304_v28  ;;  %6770 = vmatpush3.msra.mxu0 %v8309_v7 }
 0x26a   :  { %6736 = vmatprep.subr.mxu1 %v9888_v2  ;;  %6771 = vmatprep.subr.mxu0 %v9888_v2 }
 0x26b   :  { %6737 = vmatpush3.msra.mxu1 %v8318_v46  ;;  %6772 = vmatpush3.msra.mxu0 %v8323_v8 }
 0x26c   :  { %6738 = vmatprep.subr.mxu1 %v9888_v2  ;;  %6773 = vmatprep.subr.mxu0 %v9888_v2 }
 0x26d   :  { %6739 = vmatpush3.msra.mxu1 %v8332_v11  ;;  %6774 = vmatpush3.msra.mxu0 %v8337_v21 }
 0x26e   :  { %6740 = vmatprep.subr.mxu1 %v9888_v2  ;;  %6775 = vmatprep.subr.mxu0 %v9888_v2 }
 0x26f   :  { %6741 = vmatpush3.msra.mxu1 %v8346_v44  ;;  %6776 = vmatpush3.msra.mxu0 %v8351_v16  ;;  %v8388_v16 = vld [vmem:[%s9788_s3 + $0x130] sm:$0xff] }
 0x270   :  { %6742 = vmatprep.subr.mxu1 %v9888_v2  ;;  %6777 = vmatprep.subr.mxu0 %v9888_v2  ;;  %9895 = vst [vmem:[#allocation20_spill] sm:$0xff] %v8388_v16  ;;  %v8393_v44 = vld [vmem:[%s9788_s3 + $0x1b0] sm:$0xff] }
 0x271   :  { %6743 = vmatpush3.msra.mxu1 %v8360_v24  ;;  %6778 = vmatpush3.msra.mxu0 %v8365_v58  ;;  %9896 = vst [vmem:[#allocation21_spill] sm:$0xff] %v8393_v44  ;;  %v8402_v58 = vld [vmem:[%s9788_s3 + $0x128] sm:$0xff] }
 0x272   :  { %6744 = vmatprep.subr.mxu1 %v9888_v2  ;;  %6779 = vmatprep.subr.mxu0 %v9888_v2  ;;  %9897 = vst [vmem:[#allocation22_spill] sm:$0xff] %v8402_v58  ;;  %v8407_v24 = vld [vmem:[%s9788_s3 + $0x1a8] sm:$0xff] }
 0x273   :  { %6745 = vmatpush3.msra.mxu1 %v8374_v40  ;;  %6780 = vmatpush3.msra.mxu0 %v8379_v20  ;;  %9898 = vst [vmem:[#allocation23_spill] sm:$0xff] %v8407_v24  ;;  %v8416_v20 = vld [vmem:[%s9788_s3 + $0x120] sm:$0xff] }
 0x274   :  { %6746 = vmatprep.subr.mxu1 %v9888_v2  ;;  %6781 = vmatprep.subr.mxu0 %v9888_v2  ;;  %9899 = vst [vmem:[#allocation24_spill] sm:$0xff] %v8416_v20  ;;  %v8421_v40 = vld [vmem:[%s9788_s3 + $0x1a0] sm:$0xff] }
 0x275   :  { %6747 = vmatpush3.msra.mxu1 %v8388_v16  ;;  %6782 = vmatpush3.msra.mxu0 %v8393_v44  ;;  %9900 = vst [vmem:[#allocation25_spill] sm:$0xff] %v8421_v40  ;;  %v8430_v44 = vld [vmem:[%s9788_s3 + $0x118] sm:$0xff] }
 0x276   :  { %6748 = vmatprep.subr.mxu1 %v9888_v2  ;;  %6783 = vmatprep.subr.mxu0 %v9888_v2  ;;  %9901 = vst [vmem:[#allocation26_spill] sm:$0xff] %v8430_v44  ;;  %v8435_v16 = vld [vmem:[%s9788_s3 + $0x198] sm:$0xff] }
 0x277   :  { %6749 = vmatpush3.msra.mxu1 %v8402_v58  ;;  %6784 = vmatpush3.msra.mxu0 %v8407_v24  ;;  %9902 = vst [vmem:[#allocation27_spill] sm:$0xff] %v8435_v16  ;;  %v8444_v24 = vld [vmem:[%s9788_s3 + $0x110] sm:$0xff] }
 0x278   :  { %6750 = vmatprep.subr.mxu1 %v9888_v2  ;;  %6785 = vmatprep.subr.mxu0 %v9888_v2  ;;  %v8449_v58 = vld [vmem:[%s9788_s3 + $0x190] sm:$0xff] }
 0x279   :  { %6751 = vmatpush3.msra.mxu1 %v8416_v20  ;;  %6786 = vmatpush3.msra.mxu0 %v8421_v40  ;;  %v8458_v40 = vld [vmem:[%s9788_s3 + $0x108] sm:$0xff] }
 0x27a   :  { %6752 = vmatprep.subr.mxu1 %v9888_v2  ;;  %6787 = vmatprep.subr.mxu0 %v9888_v2  ;;  %9903 = vst [vmem:[#allocation28_spill] sm:$0xff] %v8458_v40  ;;  %v8463_v20 = vld [vmem:[%s9788_s3 + $0x188] sm:$0xff] }
 0x27b   :  { %6753 = vmatpush3.msra.mxu1 %v8430_v44  ;;  %6788 = vmatpush3.msra.mxu0 %v8435_v16  ;;  %9904 = vst [vmem:[#allocation29_spill] sm:$0xff] %v8463_v20  ;;  %v8472_v16 = vld [vmem:[%s9788_s3 + $0x100] sm:$0xff] }
 0x27c   :  { %6754 = vmatprep.subr.mxu1 %v9888_v2  ;;  %6789 = vmatprep.subr.mxu0 %v9888_v2  ;;  %9905 = vst [vmem:[#allocation30_spill] sm:$0xff] %v8472_v16  ;;  %v8479_v44 = vld [vmem:[%s9788_s3 + $0x180] sm:$0xff] }
 0x27d   :  { %6755 = vmatpush3.msra.mxu1 %v8444_v24  ;;  %6790 = vmatpush3.msra.mxu0 %v8449_v58  ;;  %9906 = vst [vmem:[#allocation31_spill] sm:$0xff] %v8479_v44 }
 0x27e   :  { %6756 = vmatprep.subr.mxu1 %v9888_v2  ;;  %6791 = vmatprep.subr.mxu0 %v9888_v2 }
 0x27f   :  { %6757 = vmatpush3.msra.mxu1 %v8458_v40  ;;  %6792 = vmatpush3.msra.mxu0 %v8463_v20  ;;  %v8492_v20 = vld [vmem:[%s9788_s3 + $0x278] sm:$0xff] }
 0x280   :  { %6758 = vmatprep.subr.mxu1 %v9888_v2  ;;  %6793 = vmatprep.subr.mxu0 %v9888_v2  ;;  %9907 = vst [vmem:[#allocation32_spill] sm:$0xff] %v8492_v20  ;;  %v8526_v40 = vld [vmem:[%s9788_s3 + $0x258] sm:$0xff] }
 0x281   :  { %6759 = vmatpush3.msra.mxu1 %v8472_v16  ;;  %6760 = vmatprep.mubr.msk.f32.mxu1 %vm7672_vm1, %v9888_v2  ;;  %v8500_v16 = vld [vmem:[%s9788_s3 + $0x270] sm:$0xff]  ;;  %9911 = vst [vmem:[#allocation36_spill] sm:$0xff] %v8526_v40 }
 0x282   :  { %6794 = vmatpush3.msra.mxu0 %v8479_v44  ;;  %6795 = vmatprep.mubr.msk.f32.mxu0 %vm7672_vm1, %v9888_v2  ;;  %9908 = vst [vmem:[#allocation33_spill] sm:$0xff] %v8500_v16  ;;  %v8510_v44 = vld [vmem:[%s9788_s3 + $0x268] sm:$0xff] }
 0x283   :  { %6761 = vmatmul.mubr.f32.vlgmr.msra.gmra.mxu1 %v8259_v60  ;;  %6796 = vmatmul.mubr.f32.vlgmr.msra.gmra.mxu0 %v8259_v60  ;;  %9909 = vst [vmem:[#allocation34_spill] sm:$0xff] %v8510_v44 }
 0x284   :  { %6798 = vmatprep.subr.mxu1 %v9888_v2  ;;  %6830 = vmatprep.mubr.msk.f32.mxu1 %vm7672_vm1, %v9888_v2 }
 0x285   :  { %6799 = vmatpush3.msra.mxu1 %v8492_v20  ;;  %6833 = vmatprep.subr.mxu0 %v9888_v2  ;;  %v8519_v20 = vld [vmem:[%s9788_s3 + $0x260] sm:$0xff] }
 0x286   :  { %6800 = vmatprep.subr.mxu1 %v9888_v2  ;;  %6835 = vmatprep.mubr.msk.f32.mxu0 %vm7672_vm1, %v9888_v2  ;;  %9910 = vst [vmem:[#allocation35_spill] sm:$0xff] %v8519_v20 }
 0x287   :  { %6801 = vmatpush3.msra.mxu1 %v8500_v16  ;;  %v8533_v16 = vld [vmem:[%s9788_s3 + $0x250] sm:$0xff] }
 0x288   :  { %6802 = vmatprep.subr.mxu1 %v9888_v2  ;;  %9912 = vst [vmem:[#allocation37_spill] sm:$0xff] %v8533_v16 }
 0x289   :  { %6803 = vmatpush3.msra.mxu1 %v8510_v44  ;;  %v8540_v44 = vld [vmem:[%s9788_s3 + $0x248] sm:$0xff] }
 0x28a   :  { %6804 = vmatprep.subr.mxu1 %v9888_v2  ;;  %9913 = vst [vmem:[#allocation38_spill] sm:$0xff] %v8540_v44 }
 0x28b   :  { %6805 = vmatpush3.msra.mxu1 %v8519_v20  ;;  %v8547_v20 = vld [vmem:[%s9788_s3 + $0x240] sm:$0xff] }
 0x28c   :  { %6806 = vmatprep.subr.mxu1 %v9888_v2  ;;  %9914 = vst [vmem:[#allocation39_spill] sm:$0xff] %v8547_v20 }
 0x28d   :  { %6807 = vmatpush3.msra.mxu1 %v8526_v40  ;;  %v8554_v40 = vld [vmem:[%s9788_s3 + $0x238] sm:$0xff] }
 0x28e   :  { %6808 = vmatprep.subr.mxu1 %v9888_v2  ;;  %9915 = vst [vmem:[#allocation40_spill] sm:$0xff] %v8554_v40 }
 0x28f   :  { %6809 = vmatpush3.msra.mxu1 %v8533_v16  ;;  %v8561_v16 = vld [vmem:[%s9788_s3 + $0x230] sm:$0xff] }
 0x290   :  { %6810 = vmatprep.subr.mxu1 %v9888_v2  ;;  %9916 = vst [vmem:[#allocation41_spill] sm:$0xff] %v8561_v16 }
 0x291   :  { %6811 = vmatpush3.msra.mxu1 %v8540_v44  ;;  %v8568_v44 = vld [vmem:[%s9788_s3 + $0x228] sm:$0xff] }
 0x292   :  { %6812 = vmatprep.subr.mxu1 %v9888_v2  ;;  %9917 = vst [vmem:[#allocation42_spill] sm:$0xff] %v8568_v44 }
 0x293   :  { %6813 = vmatpush3.msra.mxu1 %v8547_v20  ;;  %v8575_v20 = vld [vmem:[%s9788_s3 + $0x220] sm:$0xff] }
 0x294   :  { %6814 = vmatprep.subr.mxu1 %v9888_v2  ;;  %9918 = vst [vmem:[#allocation43_spill] sm:$0xff] %v8575_v20 }
 0x295   :  { %6815 = vmatpush3.msra.mxu1 %v8554_v40  ;;  %v8582_v40 = vld [vmem:[%s9788_s3 + $0x218] sm:$0xff] }
 0x296   :  { %6816 = vmatprep.subr.mxu1 %v9888_v2 }
 0x297   :  { %6817 = vmatpush3.msra.mxu1 %v8561_v16  ;;  %v8589_v16 = vld [vmem:[%s9788_s3 + $0x210] sm:$0xff] }
 0x298   :  { %6818 = vmatprep.subr.mxu1 %v9888_v2 }
 0x299   :  { %6819 = vmatpush3.msra.mxu1 %v8568_v44  ;;  %v8596_v44 = vld [vmem:[%s9788_s3 + $0x208] sm:$0xff] }
 0x29a   :  { %6820 = vmatprep.subr.mxu1 %v9888_v2 }
 0x29b   :  { %6821 = vmatpush3.msra.mxu1 %v8575_v20  ;;  %v8603_v20 = vld [vmem:[%s9788_s3 + $0x200] sm:$0xff] }
 0x29c   :  { %6822 = vmatprep.subr.mxu1 %v9888_v2 }
 0x29d   :  { %6823 = vmatpush3.msra.mxu1 %v8582_v40 }
 0x29e   :  { %6824 = vmatprep.subr.mxu1 %v9888_v2 }
 0x29f   :  { %6825 = vmatpush3.msra.mxu1 %v8589_v16 }
 0x2a0   :  { %6826 = vmatprep.subr.mxu1 %v9888_v2 }
 0x2a1   :  { %6827 = vmatpush3.msra.mxu1 %v8596_v44 }
 0x2a2   :  { %6828 = vmatprep.subr.mxu1 %v9888_v2 }
 0x2a3   :  { %6829 = vmatpush3.msra.mxu1 %v8603_v20 }
 0x2a4   :  { %6831 = vmatmul.mubr.f32.vlgmr.msra.gmra.mxu1 %v8259_v60  ;;  %6873 = vmatprep.subr.mxu1 %v7812_v0 }
 0x2a5   :  { %6874 = vmatpush3.msra.mxu1 %v7812_v0  ;;  %v5858_v0 = vld [vmem:[%s9789_s1 + $0x10] sm:$0xff] }
 0x2a6   :  { %6875 = vmatprep.subr.mxu1 %v7817_v1  ;;  %6889 = vmatprep.mubr.msk.f32.mxu1 %vm105_vm0, %v5858_v0 }
 0x2a7   :  { %6876 = vmatpush3.msra.mxu1 %v7817_v1  ;;  %v5859_v1 = vld [vmem:[%s9789_s1 + $0x18] sm:$0xff] }
 0x2a8   :  { %6877 = vmatprep.subr.mxu1 %v7824_v3 }
 0x2a9   :  { %6878 = vmatpush3.msra.mxu1 %v7824_v3  ;;  %v8639_v3 = vld [vmem:[%s9790_s11] sm:$0xf] }
 0x2aa   :  { %6879 = vmatprep.subr.mxu1 %v7835_v5 }
 0x2ab   :  { %6880 = vmatpush3.msra.mxu1 %v7835_v5 }
 0x2ac   :  { %6881 = vmatprep.subr.mxu1 %v7842_v6 }
 0x2ad   :  { %6882 = vmatpush3.msra.mxu1 %v7842_v6 }
 0x2ae   :  { %6883 = vmatprep.subr.mxu1 %v7855_v9 }
 0x2af   :  { %6884 = vmatpush3.msra.mxu1 %v7855_v9 }
 0x2b0   :  { %6885 = vmatprep.subr.mxu1 %v7868_v12 }
 0x2b1   :  { %6886 = vmatpush3.msra.mxu1 %v7868_v12 }
 0x2b2   :  { %6887 = vmatprep.subr.mxu1 %v7875_v13 }
 0x2b3   :  { %6888 = vmatpush3.msra.mxu1 %v7875_v13  ;;  %v8650_v13 = vld [vmem:[%s9790_s11 + $0x4] sm:$0xf] }
 0x2b4   :  { %6911 = vmatprep.subr.mxu1 %v9888_v2  ;;  %6890 = vmatmul.mubr.msk.f32.vlgmr.msra.gmra.mxu1 %vm105_vm0, %v5859_v1 }
 0x2b5   :  { %6915 = vmatprep.mubr.msk.f32.mxu1 %vm7672_vm1, %v9888_v2 }
 0x322   :  { %v548_v5 = vpop.f32.mrf.mxu1  ;;  %v635_v6 = vpop.f32.mrf.mxu0 }
 0x323   :  { %6834 = vmatpush3.msk.msra.mxu0 %vm431_vm4, %v635_v6 }
 0x324   :  { %v6692_v9 = vpop.f32.mrf.mxu1  ;;  %v6727_v12 = vpop.f32.mrf.mxu0  ;;  %6836 = vmatmul.mubr.msk.f32.vlgmr.msra.gmra.mxu0 %vm908_vm5, %v8639_v3  ;;  %6838 = vmatprep.subr.mxu0 %v9888_v2 }
 0x325   :  { %6840 = vmatprep.mubr.msk.f32.mxu0 %vm7672_vm1, %v9888_v2  ;;  %v8662_v12 = vld [vmem:[%s9790_s11 + $0x8] sm:$0xf] }
 0x343   :  { %v722_v60 = vpop.f32.mrf.mxu1  ;;  %v809_v0 = vpop.f32.mrf.mxu0 }
 0x344   :  { %6839 = vmatpush3.msk.msra.mxu0 %vm431_vm4, %v722_v60 }
 0x345   :  { %v6762_v1 = vpop.f32.mrf.mxu1  ;;  %v6797_v9 = vpop.f32.mrf.mxu0  ;;  %6841 = vmatmul.mubr.msk.f32.vlgmr.msra.gmra.mxu0 %vm908_vm5, %v8650_v13  ;;  %6843 = vmatprep.subr.mxu0 %v9888_v2 }
 0x346   :  { %6844 = vmatpush3.msk.msra.mxu0 %vm431_vm4, %v809_v0  ;;  %6845 = vmatprep.mubr.msk.f32.mxu0 %vm7672_vm1, %v9888_v2  ;;  %v8673_v1 = vld [vmem:[%s9791_s13] sm:$0xf] }
 0x347   :  { %6848 = vmatprep.subr.mxu0 %v9888_v2 }
 0x349   :  { %6846 = vmatmul.mubr.msk.f32.vlgmr.msra.gmra.mxu0 %vm908_vm5, %v8662_v12 }
 0x34a   :  { %6849 = vmatpush3.msk.msra.mxu0 %vm431_vm4, %v548_v5  ;;  %6850 = vmatprep.mubr.msk.f32.mxu0 %vm7672_vm1, %v9888_v2  ;;  %v8684_v5 = vld [vmem:[%s9791_s13 + $0x4] sm:$0xf] }
 0x34b   :  { %6853 = vmatprep.subr.mxu0 %v9888_v2  ;;  %9919 = vst [vmem:[#allocation44_spill] sm:$0xff] %v8684_v5 }
 0x34d   :  { %6851 = vmatmul.mubr.msk.f32.vlgmr.msra.gmra.mxu0 %vm908_vm5, %v8673_v1 }
 0x34e   :  { %6854 = vmatpush3.msk.msra.mxu0 %vm431_vm4, %v635_v6  ;;  %6855 = vmatprep.mubr.msk.f32.mxu0 %vm7672_vm1, %v9888_v2  ;;  %v8695_v6 = vld [vmem:[%s9791_s13 + $0x8] sm:$0xf] }
 0x34f   :  { %6858 = vmatprep.subr.mxu0 %v9888_v2  ;;  %9920 = vst [vmem:[#allocation45_spill] sm:$0xff] %v8695_v6 }
 0x351   :  { %6856 = vmatmul.mubr.msk.f32.vlgmr.msra.gmra.mxu0 %vm908_vm5, %v8684_v5 }
 0x352   :  { %6859 = vmatpush3.msk.msra.mxu0 %vm431_vm4, %v722_v60  ;;  %6860 = vmatprep.mubr.msk.f32.mxu0 %vm7672_vm1, %v9888_v2  ;;  %v8706_v60 = vld [vmem:[%s9791_s13 + $0xc] sm:$0xf] }
 0x353   :  { %6863 = vmatprep.subr.mxu0 %v9888_v2 }
 0x355   :  { %6861 = vmatmul.mubr.msk.f32.vlgmr.msra.gmra.mxu0 %vm908_vm5, %v8695_v6  ;;  %v1536_v6 = vld [vmem:[%s9789_s1] sm:$0xff] }
 0x356   :  { %6864 = vmatpush3.msk.msra.mxu0 %vm431_vm4, %v809_v0  ;;  %6865 = vmatprep.mubr.msk.f32.mxu0 %vm7672_vm1, %v9888_v2  ;;  %v8716_v0 = vld [vmem:[%s9791_s13 + $0x10] sm:$0xf] }
 0x357   :  { %6868 = vmatprep.subr.mxu0 %v9888_v2 }
 0x359   :  { %6866 = vmatmul.mubr.msk.f32.vlgmr.msra.gmra.mxu0 %vm908_vm5, %v8706_v60 }
 0x35a   :  { %6870 = vmatprep.mubr.msk.f32.mxu0 %vm7672_vm1, %v9888_v2 }
 0x364   :  { %v896_v9 = vpop.f32.mrf.mxu1 }
 0x365   :  { %6869 = vmatpush3.msk.msra.mxu0 %vm431_vm4, %v896_v9 }
 0x366   :  { %v6832_v5 = vpop.f32.mrf.mxu1  ;;  %6871 = vmatmul.mubr.msk.f32.vlgmr.msra.gmra.mxu0 %vm908_vm5, %v8716_v0  ;;  %6892 = vmatprep.subr.mxu0 %v7891_v17 }
 0x367   :  { %6893 = vmatpush3.msra.mxu0 %v7891_v17  ;;  %6908 = vmatprep.mubr.msk.f32.mxu0 %vm105_vm0, %v1536_v6  ;;  %v1537_v17 = vld [vmem:[%s9789_s1 + $0x8] sm:$0xff] }
 0x368   :  { %6894 = vmatprep.subr.mxu0 %v7901_v19 }
 0x369   :  { %6895 = vmatpush3.msra.mxu0 %v7901_v19 }
 0x36a   :  { %6896 = vmatprep.subr.mxu0 %v7915_v22 }
 0x36b   :  { %6897 = vmatpush3.msra.mxu0 %v7915_v22 }
 0x36c   :  { %6898 = vmatprep.subr.mxu0 %v7923_v23 }
 0x36d   :  { %6899 = vmatpush3.msra.mxu0 %v7923_v23  ;;  %v8780_v23 = vpop.permute.xlu1 %903 }
 0x36e   :  { %6900 = vmatprep.subr.mxu0 %v7936_v26 }
 0x36f   :  { %6901 = vmatpush3.msra.mxu0 %v7936_v26 }
 0x370   :  { %6902 = vmatprep.subr.mxu0 %v7943_v27 }
 0x371   :  { %6903 = vmatpush3.msra.mxu0 %v7943_v27 }
 0x372   :  { %6904 = vmatprep.subr.mxu0 %v7956_v30 }
 0x373   :  { %6905 = vmatpush3.msra.mxu0 %v7956_v30 }
 0x374   :  { %6906 = vmatprep.subr.mxu0 %v7963_v31 }
 0x375   :  { %6907 = vmatpush3.msra.mxu0 %v7963_v31 }
 0x376   :  { %6909 = vmatmul.mubr.msk.f32.vlgmr.msra.gmra.mxu0 %vm105_vm0, %v1537_v17  ;;  %6918 = vmatprep.subr.mxu0 %v9888_v2  ;;  %v6891_v17 = vpop.f32.mrf.mxu1 }
 0x377   :  { %6919 = vmatpush3.msra.mxu0 %v8026_v32  ;;  %6950 = vmatprep.mubr.msk.f32.mxu0 %vm7672_vm1, %v9888_v2 }
 0x378   :  { %6920 = vmatprep.subr.mxu0 %v9888_v2 }
 0x379   :  { %6921 = vmatpush3.msra.mxu0 %v8040_v34 }
 0x37a   :  { %6922 = vmatprep.subr.mxu0 %v9888_v2 }
 0x37b   :  { %6923 = vmatpush3.msra.mxu0 %v8054_v36 }
 0x37c   :  { %6924 = vmatprep.subr.mxu0 %v9888_v2 }
 0x37d   :  { %6925 = vmatpush3.msra.mxu0 %v8068_v38 }
 0x37e   :  { %6926 = vmatprep.subr.mxu0 %v9888_v2 }
 0x37f   :  { %6927 = vmatpush3.msra.mxu0 %v8082_v41  ;;  %v8785_v41 = vpop.permute.xlu0 %1147 }
 0x380   :  { %6928 = vmatprep.subr.mxu0 %v9888_v2 }
 0x381   :  { %6929 = vmatpush3.msra.mxu0 %v8096_v43 }
 0x382   :  { %6930 = vmatprep.subr.mxu0 %v9888_v2 }
 0x383   :  { %6931 = vmatpush3.msra.mxu0 %v8110_v45 }
 0x384   :  { %6932 = vmatprep.subr.mxu0 %v9888_v2 }
 0x385   :  { %6933 = vmatpush3.msra.mxu0 %v8124_v47 }
 0x386   :  { %6934 = vmatprep.subr.mxu0 %v9888_v2 }
 0x387   :  { %6935 = vmatpush3.msra.mxu0 %v8138_v49 }
 0x388   :  { %6936 = vmatprep.subr.mxu0 %v9888_v2 }
 0x389   :  { %6937 = vmatpush3.msra.mxu0 %v8152_v51 }
 0x38a   :  { %6938 = vmatprep.subr.mxu0 %v9888_v2 }
 0x38b   :  { %6939 = vmatpush3.msra.mxu0 %v8166_v53 }
 0x38c   :  { %6940 = vmatprep.subr.mxu0 %v9888_v2 }
 0x38d   :  { %6941 = vmatpush3.msra.mxu0 %v8180_v55 }
 0x38e   :  { %6942 = vmatprep.subr.mxu0 %v9888_v2 }
 0x38f   :  { %6943 = vmatpush3.msra.mxu0 %v8194_v57 }
 0x390   :  { %6944 = vmatprep.subr.mxu0 %v9888_v2 }
 0x391   :  { %6945 = vmatpush3.msra.mxu0 %v8208_v59 }
 0x392   :  { %6946 = vmatprep.subr.mxu0 %v9888_v2 }
 0x393   :  { %6947 = vmatpush3.msra.mxu0 %v8222_v61 }
 0x394   :  { %6948 = vmatprep.subr.mxu0 %v9888_v2 }
 0x395   :  { %6949 = vmatpush3.msra.mxu0 %v8234_v63 }
 0x396   :  { %6988 = vmatprep.subr.mxu0 %v9888_v2 }
 0x3e4   :  { %v981_v19 = vpop.f32.mrf.mxu0 }
 0x3e5   :  { %v985_v26 = vadd.f32 %v981_v19, %v8780_v23 }
 0x3e6   :  { %v6837_v22 = vpop.f32.mrf.mxu0 }
 0x3e7   :  { %v1613_v22 = vpop.f32.mrf.mxu1 }
 0x405   :  { %v1060_v27 = vpop.f32.mrf.mxu0 }
 0x406   :  { %v1064_v30 = vadd.f32 %v1060_v27, %v985_v26 }
 0x407   :  { %v6842_v31 = vpop.f32.mrf.mxu0 }
 0x409   :  { %v1139_v32 = vpop.f32.mrf.mxu0 }
 0x40a   :  { %v8783_v34 = vadd.f32 %v1139_v32, %v1064_v30 }
 0x40b   :  { %v6847_v36 = vpop.f32.mrf.mxu0 }
 0x40d   :  { %v1224_v38 = vpop.f32.mrf.mxu0 }
 0x40e   :  { %v1228_v45 = vadd.f32 %v1224_v38, %v8785_v41 }
 0x40f   :  { %v6852_v43 = vpop.f32.mrf.mxu0 }
 0x411   :  { %v1300_v47 = vpop.f32.mrf.mxu0 }
 0x412   :  { %v1304_v49 = vadd.f32 %v1300_v47, %v1228_v45 }
 0x413   :  { %v6857_v51 = vpop.f32.mrf.mxu0 }
 0x415   :  { %v1376_v53 = vpop.f32.mrf.mxu0 }
 0x416   :  { %v1380_v55 = vadd.f32 %v1376_v53, %v1304_v49 }
 0x417   :  { %v6862_v57 = vpop.f32.mrf.mxu0 }
 0x419   :  { %v1452_v59 = vpop.f32.mrf.mxu0 }
 0x41a   :  { %v1456_v61 = vadd.f32 %v1452_v59, %v1380_v55 }
 0x41b   :  { %v6867_v63 = vpop.f32.mrf.mxu0 }
 0x426   :  { %v1531_v5 = vpop.f32.mrf.mxu0 }
 0x427   :  { %v8788_v6 = vadd.f32 %v1531_v5, %v1456_v61 }
 0x428   :  { %v6872_v9 = vpop.f32.mrf.mxu0 }
 0x429   :  { %9921 = vst [vmem:[#allocation46_spill] sm:$0xff] %v8788_v6 }
 0x436   :  { %v6910_v19 = vpop.f32.mrf.mxu0 }
 0x437   :  { %v1700_v27 = vadd.f32 %v6910_v19, %v6891_v17 }
 0x438   :  { %v1694_v26 = vpop.f32.mrf.mxu0 }
 0x439   :  { %v1695_v30 = vadd.f32 %v1694_v26, %v1613_v22 }
 0x43b   :  { %v1703_v31 = vadd.f32 %v1700_v27, %v1695_v30 }
 0x43d   :  { %v1704_v32 = vrot.slane %v1703_v31, 4 }
 0x43f   :  { %v1705_v36 = vadd.f32 %v1704_v32, %v1703_v31 }
 0x441   :  { %v1706_v38 = vrot.slane %v1705_v36, 2 }
 0x443   :  { %v1707_v43 = vadd.f32 %v1706_v38, %v1705_v36 }
 0x445   :  { %v1708_v45 = vrot.slane %v1707_v43, 1 }
 0x447   :  { %v1709_v47 = vadd.f32 %v1708_v45, %v1707_v43  ;;  %v9933_v45 = vld [vmem:[#allocation13_spill] sm:$0xff] }
 0x449   :  { %v1710_v49 = vmul.f32 0.0625, %v1709_v47 }
 0x44b   :  { %v1711_v51 = vsub.f32 %v1695_v30, %v1710_v49  ;;  %v1712_v53 = vsub.f32 %v1700_v27, %v1710_v49 }
 0x44d   :  { %v1713_v55 = vmul.f32 %v1711_v51, %v1711_v51  ;;  %v1714_v57 = vmul.f32 %v1712_v53, %v1712_v53 }
 0x44f   :  { %v1715_v59 = vadd.f32 %v1714_v57, %v1713_v55 }
 0x451   :  { %v1716_v61 = vrot.slane %v1715_v59, 4 }
 0x453   :  { %v1717_v63 = vadd.f32 %v1716_v61, %v1715_v59 }
 0x455   :  { %v1718_v5 = vrot.slane %v1717_v63, 2 }
 0x457   :  { %v1719_v9 = vadd.f32 %v1718_v5, %v1717_v63 }
 0x459   :  { %v1720_v6 = vrot.slane %v1719_v9, 1 }
 0x45b   :  { %v1721_v17 = vadd.f32 %v1720_v6, %v1719_v9  ;;  %v9932_v6 = vld [vmem:[#allocation12_spill] sm:$0xff] }
 0x45d   :  { %v1722_v19 = vmul.f32 0.0625, %v1721_v17 }
 0x45f   :  { %v1723_v22 = vadd.f32 1e-05, %v1722_v19 }
 0x461   :  { %7650 = vrsqrt.f32 %v1723_v22 }
 0x46e   :  { %v7651_v26 = vpop.eup %7650 }
 0x46f   :  { %v1725_v31 = vmul.f32 %v7651_v26, %v1711_v51  ;;  %v1726_v32 = vmul.f32 %v7651_v26, %v1712_v53 }
 0x471   :  { %v1727_v36 = vmul.f32 %v1725_v31, %v8004_v18  ;;  %v1728_v30 = vmul.f32 %v1726_v32, %v8000_v10  ;;  %v9922_v10 = vld [vmem:[#allocation2_spill] sm:$0xff]  ;;  %v9924_v18 = vld [vmem:[#allocation4_spill] sm:$0xff] }
 0x473   :  { %v1730_v27 = vadd.f32 %v1728_v30, %v8002_v14  ;;  %v1729_v38 = vadd.f32 %v1727_v36, %v8009_v25  ;;  %v9923_v14 = vld [vmem:[#allocation3_spill] sm:$0xff]  ;;  %v9925_v25 = vld [vmem:[#allocation5_spill] sm:$0xff] }
 0x475   :  { %6912 = vmatpush3.msra.mxu1 %v1730_v27 }
 0x476   :  { %6913 = vmatprep.subr.mxu1 %v9888_v2 }
 0x477   :  { %6914 = vmatpush3.msra.mxu1 %v1729_v38 }
 0x478   :  { %6916 = vmatmul.mubr.msk.f32.vlgmr.msra.gmra.mxu1 %vm328_vm2, %v8015_v29  ;;  %6953 = vmatprep.subr.mxu1 %v9888_v2  ;;  %v9926_v29 = vld [vmem:[#allocation6_spill] sm:$0xff] }
 0x479   :  { %6954 = vmatpush3.msra.mxu1 %v8031_v33  ;;  %6985 = vmatprep.mubr.msk.f32.mxu1 %vm7672_vm1, %v9888_v2  ;;  %v9927_v33 = vld [vmem:[#allocation7_spill] sm:$0xff] }
 0x47a   :  { %6955 = vmatprep.subr.mxu1 %v9888_v2 }
 0x47b   :  { %6956 = vmatpush3.msra.mxu1 %v8045_v35  ;;  %v9928_v35 = vld [vmem:[#allocation8_spill] sm:$0xff] }
 0x47c   :  { %6957 = vmatprep.subr.mxu1 %v9888_v2 }
 0x47d   :  { %6958 = vmatpush3.msra.mxu1 %v8059_v37  ;;  %v9929_v37 = vld [vmem:[#allocation9_spill] sm:$0xff] }
 0x47e   :  { %6959 = vmatprep.subr.mxu1 %v9888_v2 }
 0x47f   :  { %6960 = vmatpush3.msra.mxu1 %v8073_v39  ;;  %v9930_v39 = vld [vmem:[#allocation10_spill] sm:$0xff] }
 0x480   :  { %6961 = vmatprep.subr.mxu1 %v9888_v2 }
 0x481   :  { %6962 = vmatpush3.msra.mxu1 %v8087_v42  ;;  %v9931_v42 = vld [vmem:[#allocation11_spill] sm:$0xff] }
 0x482   :  { %6963 = vmatprep.subr.mxu1 %v9888_v2 }
 0x483   :  { %6964 = vmatpush3.msra.mxu1 %v9922_v10 }
 0x484   :  { %6965 = vmatprep.subr.mxu1 %v9888_v2 }
 0x485   :  { %6966 = vmatpush3.msra.mxu1 %v9923_v14  ;;  %v9934_v14 = vmov -1.0  }
 0x486   :  { %6967 = vmatprep.subr.mxu1 %v9888_v2 }
 0x487   :  { %6968 = vmatpush3.msra.mxu1 %v9924_v18 }
 0x488   :  { %6969 = vmatprep.subr.mxu1 %v9888_v2 }
 0x489   :  { %6970 = vmatpush3.msra.mxu1 %v9925_v25 }
 0x48a   :  { %6971 = vmatprep.subr.mxu1 %v9888_v2 }
 0x48b   :  { %6972 = vmatpush3.msra.mxu1 %v9926_v29 }
 0x48c   :  { %6973 = vmatprep.subr.mxu1 %v9888_v2 }
 0x48d   :  { %6974 = vmatpush3.msra.mxu1 %v9927_v33 }
 0x48e   :  { %6975 = vmatprep.subr.mxu1 %v9888_v2 }
 0x48f   :  { %6976 = vmatpush3.msra.mxu1 %v9928_v35 }
 0x490   :  { %6977 = vmatprep.subr.mxu1 %v9888_v2 }
 0x491   :  { %6978 = vmatpush3.msra.mxu1 %v9929_v37 }
 0x492   :  { %6979 = vmatprep.subr.mxu1 %v9888_v2 }
 0x493   :  { %6980 = vmatpush3.msra.mxu1 %v9930_v39 }
 0x494   :  { %6981 = vmatprep.subr.mxu1 %v9888_v2 }
 0x495   :  { %6982 = vmatpush3.msra.mxu1 %v9931_v42 }
 0x496   :  { %6983 = vmatprep.subr.mxu1 %v9888_v2 }
 0x497   :  { %6984 = vmatpush3.msra.mxu1 %v9932_v6 }
 0x498   :  { %7023 = vmatprep.subr.mxu1 %v9888_v2 }
 0x538   :  { %v1797_v43 = vpop.f32.mrf.mxu1 }
 0x539   :  { %v1798_v47 = vadd.f32 %v1797_v43, %v9933_v45 }
 0x53a   :  { %v6917_v49 = vpop.f32.mrf.mxu1 }
 0x53b   :  { %v1802_v51 = vmul.f32 0.70710677, %v1798_v47  ;;  %v1801_v29 = vmul.f32 0.5, %v1798_v47 }
 0x53d   :  { %v1805_v53 = vand.u32 2147483647, %v1802_v51  ;;  %vm1803_vm6 = vcmp.ge.f32.partialorder %v1802_v51, 0.0 }
 0x53e   :  { %v1804_v18 = vsel %vm1803_vm6, 1.0, %v9934_v14  ;;  %v9956_v14 = vld [vmem:[#allocation35_spill] sm:$0xff] }
 0x53f   :  { %v1806_v55 = vmul.f32 0.3275911, %v1805_v53  ;;  %v1819_v59 = vsub.f32 0.0, %v1805_v53 }
 0x541   :  { %v1807_v57 = vadd.f32 1.0, %v1806_v55  ;;  %v1820_v61 = vmul.f32 %v1819_v59, %v1805_v53 }
 0x543   :  { %7652 = vrcp.f32 %v1807_v57  ;;  %v1821_v9 = vmul.f32 1.442695, %v1820_v61 }
 0x545   :  { %7654 = vpow2.f32 %v1821_v9 }
 0x550   :  { %v7653_v63 = vpop.eup %7652 }
 0x551   :  { %v1810_v5 = vmul.f32 1.0614054, %v7653_v63 }
 0x552   :  { %v7655_v27 = vpop.eup %7654 }
 0x553   :  { %v1811_v17 = vadd.f32 -1.4531521, %v1810_v5 }
 0x555   :  { %v1812_v19 = vmul.f32 %v7653_v63, %v1811_v17 }
 0x557   :  { %v1813_v22 = vadd.f32 1.4214138, %v1812_v19 }
 0x559   :  { %v1814_v26 = vmul.f32 %v7653_v63, %v1813_v22 }
 0x55b   :  { %v1815_v31 = vadd.f32 -0.28449672, %v1814_v26 }
 0x55d   :  { %v1816_v32 = vmul.f32 %v7653_v63, %v1815_v31 }
 0x55f   :  { %v1817_v36 = vadd.f32 0.2548296, %v1816_v32 }
 0x561   :  { %v1818_v30 = vmul.f32 %v7653_v63, %v1817_v36  ;;  %v9949_v36 = vld [vmem:[#allocation28_spill] sm:$0xff] }
 0x563   :  { %v1823_v38 = vmul.f32 %v7655_v27, %v1818_v30  ;;  %v9950_v30 = vld [vmem:[#allocation29_spill] sm:$0xff]  ;;  %v9951_v27 = vld [vmem:[#allocation30_spill] sm:$0xff] }
 0x565   :  { %v1824_v10 = vsub.f32 1.0, %v1823_v38  ;;  %v9954_v38 = vld [vmem:[#allocation33_spill] sm:$0xff] }
 0x567   :  { %v1825_v25 = vmul.f32 %v1824_v10, %v1804_v18  ;;  %v9955_v10 = vld [vmem:[#allocation34_spill] sm:$0xff]  ;;  %v9957_v18 = vld [vmem:[#allocation36_spill] sm:$0xff] }
 0x569   :  { %v1826_v33 = vadd.f32 1.0, %v1825_v25  ;;  %v9958_v25 = vld [vmem:[#allocation37_spill] sm:$0xff] }
 0x56b   :  { %v1827_v35 = vmul.f32 %v1826_v33, %v1801_v29  ;;  %v9959_v29 = vld [vmem:[#allocation38_spill] sm:$0xff]  ;;  %v9960_v33 = vld [vmem:[#allocation39_spill] sm:$0xff] }
 0x56d   :  { %v1828_v37 = vsel %vm431_vm4, %v1827_v35, 0.0 }
 0x56e   :  { %v1829_v39 = vrot.slane %v1828_v37, 4 }
 0x570   :  { %v1830_v42 = vadd.f32 %v1829_v39, %v1828_v37  ;;  %v9962_v37 = vld [vmem:[#allocation41_spill] sm:$0xff]  ;;  %v9963_v39 = vld [vmem:[#allocation42_spill] sm:$0xff] }
 0x572   :  { %v1831_v6 = vrot.slane %v1830_v42, 2 }
 0x574   :  { %v1832_v43 = vadd.f32 %v1831_v6, %v1830_v42  ;;  %v9964_v42 = vld [vmem:[#allocation43_spill] sm:$0xff] }
 0x576   :  { %v1833_v45 = vrot.slane %v1832_v43, 1 }
 0x578   :  { %v1834_v49 = vadd.f32 %v1833_v45, %v1832_v43 }
 0x57a   :  { %v1835_v53 = vmul.f32 0.25, %v1834_v49 }
 0x57c   :  { %v1836_v55 = vsub.f32 %v1827_v35, %v1835_v53  ;;  %v9961_v35 = vld [vmem:[#allocation40_spill] sm:$0xff]  ;;  %v2787_v53 = vld [vmem:[%s9792_s15] sm:$0xff] }
 0x57e   :  { %v1837_v57 = vmul.f32 %v1836_v55, %v1836_v55 }
 0x580   :  { %v1838_v51 = vsel %vm431_vm4, %v1837_v57, 0.0 }
 0x581   :  { %v1839_v59 = vrot.slane %v1838_v51, 4 }
 0x583   :  { %v1840_v61 = vadd.f32 %v1839_v59, %v1838_v51 }
 0x585   :  { %v1841_v63 = vrot.slane %v1840_v61, 2 }
 0x587   :  { %v1842_v5 = vadd.f32 %v1841_v63, %v1840_v61 }
 0x589   :  { %v1843_v47 = vrot.slane %v1842_v5, 1 }
 0x58b   :  { %v1844_v9 = vadd.f32 %v1843_v47, %v1842_v5 }
 0x58d   :  { %v1845_v17 = vmul.f32 0.25, %v1844_v9 }
 0x58f   :  { %v1846_v19 = vadd.f32 1e-05, %v1845_v17 }
 0x591   :  { %7656 = vrsqrt.f32 %v1846_v19 }
 0x59e   :  { %v7657_v22 = vpop.eup %7656 }
 0x59f   :  { %v1848_v26 = vmul.f32 %v7657_v22, %v1836_v55  ;;  %v2788_v22 = vld [vmem:[%s9792_s15 + $0x8] sm:$0xff] }
 0x5a1   :  { %v1849_v31 = vmul.f32 %v1848_v26, %v8253_v56  ;;  %v9935_v56 = vld [vmem:[#allocation14_spill] sm:$0xff] }
 0x5a3   :  { %v8838_v32 = vadd.f32 %v1849_v31, %v8256_v54  ;;  %v9936_v54 = vld [vmem:[#allocation15_spill] sm:$0xff] }
 0x5a5   :  { %6951 = vmatmul.mubr.f32.vlgmr.msra.gmra.mxu0 %v8838_v32  ;;  %6986 = vmatmul.mubr.f32.vlgmr.msra.gmra.mxu1 %v8838_v32 }
 0x5a6   :  { %6989 = vmatpush3.msra.mxu0 %v8264_v52  ;;  %7024 = vmatpush3.msra.mxu1 %v8269_v50  ;;  %v9937_v52 = vld [vmem:[#allocation16_spill] sm:$0xff]  ;;  %v9938_v50 = vld [vmem:[#allocation17_spill] sm:$0xff] }
 0x5a7   :  { %6990 = vmatprep.subr.mxu0 %v9888_v2  ;;  %7025 = vmatprep.subr.mxu1 %v9888_v2 }
 0x5a8   :  { %6991 = vmatpush3.msra.mxu0 %v8276_v48  ;;  %7026 = vmatpush3.msra.mxu1 %v8281_v62  ;;  %v9939_v48 = vld [vmem:[#allocation18_spill] sm:$0xff]  ;;  %v9940_v62 = vld [vmem:[#allocation19_spill] sm:$0xff] }
 0x5a9   :  { %6992 = vmatprep.subr.mxu0 %v9888_v2  ;;  %7027 = vmatprep.subr.mxu1 %v9888_v2 }
 0x5aa   :  { %6993 = vmatpush3.msra.mxu0 %v8290_v15  ;;  %7028 = vmatpush3.msra.mxu1 %v8295_v4  ;;  %v9941_v15 = vld [vmem:[#allocation20_spill] sm:$0xff]  ;;  %v9942_v4 = vld [vmem:[#allocation21_spill] sm:$0xff] }
 0x5ab   :  { %6994 = vmatprep.subr.mxu0 %v9888_v2  ;;  %7029 = vmatprep.subr.mxu1 %v9888_v2 }
 0x5ac   :  { %6995 = vmatpush3.msra.mxu0 %v8304_v28  ;;  %7030 = vmatpush3.msra.mxu1 %v8309_v7  ;;  %v9943_v28 = vld [vmem:[#allocation22_spill] sm:$0xff]  ;;  %v9944_v7 = vld [vmem:[#allocation23_spill] sm:$0xff] }
 0x5ad   :  { %6996 = vmatprep.subr.mxu0 %v9888_v2  ;;  %7031 = vmatprep.subr.mxu1 %v9888_v2 }
 0x5ae   :  { %6997 = vmatpush3.msra.mxu0 %v8318_v46  ;;  %7032 = vmatpush3.msra.mxu1 %v8323_v8  ;;  %v9945_v46 = vld [vmem:[#allocation24_spill] sm:$0xff]  ;;  %v9946_v8 = vld [vmem:[#allocation25_spill] sm:$0xff] }
 0x5af   :  { %6998 = vmatprep.subr.mxu0 %v9888_v2  ;;  %7033 = vmatprep.subr.mxu1 %v9888_v2 }
 0x5b0   :  { %6999 = vmatpush3.msra.mxu0 %v8332_v11  ;;  %7034 = vmatpush3.msra.mxu1 %v8337_v21  ;;  %v9947_v11 = vld [vmem:[#allocation26_spill] sm:$0xff]  ;;  %v9948_v21 = vld [vmem:[#allocation27_spill] sm:$0xff] }
 0x5b1   :  { %7000 = vmatprep.subr.mxu0 %v9888_v2  ;;  %7035 = vmatprep.subr.mxu1 %v9888_v2 }
 0x5b2   :  { %7001 = vmatpush3.msra.mxu0 %v9935_v56  ;;  %7036 = vmatpush3.msra.mxu1 %v9936_v54 }
 0x5b3   :  { %7002 = vmatprep.subr.mxu0 %v9888_v2  ;;  %7037 = vmatprep.subr.mxu1 %v9888_v2 }
 0x5b4   :  { %7003 = vmatpush3.msra.mxu0 %v9937_v52  ;;  %7038 = vmatpush3.msra.mxu1 %v9938_v50 }
 0x5b5   :  { %7004 = vmatprep.subr.mxu0 %v9888_v2  ;;  %7039 = vmatprep.subr.mxu1 %v9888_v2 }
 0x5b6   :  { %7005 = vmatpush3.msra.mxu0 %v9939_v48  ;;  %7040 = vmatpush3.msra.mxu1 %v9940_v62 }
 0x5b7   :  { %7006 = vmatprep.subr.mxu0 %v9888_v2  ;;  %7041 = vmatprep.subr.mxu1 %v9888_v2 }
 0x5b8   :  { %7007 = vmatpush3.msra.mxu0 %v9941_v15  ;;  %7042 = vmatpush3.msra.mxu1 %v9942_v4 }
 0x5b9   :  { %7008 = vmatprep.subr.mxu0 %v9888_v2  ;;  %7043 = vmatprep.subr.mxu1 %v9888_v2 }
 0x5ba   :  { %7009 = vmatpush3.msra.mxu0 %v9943_v28  ;;  %7044 = vmatpush3.msra.mxu1 %v9944_v7  ;;  %v9967_v28 = vld [vmem:[#allocation46_spill] sm:$0xff] }
 0x5bb   :  { %7010 = vmatprep.subr.mxu0 %v9888_v2  ;;  %7045 = vmatprep.subr.mxu1 %v9888_v2 }
 0x5bc   :  { %7011 = vmatpush3.msra.mxu0 %v9945_v46  ;;  %7046 = vmatpush3.msra.mxu1 %v9946_v8 }
 0x5bd   :  { %7012 = vmatprep.subr.mxu0 %v9888_v2  ;;  %7047 = vmatprep.subr.mxu1 %v9888_v2 }
 0x5be   :  { %7013 = vmatpush3.msra.mxu0 %v9947_v11  ;;  %7048 = vmatpush3.msra.mxu1 %v9948_v21  ;;  %v2799_v11 = vpop.permute.xlu1 %2798  ;;  %v2794_v21 = vpop.permute.xlu0 %2793 }
 0x5bf   :  { %7014 = vmatprep.subr.mxu0 %v9888_v2  ;;  %7049 = vmatprep.subr.mxu1 %v9888_v2 }
 0x5c0   :  { %7015 = vmatpush3.msra.mxu0 %v8444_v24  ;;  %7050 = vmatpush3.msra.mxu1 %v8449_v58  ;;  %v9952_v24 = vld [vmem:[#allocation31_spill] sm:$0xff]  ;;  %v9953_v58 = vld [vmem:[#allocation32_spill] sm:$0xff] }
 0x5c1   :  { %7016 = vmatprep.subr.mxu0 %v9888_v2  ;;  %7051 = vmatprep.subr.mxu1 %v9888_v2 }
 0x5c2   :  { %7017 = vmatpush3.msra.mxu0 %v9949_v36  ;;  %7052 = vmatpush3.msra.mxu1 %v9950_v30  ;;  %v2895_v36 = vpop.permute.xlu1 %2894  ;;  %v2890_v30 = vpop.permute.xlu0 %2889 }
 0x5c3   :  { %7018 = vmatprep.subr.mxu0 %v9888_v2  ;;  %7053 = vmatprep.subr.mxu1 %v9888_v2 }
 0x5c4   :  { %7019 = vmatpush3.msra.mxu0 %v9951_v27  ;;  %7020 = vmatprep.mubr.msk.f32.mxu0 %vm7672_vm1, %v9888_v2 }
 0x5c5   :  { %7054 = vmatpush3.msra.mxu1 %v9952_v24  ;;  %7055 = vmatprep.mubr.msk.f32.mxu1 %vm7672_vm1, %v9888_v2 }
 0x5c6   :  { %7021 = vmatmul.mubr.f32.vlgmr.msra.gmra.mxu0 %v8838_v32  ;;  %7056 = vmatmul.mubr.f32.vlgmr.msra.gmra.mxu1 %v8838_v32 }
 0x5c7   :  { %7058 = vmatprep.subr.mxu0 %v9888_v2  ;;  %7090 = vmatprep.mubr.msk.f32.mxu0 %vm7672_vm1, %v9888_v2 }
 0x5c8   :  { %7059 = vmatpush3.msra.mxu0 %v9953_v58  ;;  %7093 = vmatprep.subr.mxu1 %v9888_v2 }
 0x5c9   :  { %7060 = vmatprep.subr.mxu0 %v9888_v2  ;;  %7095 = vmatprep.mubr.msk.f32.mxu1 %vm7672_vm1, %v9888_v2 }
 0x5ca   :  { %7061 = vmatpush3.msra.mxu0 %v9954_v38 }
 0x5cb   :  { %7062 = vmatprep.subr.mxu0 %v9888_v2 }
 0x5cc   :  { %7063 = vmatpush3.msra.mxu0 %v9955_v10 }
 0x5cd   :  { %7064 = vmatprep.subr.mxu0 %v9888_v2 }
 0x5ce   :  { %7065 = vmatpush3.msra.mxu0 %v9956_v14  ;;  %v2909_v14 = vpop.permute.xlu1 %2908 }
 0x5cf   :  { %7066 = vmatprep.subr.mxu0 %v9888_v2 }
 0x5d0   :  { %7067 = vmatpush3.msra.mxu0 %v9957_v18 }
 0x5d1   :  { %7068 = vmatprep.subr.mxu0 %v9888_v2 }
 0x5d2   :  { %7069 = vmatpush3.msra.mxu0 %v9958_v25 }
 0x5d3   :  { %7070 = vmatprep.subr.mxu0 %v9888_v2 }
 0x5d4   :  { %7071 = vmatpush3.msra.mxu0 %v9959_v29  ;;  %v2904_v29 = vpop.permute.xlu0 %2903 }
 0x5d5   :  { %7072 = vmatprep.subr.mxu0 %v9888_v2 }
 0x5d6   :  { %7073 = vmatpush3.msra.mxu0 %v9960_v33 }
 0x5d7   :  { %7074 = vmatprep.subr.mxu0 %v9888_v2 }
 0x5d8   :  { %7075 = vmatpush3.msra.mxu0 %v9961_v35  ;;  %v2914_v35 = vld [vmem:[%s9793_s19 + $0x8] sm:$0xff] }
 0x5d9   :  { %7076 = vmatprep.subr.mxu0 %v9888_v2 }
 0x5da   :  { %7077 = vmatpush3.msra.mxu0 %v9962_v37 }
 0x5db   :  { %7078 = vmatprep.subr.mxu0 %v9888_v2 }
 0x5dc   :  { %7079 = vmatpush3.msra.mxu0 %v9963_v39 }
 0x5dd   :  { %7080 = vmatprep.subr.mxu0 %v9888_v2 }
 0x5de   :  { %7081 = vmatpush3.msra.mxu0 %v9964_v42 }
 0x5df   :  { %7082 = vmatprep.subr.mxu0 %v9888_v2 }
 0x5e0   :  { %7083 = vmatpush3.msra.mxu0 %v8582_v40 }
 0x5e1   :  { %7084 = vmatprep.subr.mxu0 %v9888_v2 }
 0x5e2   :  { %7085 = vmatpush3.msra.mxu0 %v8589_v16 }
 0x5e3   :  { %7086 = vmatprep.subr.mxu0 %v9888_v2 }
 0x5e4   :  { %7087 = vmatpush3.msra.mxu0 %v8596_v44 }
 0x5e5   :  { %7088 = vmatprep.subr.mxu0 %v9888_v2 }
 0x5e6   :  { %7089 = vmatpush3.msra.mxu0 %v8603_v20 }
 0x5e7   :  { %7091 = vmatmul.mubr.f32.vlgmr.msra.gmra.mxu0 %v8838_v32 }
 0x5e8   :  { %7135 = vmatprep.mubr.msk.f32.mxu0 %vm908_vm5, %v2787_v53 }
 0x665   :  { %v1917_v6 = vpop.f32.mrf.mxu0  ;;  %v1987_v43 = vpop.f32.mrf.mxu1 }
 0x666   :  { %7094 = vmatpush3.msk.msra.mxu1 %vm431_vm4, %v1987_v43 }
 0x667   :  { %v6952_v45 = vpop.f32.mrf.mxu0  ;;  %v6987_v40 = vpop.f32.mrf.mxu1  ;;  %7096 = vmatmul.mubr.msk.f32.vlgmr.msra.gmra.mxu1 %vm908_vm5, %v8639_v3  ;;  %7098 = vmatprep.subr.mxu1 %v9888_v2  ;;  %v9965_v3 = vld [vmem:[#allocation44_spill] sm:$0xff] }
 0x668   :  { %7100 = vmatprep.mubr.msk.f32.mxu1 %vm7672_vm1, %v9888_v2 }
 0x686   :  { %v2057_v44 = vpop.f32.mrf.mxu0  ;;  %v2127_v16 = vpop.f32.mrf.mxu1 }
 0x687   :  { %7099 = vmatpush3.msk.msra.mxu1 %vm431_vm4, %v2057_v44 }
 0x688   :  { %v7022_v20 = vpop.f32.mrf.mxu0  ;;  %v7057_v49 = vpop.f32.mrf.mxu1  ;;  %7101 = vmatmul.mubr.msk.f32.vlgmr.msra.gmra.mxu1 %vm908_vm5, %v8650_v13  ;;  %7103 = vmatprep.subr.mxu1 %v9888_v2  ;;  %v9966_v13 = vld [vmem:[#allocation45_spill] sm:$0xff] }
 0x689   :  { %7104 = vmatpush3.msk.msra.mxu1 %vm431_vm4, %v2127_v16  ;;  %7105 = vmatprep.mubr.msk.f32.mxu1 %vm7672_vm1, %v9888_v2  ;;  %v3184_v20 = vld [vmem:[%s9795_s22] sm:$0xff]  ;;  %v2925_v49 = vpop.permute.xlu1 %2924 }
 0x68a   :  { %7108 = vmatprep.subr.mxu1 %v9888_v2 }
 0x68c   :  { %7106 = vmatmul.mubr.msk.f32.vlgmr.msra.gmra.mxu1 %vm908_vm5, %v8662_v12 }
 0x68d   :  { %7109 = vmatpush3.msk.msra.mxu1 %vm431_vm4, %v1917_v6  ;;  %7110 = vmatprep.mubr.msk.f32.mxu1 %vm7672_vm1, %v9888_v2 }
 0x68e   :  { %7113 = vmatprep.subr.mxu1 %v9888_v2 }
 0x690   :  { %7111 = vmatmul.mubr.msk.f32.vlgmr.msra.gmra.mxu1 %vm908_vm5, %v8673_v1 }
 0x691   :  { %7114 = vmatpush3.msk.msra.mxu1 %vm431_vm4, %v1987_v43  ;;  %7115 = vmatprep.mubr.msk.f32.mxu1 %vm7672_vm1, %v9888_v2 }
 0x692   :  { %7118 = vmatprep.subr.mxu1 %v9888_v2 }
 0x694   :  { %7116 = vmatmul.mubr.msk.f32.vlgmr.msra.gmra.mxu1 %vm908_vm5, %v9965_v3 }
 0x695   :  { %7119 = vmatpush3.msk.msra.mxu1 %vm431_vm4, %v2057_v44  ;;  %7120 = vmatprep.mubr.msk.f32.mxu1 %vm7672_vm1, %v9888_v2 }
 0x696   :  { %7123 = vmatprep.subr.mxu1 %v9888_v2 }
 0x698   :  { %7121 = vmatmul.mubr.msk.f32.vlgmr.msra.gmra.mxu1 %vm908_vm5, %v9966_v13 }
 0x699   :  { %7124 = vmatpush3.msk.msra.mxu1 %vm431_vm4, %v2127_v16  ;;  %7125 = vmatprep.mubr.msk.f32.mxu1 %vm7672_vm1, %v9888_v2  ;;  %v3182_v16 = vld [vmem:[%s9794_s21] sm:$0xff] }
 0x69a   :  { %7128 = vmatprep.subr.mxu1 %v9888_v2 }
 0x69c   :  { %7126 = vmatmul.mubr.msk.f32.vlgmr.msra.gmra.mxu1 %vm908_vm5, %v8706_v60 }
 0x69d   :  { %7130 = vmatprep.mubr.msk.f32.mxu1 %vm7672_vm1, %v9888_v2 }
 0x6a7   :  { %v2197_v12 = vpop.f32.mrf.mxu0 }
 0x6a8   :  { %7129 = vmatpush3.msk.msra.mxu1 %vm431_vm4, %v2197_v12  ;;  %v2920_v12 = vpop.permute.xlu0 %2919 }
 0x6a9   :  { %v7092_v1 = vpop.f32.mrf.mxu0  ;;  %7131 = vmatmul.mubr.msk.f32.vlgmr.msra.gmra.mxu1 %vm908_vm5, %v8716_v0 }
 0x727   :  { %v2270_v55 = vpop.f32.mrf.mxu1 }
 0x728   :  { %v2274_v60 = vadd.f32 %v2270_v55, %v8780_v23  ;;  %v3183_v55 = vld [vmem:[%s9794_s21 + $0x8] sm:$0xff] }
 0x729   :  { %v7097_v57 = vpop.f32.mrf.mxu1 }
 0x72a   :  { %v5897_v57 = vld [vmem:[%s9795_s22 + $0x10] sm:$0xff] }
 0x748   :  { %v2344_v51 = vpop.f32.mrf.mxu1 }
 0x749   :  { %v2348_v2 = vadd.f32 %v2344_v51, %v2274_v60 }
 0x74a   :  { %v7102_v59 = vpop.f32.mrf.mxu1 }
 0x74c   :  { %v2418_v61 = vpop.f32.mrf.mxu1 }
 0x74d   :  { %v2422_v63 = vadd.f32 %v2418_v61, %v2348_v2  ;;  %v3185_v61 = vld [vmem:[%s9795_s22 + $0x8] sm:$0xff] }
 0x74e   :  { %v7107_v5 = vpop.f32.mrf.mxu1 }
 0x74f   :  { %v2784_v47 = vadd.f32 %v2422_v63, %v8783_v34  ;;  %v2785_v0 = vmul.f32 %v2422_v63, %v8783_v34  ;;  %v3363_v63 = vld [vmem:[%s9796_s4 + $0x78] sm:$0xff] }
 0x750   :  { %v2492_v9 = vpop.f32.mrf.mxu1  ;;  %v5898_v5 = vld [vmem:[%s9795_s22 + $0x18] sm:$0xff] }
 0x751   :  { %v2786_v17 = vadd.f32 %v2785_v0, %v2784_v47  ;;  %v2496_v54 = vadd.f32 %v2492_v9, %v8785_v41  ;;  %v2913_v41 = vld [vmem:[%s9793_s19] sm:$0xff]  ;;  %v3362_v47 = vld [vmem:[%s9796_s4 + $0x70] sm:$0xff]  ;;  %v3361_v9 = vld [vmem:[%s9796_s4 + $0x68] sm:$0xff] }
 0x752   :  { %v7112_v19 = vpop.f32.mrf.mxu1  ;;  %7142 = vmatprep.mubr.msk.f32.mxu1 %vm328_vm2, %v2913_v41  ;;  %v5895_v0 = vld [vmem:[%s9794_s21 + $0x10] sm:$0xff] }
 0x753   :  { %7133 = vmatprep.subr.msk.mxu0 %vm431_vm4, %v2786_v17  ;;  %v5918_v19 = vld [vmem:[%s9796_s4 + $0xf8] sm:$0xff] }
 0x754   :  { %v2563_v26 = vpop.f32.mrf.mxu1  ;;  %7134 = vmatpush3.msk.msra.mxu0 %vm431_vm4, %v2786_v17  ;;  %v5896_v17 = vld [vmem:[%s9794_s21 + $0x18] sm:$0xff] }
 0x755   :  { %7136 = vmatmul.mubr.msk.f32.vlgmr.msra.gmra.mxu0 %vm908_vm5, %v2788_v22  ;;  %v2567_v52 = vadd.f32 %v2563_v26, %v2496_v54  ;;  %v5917_v26 = vld [vmem:[%s9796_s4 + $0xf0] sm:$0xff]  ;;  %v5914_v54 = vld [vmem:[%s9796_s4 + $0xd8] sm:$0xff] }
 0x756   :  { %v7117_v23 = vpop.f32.mrf.mxu1  ;;  %7147 = vmatprep.mubr.msk.f32.mxu0 %vm908_vm5, %v2787_v53 }
 0x757   :  { %v3359_v23 = vld [vmem:[%s9796_s4 + $0x58] sm:$0xff] }
 0x758   :  { %v2634_v31 = vpop.f32.mrf.mxu1 }
 0x759   :  { %v2638_v50 = vadd.f32 %v2634_v31, %v2567_v52  ;;  %v5916_v31 = vld [vmem:[%s9796_s4 + $0xe8] sm:$0xff]  ;;  %v3356_v52 = vld [vmem:[%s9796_s4 + $0x40] sm:$0xff] }
 0x75a   :  { %v7122_v32 = vpop.f32.mrf.mxu1 }
 0x75b   :  { %v3358_v32 = vld [vmem:[%s9796_s4 + $0x50] sm:$0xff] }
 0x75c   :  { %v2705_v34 = vpop.f32.mrf.mxu1 }
 0x75d   :  { %v2709_v48 = vadd.f32 %v2705_v34, %v2638_v50  ;;  %v5915_v34 = vld [vmem:[%s9796_s4 + $0xe0] sm:$0xff]  ;;  %v5913_v50 = vld [vmem:[%s9796_s4 + $0xd0] sm:$0xff] }
 0x75e   :  { %v7127_v56 = vpop.f32.mrf.mxu1 }
 0x75f   :  { %v3357_v56 = vld [vmem:[%s9796_s4 + $0x48] sm:$0xff] }
 0x769   :  { %v2779_v62 = vpop.f32.mrf.mxu1 }
 0x76a   :  { %v2783_v15 = vadd.f32 %v2779_v62, %v2709_v48  ;;  %v3355_v48 = vld [vmem:[%s9796_s4 + $0x38] sm:$0xff]  ;;  %v5912_v62 = vld [vmem:[%s9796_s4 + $0xc8] sm:$0xff] }
 0x76b   :  { %v7132_v4 = vpop.f32.mrf.mxu1 }
 0x76c   :  { %v3008_v7 = vadd.f32 %v2783_v15, %v9967_v28  ;;  %v3009_v46 = vmul.f32 %v2783_v15, %v9967_v28  ;;  %v3354_v15 = vld [vmem:[%s9796_s4 + $0x30] sm:$0xff]  ;;  %v5911_v4 = vld [vmem:[%s9796_s4 + $0xc0] sm:$0xff]  ;;  %v3353_v28 = vld [vmem:[%s9796_s4 + $0x28] sm:$0xff] }
 0x76e   :  { %v3010_v8 = vadd.f32 %v3009_v46, %v3008_v7  ;;  %v5910_v7 = vld [vmem:[%s9796_s4 + $0xb8] sm:$0xff]  ;;  %v3352_v46 = vld [vmem:[%s9796_s4 + $0x20] sm:$0xff] }
 0x770   :  { %7145 = vmatprep.subr.msk.mxu0 %vm431_vm4, %v3010_v8 }
 0x771   :  { %7146 = vmatpush3.msk.msra.mxu0 %vm431_vm4, %v3010_v8  ;;  %v5909_v8 = vld [vmem:[%s9796_s4 + $0xb0] sm:$0xff] }
 0x772   :  { %7148 = vmatmul.mubr.msk.f32.vlgmr.msra.gmra.mxu0 %vm908_vm5, %v2788_v22  ;;  %v3360_v22 = vld [vmem:[%s9796_s4 + $0x60] sm:$0xff] }
 0x773   :  { %7161 = vmatprep.mubr.msk.f32.mxu0 %vm328_vm2, %v3184_v20  ;;  %v5942_v20 = vld [vmem:[%s9796_s4 + $0x178] sm:$0xff] }
 0x815   :  { %v7137_v27 = vpop.f32.mrf.mxu0 }
 0x816   :  { %v2882_v24 = vadd.f32 %v7137_v27, %v2799_v11  ;;  %v5906_v27 = vld [vmem:[%s9796_s4 + $0x98] sm:$0xff] }
 0x817   :  { %v2876_v58 = vpop.f32.mrf.mxu0 }
 0x818   :  { %v2898_v38 = vmul.f32 %v2895_v36, %v2882_v24  ;;  %v2877_v10 = vadd.f32 %v2876_v58, %v2794_v21  ;;  %v3348_v24 = vld [vmem:[%s9796_s4] sm:$0xff]  ;;  %v5905_v58 = vld [vmem:[%s9796_s4 + $0x90] sm:$0xff] }
 0x81a   :  { %v2897_v18 = vmul.f32 %v2890_v30, %v2877_v10  ;;  %v2912_v25 = vadd.f32 %v2909_v14, %v2898_v38  ;;  %v5904_v38 = vld [vmem:[%s9796_s4 + $0x88] sm:$0xff]  ;;  %v5903_v10 = vld [vmem:[%s9796_s4 + $0x80] sm:$0xff] }
 0x81c   :  { %7138 = vmatprep.subr.mxu1 %v2912_v25  ;;  %v2911_v33 = vadd.f32 %v2904_v29, %v2897_v18 }
 0x81d   :  { %7139 = vmatpush3.msra.mxu1 %v2912_v25 }
 0x81e   :  { %7140 = vmatprep.subr.mxu1 %v2911_v33 }
 0x81f   :  { %7141 = vmatpush3.msra.mxu1 %v2911_v33 }
 0x820   :  { %7143 = vmatmul.mubr.msk.f32.vlgmr.msra.gmra.mxu1 %vm328_vm2, %v2914_v35 }
 0x821   :  { %7154 = vmatprep.mubr.msk.f32.mxu1 %vm328_vm2, %v2913_v41  ;;  %v3351_v41 = vld [vmem:[%s9796_s4 + $0x18] sm:$0xff] }
 0x832   :  { %v7149_v37 = vpop.f32.mrf.mxu0 }
 0x833   :  { %v3086_v39 = vadd.f32 %v7149_v37, %v2799_v11  ;;  %v5908_v11 = vld [vmem:[%s9796_s4 + $0xa8] sm:$0xff] }
 0x834   :  { %v3080_v42 = vpop.f32.mrf.mxu0 }
 0x835   :  { %v3090_v6 = vmul.f32 %v3086_v39, %v2895_v36  ;;  %v3081_v43 = vadd.f32 %v3080_v42, %v2794_v21  ;;  %v3350_v21 = vld [vmem:[%s9796_s4 + $0x10] sm:$0xff]  ;;  %v5907_v36 = vld [vmem:[%s9796_s4 + $0xa0] sm:$0xff] }
 0x836   :  { %v5921_v42 = vld [vmem:[%s9795_s22 + $0x20] sm:$0xff] }
 0x837   :  { %v3089_v45 = vmul.f32 %v3081_v43, %v2890_v30  ;;  %v3092_v40 = vadd.f32 %v3090_v6, %v2909_v14  ;;  %v3349_v30 = vld [vmem:[%s9796_s4 + $0x8] sm:$0xff] }
 0x838   :  { %v5922_v43 = vld [vmem:[%s9795_s22 + $0x28] sm:$0xff] }
 0x839   :  { %7150 = vmatprep.subr.mxu1 %v3092_v40  ;;  %v3091_v44 = vadd.f32 %v3089_v45, %v2904_v29 }
 0x83a   :  { %7151 = vmatpush3.msra.mxu1 %v3092_v40 }
 0x83b   :  { %7152 = vmatprep.subr.mxu1 %v3091_v44 }
 0x83c   :  { %7153 = vmatpush3.msra.mxu1 %v3091_v44 }
 0x83d   :  { %7155 = vmatmul.mubr.msk.f32.vlgmr.msra.gmra.mxu1 %vm328_vm2, %v2914_v35 }
 0x83e   :  { %7168 = vmatprep.mubr.msk.f32.mxu1 %vm328_vm2, %v3182_v16  ;;  %v5919_v16 = vld [vmem:[%s9794_s21 + $0x20] sm:$0xff] }
 0x8e0   :  { %v7144_v3 = vpop.f32.mrf.mxu1 }
 0x8e1   :  { %v9031_v13 = vadd.f32 %v7144_v3, %v2925_v49  ;;  %v5920_v3 = vld [vmem:[%s9794_s21 + $0x28] sm:$0xff] }
 0x8e2   :  { %v2999_v1 = vpop.f32.mrf.mxu1 }
 0x8e3   :  { %v9033_v53 = vadd.f32 %v2999_v1, %v2920_v12  ;;  %7164 = vmatprep.subr.mxu1 %v9031_v13  ;;  %v5941_v1 = vld [vmem:[%s9796_s4 + $0x170] sm:$0xff] }
 0x8e4   :  { %7165 = vmatpush3.msra.mxu1 %v9031_v13 }
 0x8e5   :  { %7166 = vmatprep.subr.mxu1 %v9033_v53 }
 0x8e6   :  { %7167 = vmatpush3.msra.mxu1 %v9033_v53 }
 0x8e7   :  { %7169 = vmatmul.mubr.msk.f32.vlgmr.msra.gmra.mxu1 %vm328_vm2, %v3183_v55  ;;  %v5940_v55 = vld [vmem:[%s9796_s4 + $0x168] sm:$0xff] }
 0x8e8   :  { %7210 = vmatprep.mubr.msk.f32.mxu1 %vm328_vm2, %v5897_v57  ;;  %v5943_v57 = vld [vmem:[%s9794_s21 + $0x30] sm:$0xff] }
 0x8fd   :  { %v7156_v51 = vpop.f32.mrf.mxu1 }
 0x8fe   :  { %v9047_v60 = vadd.f32 %v7156_v51, %v2925_v49  ;;  %v5945_v49 = vld [vmem:[%s9795_s22 + $0x30] sm:$0xff]  ;;  %v5966_v51 = vld [vmem:[%s9796_s4 + $0x1f8] sm:$0xff] }
 0x8ff   :  { %v3159_v59 = vpop.f32.mrf.mxu1 }
 0x900   :  { %v9049_v2 = vadd.f32 %v3159_v59, %v2920_v12  ;;  %7157 = vmatprep.subr.mxu0 %v9047_v60  ;;  %7206 = vmatprep.subr.mxu1 %v9047_v60  ;;  %v5946_v12 = vld [vmem:[%s9795_s22 + $0x38] sm:$0xff] }
 0x901   :  { %7158 = vmatpush3.msra.mxu0 %v9047_v60  ;;  %7207 = vmatpush3.msra.mxu1 %v9047_v60  ;;  %v5944_v59 = vld [vmem:[%s9794_s21 + $0x38] sm:$0xff] }
 0x902   :  { %7159 = vmatprep.subr.mxu0 %v9049_v2  ;;  %7208 = vmatprep.subr.mxu1 %v9049_v2 }
 0x903   :  { %7160 = vmatpush3.msra.mxu0 %v9049_v2  ;;  %7209 = vmatpush3.msra.mxu1 %v9049_v2 }
 0x904   :  { %7162 = vmatmul.mubr.msk.f32.vlgmr.msra.gmra.mxu0 %vm328_vm2, %v3185_v61  ;;  %7171 = vmatprep.subr.mxu0 %v3363_v63  ;;  %v5939_v61 = vld [vmem:[%s9796_s4 + $0x160] sm:$0xff] }
 0x905   :  { %7211 = vmatmul.mubr.msk.f32.vlgmr.msra.gmra.mxu1 %vm328_vm2, %v5898_v5  ;;  %7213 = vmatprep.subr.mxu1 %v9031_v13  ;;  %v5938_v5 = vld [vmem:[%s9796_s4 + $0x158] sm:$0xff] }
 0x906   :  { %7172 = vmatpush3.msra.mxu0 %v3363_v63  ;;  %7214 = vmatpush3.msra.mxu1 %v9031_v13  ;;  %v5965_v63 = vld [vmem:[%s9796_s4 + $0x1f0] sm:$0xff] }
 0x907   :  { %7173 = vmatprep.subr.mxu0 %v3362_v47  ;;  %7215 = vmatprep.subr.mxu1 %v9033_v53 }
 0x908   :  { %7174 = vmatpush3.msra.mxu0 %v3362_v47  ;;  %7216 = vmatpush3.msra.mxu1 %v9033_v53  ;;  %v5964_v47 = vld [vmem:[%s9796_s4 + $0x1e8] sm:$0xff] }
 0x909   :  { %7217 = vmatprep.mubr.msk.f32.mxu1 %vm328_vm2, %v5895_v0  ;;  %7175 = vmatprep.subr.mxu0 %v3361_v9  ;;  %v5937_v0 = vld [vmem:[%s9796_s4 + $0x150] sm:$0xff] }
 0x90a   :  { %7218 = vmatmul.mubr.msk.f32.vlgmr.msra.gmra.mxu1 %vm328_vm2, %v5896_v17  ;;  %7220 = vmatprep.subr.mxu1 %v5918_v19  ;;  %v5936_v17 = vld [vmem:[%s9796_s4 + $0x148] sm:$0xff] }
 0x90b   :  { %7176 = vmatpush3.msra.mxu0 %v3361_v9  ;;  %7221 = vmatpush3.msra.mxu1 %v5918_v19  ;;  %v5963_v9 = vld [vmem:[%s9796_s4 + $0x1e0] sm:$0xff]  ;;  %v5962_v19 = vld [vmem:[%s9796_s4 + $0x1d8] sm:$0xff] }
 0x90c   :  { %7177 = vmatprep.subr.mxu0 %v3360_v22  ;;  %7222 = vmatprep.subr.mxu1 %v5917_v26 }
 0x90d   :  { %7178 = vmatpush3.msra.mxu0 %v3360_v22  ;;  %7223 = vmatpush3.msra.mxu1 %v5917_v26  ;;  %v5935_v22 = vld [vmem:[%s9796_s4 + $0x140] sm:$0xff]  ;;  %v5961_v26 = vld [vmem:[%s9796_s4 + $0x1d0] sm:$0xff] }
 0x90e   :  { %7179 = vmatprep.subr.mxu0 %v3359_v23  ;;  %7224 = vmatprep.subr.mxu1 %v5916_v31 }
 0x90f   :  { %7180 = vmatpush3.msra.mxu0 %v3359_v23  ;;  %7225 = vmatpush3.msra.mxu1 %v5916_v31  ;;  %v5934_v23 = vld [vmem:[%s9796_s4 + $0x138] sm:$0xff]  ;;  %v5960_v31 = vld [vmem:[%s9796_s4 + $0x1c8] sm:$0xff] }
 0x910   :  { %7181 = vmatprep.subr.mxu0 %v3358_v32  ;;  %7226 = vmatprep.subr.mxu1 %v5915_v34 }
 0x911   :  { %7182 = vmatpush3.msra.mxu0 %v3358_v32  ;;  %7227 = vmatpush3.msra.mxu1 %v5915_v34  ;;  %v5933_v32 = vld [vmem:[%s9796_s4 + $0x130] sm:$0xff]  ;;  %v5959_v34 = vld [vmem:[%s9796_s4 + $0x1c0] sm:$0xff] }
 0x912   :  { %7183 = vmatprep.subr.mxu0 %v3357_v56  ;;  %7228 = vmatprep.subr.mxu1 %v5914_v54 }
 0x913   :  { %7184 = vmatpush3.msra.mxu0 %v3357_v56  ;;  %7229 = vmatpush3.msra.mxu1 %v5914_v54  ;;  %v5932_v56 = vld [vmem:[%s9796_s4 + $0x128] sm:$0xff]  ;;  %v5958_v54 = vld [vmem:[%s9796_s4 + $0x1b8] sm:$0xff] }
 0x914   :  { %7185 = vmatprep.subr.mxu0 %v3356_v52  ;;  %7230 = vmatprep.subr.mxu1 %v5913_v50 }
 0x915   :  { %7186 = vmatpush3.msra.mxu0 %v3356_v52  ;;  %7231 = vmatpush3.msra.mxu1 %v5913_v50  ;;  %v5931_v52 = vld [vmem:[%s9796_s4 + $0x120] sm:$0xff]  ;;  %v5957_v50 = vld [vmem:[%s9796_s4 + $0x1b0] sm:$0xff] }
 0x916   :  { %7187 = vmatprep.subr.mxu0 %v3355_v48  ;;  %7232 = vmatprep.subr.mxu1 %v5912_v62 }
 0x917   :  { %7188 = vmatpush3.msra.mxu0 %v3355_v48  ;;  %7233 = vmatpush3.msra.mxu1 %v5912_v62  ;;  %v5930_v48 = vld [vmem:[%s9796_s4 + $0x118] sm:$0xff]  ;;  %v5956_v62 = vld [vmem:[%s9796_s4 + $0x1a8] sm:$0xff] }
 0x918   :  { %7189 = vmatprep.subr.mxu0 %v3354_v15  ;;  %7234 = vmatprep.subr.mxu1 %v5911_v4 }
 0x919   :  { %7190 = vmatpush3.msra.mxu0 %v3354_v15  ;;  %7235 = vmatpush3.msra.mxu1 %v5911_v4  ;;  %v5929_v15 = vld [vmem:[%s9796_s4 + $0x110] sm:$0xff]  ;;  %v5955_v4 = vld [vmem:[%s9796_s4 + $0x1a0] sm:$0xff] }
 0x91a   :  { %7191 = vmatprep.subr.mxu0 %v3353_v28  ;;  %7236 = vmatprep.subr.mxu1 %v5910_v7 }
 0x91b   :  { %7192 = vmatpush3.msra.mxu0 %v3353_v28  ;;  %7237 = vmatpush3.msra.mxu1 %v5910_v7  ;;  %v5928_v28 = vld [vmem:[%s9796_s4 + $0x108] sm:$0xff]  ;;  %v5954_v7 = vld [vmem:[%s9796_s4 + $0x198] sm:$0xff] }
 0x91c   :  { %7193 = vmatprep.subr.mxu0 %v3352_v46  ;;  %7238 = vmatprep.subr.mxu1 %v5909_v8 }
 0x91d   :  { %7194 = vmatpush3.msra.mxu0 %v3352_v46  ;;  %7239 = vmatpush3.msra.mxu1 %v5909_v8  ;;  %v5927_v46 = vld [vmem:[%s9796_s4 + $0x100] sm:$0xff]  ;;  %v5953_v8 = vld [vmem:[%s9796_s4 + $0x190] sm:$0xff] }
 0x91e   :  { %7195 = vmatprep.subr.mxu0 %v3351_v41  ;;  %7240 = vmatprep.subr.mxu1 %v5908_v11 }
 0x91f   :  { %7196 = vmatpush3.msra.mxu0 %v3351_v41  ;;  %7241 = vmatpush3.msra.mxu1 %v5908_v11  ;;  %v5952_v41 = vld [vmem:[%s9796_s4 + $0x188] sm:$0xff]  ;;  %v5951_v11 = vld [vmem:[%s9796_s4 + $0x180] sm:$0xff] }
 0x920   :  { %7197 = vmatprep.subr.mxu0 %v3350_v21  ;;  %7242 = vmatprep.subr.mxu1 %v5907_v36 }
 0x921   :  { %7198 = vmatpush3.msra.mxu0 %v3350_v21  ;;  %7243 = vmatpush3.msra.mxu1 %v5907_v36 }
 0x922   :  { %7199 = vmatprep.subr.mxu0 %v3349_v30  ;;  %7244 = vmatprep.subr.mxu1 %v5906_v27 }
 0x923   :  { %7200 = vmatpush3.msra.mxu0 %v3349_v30  ;;  %7245 = vmatpush3.msra.mxu1 %v5906_v27  ;;  %v3178_v30 = vpop.permute.xlu0 %3177 }
 0x924   :  { %7201 = vmatprep.subr.mxu0 %v3348_v24  ;;  %7246 = vmatprep.subr.mxu1 %v5905_v58 }
 0x925   :  { %7202 = vmatpush3.msra.mxu0 %v3348_v24  ;;  %7247 = vmatpush3.msra.mxu1 %v5905_v58  ;;  %v3173_v58 = vpop.permute.xlu1 %3172 }
 0x926   :  { %7248 = vmatprep.subr.mxu1 %v5904_v38  ;;  %7255 = vmatprep.subr.mxu0 %v9047_v60 }
 0x927   :  { %7249 = vmatpush3.msra.mxu1 %v5904_v38 }
 0x928   :  { %7250 = vmatprep.subr.mxu1 %v5903_v10 }
 0x929   :  { %7251 = vmatpush3.msra.mxu1 %v5903_v10 }
 0x92a   :  { %7304 = vmatprep.subr.mxu1 %v9047_v60 }
 0x9a7   :  { %v7170_v14 = vpop.f32.mrf.mxu1 }
 0x9a9   :  { %v3339_v18 = vpop.f32.mrf.mxu1 }
 0x9c4   :  { %v7163_v25 = vpop.f32.mrf.mxu0 }
 0x9c5   :  { %v7212_v29 = vpop.f32.mrf.mxu1  ;;  %v3345_v39 = vadd.f32 %v7170_v14, %v7163_v25 }
 0x9c6   :  { %v3258_v33 = vpop.f32.mrf.mxu0 }
 0x9c7   :  { %v3340_v35 = vadd.f32 %v3339_v18, %v3258_v33  ;;  %v3519_v37 = vpop.f32.mrf.mxu1 }
 0x9c9   :  { %7203 = vmatprep.mubr.f32.mxu0 %v3340_v35 }
 0x9ca   :  { %v7219_v6 = vpop.f32.mrf.mxu1  ;;  %7204 = vmatmul.mubr.f32.vlgmr.msra.gmra.mxu0 %v3345_v39 }
 0x9cb   :  { %7256 = vmatpush3.msra.mxu0 %v9047_v60  ;;  %7259 = vmatprep.mubr.msk.f32.mxu0 %vm328_vm2, %v5921_v42  ;;  %v3606_v45 = vadd.f32 %v7219_v6, %v7212_v29 }
 0x9cc   :  { %v3600_v40 = vpop.f32.mrf.mxu1  ;;  %7257 = vmatprep.subr.mxu0 %v9049_v2 }
 0x9cd   :  { %v3601_v44 = vadd.f32 %v3600_v40, %v3519_v37  ;;  %7258 = vmatpush3.msra.mxu0 %v9049_v2  ;;  %v5970_v40 = vld [vmem:[%s9795_s22 + $0x48] sm:$0xff] }
 0x9ce   :  { %7262 = vmatprep.subr.mxu0 %v9031_v13  ;;  %7260 = vmatmul.mubr.msk.f32.vlgmr.msra.gmra.mxu0 %vm328_vm2, %v5922_v43  ;;  %v5969_v43 = vld [vmem:[%s9795_s22 + $0x40] sm:$0xff] }
 0x9cf   :  { %7252 = vmatprep.mubr.f32.mxu1 %v3601_v44  ;;  %7263 = vmatpush3.msra.mxu0 %v9031_v13 }
 0x9d0   :  { %7253 = vmatmul.mubr.f32.vlgmr.msra.gmra.mxu1 %v3606_v45  ;;  %7264 = vmatprep.subr.mxu0 %v9033_v53 }
 0x9d1   :  { %7305 = vmatpush3.msra.mxu1 %v9047_v60  ;;  %7265 = vmatpush3.msra.mxu0 %v9033_v53 }
 0x9d2   :  { %7306 = vmatprep.subr.mxu1 %v9049_v2  ;;  %7266 = vmatprep.mubr.msk.f32.mxu0 %vm328_vm2, %v5919_v16 }
 0x9d3   :  { %7307 = vmatpush3.msra.mxu1 %v9049_v2  ;;  %7269 = vmatprep.subr.mxu0 %v5942_v20 }
 0x9d4   :  { %7308 = vmatprep.mubr.msk.f32.mxu1 %vm328_vm2, %v5945_v49  ;;  %7311 = vmatprep.subr.mxu1 %v9031_v13  ;;  %v5967_v49 = vld [vmem:[%s9794_s21 + $0x40] sm:$0xff] }
 0x9d5   :  { %7267 = vmatmul.mubr.msk.f32.vlgmr.msra.gmra.mxu0 %vm328_vm2, %v5920_v3  ;;  %7309 = vmatmul.mubr.msk.f32.vlgmr.msra.gmra.mxu1 %vm328_vm2, %v5946_v12  ;;  %v5990_v3 = vld [vmem:[%s9796_s4 + $0x278] sm:$0xff]  ;;  %v5993_v12 = vld [vmem:[%s9795_s22 + $0x50] sm:$0xff] }
 0x9d6   :  { %7270 = vmatpush3.msra.mxu0 %v5942_v20  ;;  %7312 = vmatpush3.msra.mxu1 %v9031_v13 }
 0x9d7   :  { %7271 = vmatprep.subr.mxu0 %v5941_v1  ;;  %7313 = vmatprep.subr.mxu1 %v9033_v53 }
 0x9d8   :  { %7272 = vmatpush3.msra.mxu0 %v5941_v1  ;;  %7314 = vmatpush3.msra.mxu1 %v9033_v53  ;;  %v5968_v1 = vld [vmem:[%s9794_s21 + $0x48] sm:$0xff] }
 0x9d9   :  { %7273 = vmatprep.subr.mxu0 %v5940_v55  ;;  %7315 = vmatprep.mubr.msk.f32.mxu1 %vm328_vm2, %v5943_v57  ;;  %v5989_v57 = vld [vmem:[%s9796_s4 + $0x270] sm:$0xff] }
 0x9da   :  { %7318 = vmatprep.subr.mxu1 %v5966_v51  ;;  %7274 = vmatpush3.msra.mxu0 %v5940_v55  ;;  %v5994_v55 = vld [vmem:[%s9795_s22 + $0x58] sm:$0xff] }
 0x9db   :  { %7316 = vmatmul.mubr.msk.f32.vlgmr.msra.gmra.mxu1 %vm328_vm2, %v5944_v59  ;;  %7275 = vmatprep.subr.mxu0 %v5939_v61  ;;  %v5991_v59 = vld [vmem:[%s9794_s21 + $0x50] sm:$0xff] }
 0x9dc   :  { %7319 = vmatpush3.msra.mxu1 %v5966_v51  ;;  %7276 = vmatpush3.msra.mxu0 %v5939_v61  ;;  %v5988_v51 = vld [vmem:[%s9796_s4 + $0x268] sm:$0xff]  ;;  %v6014_v61 = vld [vmem:[%s9796_s4 + $0x2f8] sm:$0xff] }
 0x9dd   :  { %7320 = vmatprep.subr.mxu1 %v5965_v63  ;;  %7277 = vmatprep.subr.mxu0 %v5938_v5 }
 0x9de   :  { %7321 = vmatpush3.msra.mxu1 %v5965_v63  ;;  %7278 = vmatpush3.msra.mxu0 %v5938_v5  ;;  %v5992_v63 = vld [vmem:[%s9794_s21 + $0x58] sm:$0xff]  ;;  %v5987_v5 = vld [vmem:[%s9796_s4 + $0x260] sm:$0xff] }
 0x9df   :  { %7322 = vmatprep.subr.mxu1 %v5964_v47  ;;  %7279 = vmatprep.subr.mxu0 %v5937_v0 }
 0x9e0   :  { %7323 = vmatpush3.msra.mxu1 %v5964_v47  ;;  %7280 = vmatpush3.msra.mxu0 %v5937_v0  ;;  %v6013_v47 = vld [vmem:[%s9796_s4 + $0x2f0] sm:$0xff]  ;;  %v5986_v0 = vld [vmem:[%s9796_s4 + $0x258] sm:$0xff] }
 0x9e1   :  { %7324 = vmatprep.subr.mxu1 %v5963_v9  ;;  %7281 = vmatprep.subr.mxu0 %v5936_v17 }
 0x9e2   :  { %7325 = vmatpush3.msra.mxu1 %v5963_v9  ;;  %7282 = vmatpush3.msra.mxu0 %v5936_v17  ;;  %v6012_v9 = vld [vmem:[%s9796_s4 + $0x2e8] sm:$0xff]  ;;  %v5985_v17 = vld [vmem:[%s9796_s4 + $0x250] sm:$0xff] }
 0x9e3   :  { %7326 = vmatprep.subr.mxu1 %v5962_v19  ;;  %7283 = vmatprep.subr.mxu0 %v5935_v22 }
 0x9e4   :  { %7327 = vmatpush3.msra.mxu1 %v5962_v19  ;;  %7284 = vmatpush3.msra.mxu0 %v5935_v22  ;;  %v6011_v19 = vld [vmem:[%s9796_s4 + $0x2e0] sm:$0xff]  ;;  %v5984_v22 = vld [vmem:[%s9796_s4 + $0x248] sm:$0xff] }
 0x9e5   :  { %7328 = vmatprep.subr.mxu1 %v5961_v26  ;;  %7285 = vmatprep.subr.mxu0 %v5934_v23 }
 0x9e6   :  { %7329 = vmatpush3.msra.mxu1 %v5961_v26  ;;  %7286 = vmatpush3.msra.mxu0 %v5934_v23  ;;  %v6010_v26 = vld [vmem:[%s9796_s4 + $0x2d8] sm:$0xff]  ;;  %v5983_v23 = vld [vmem:[%s9796_s4 + $0x240] sm:$0xff] }
 0x9e7   :  { %7330 = vmatprep.subr.mxu1 %v5960_v31  ;;  %7287 = vmatprep.subr.mxu0 %v5933_v32 }
 0x9e8   :  { %7331 = vmatpush3.msra.mxu1 %v5960_v31  ;;  %7288 = vmatpush3.msra.mxu0 %v5933_v32  ;;  %v6009_v31 = vld [vmem:[%s9796_s4 + $0x2d0] sm:$0xff]  ;;  %v5982_v32 = vld [vmem:[%s9796_s4 + $0x238] sm:$0xff] }
 0x9e9   :  { %7332 = vmatprep.subr.mxu1 %v5959_v34  ;;  %7289 = vmatprep.subr.mxu0 %v5932_v56 }
 0x9ea   :  { %7333 = vmatpush3.msra.mxu1 %v5959_v34  ;;  %7290 = vmatpush3.msra.mxu0 %v5932_v56  ;;  %v6008_v34 = vld [vmem:[%s9796_s4 + $0x2c8] sm:$0xff]  ;;  %v5981_v56 = vld [vmem:[%s9796_s4 + $0x230] sm:$0xff] }
 0x9eb   :  { %7334 = vmatprep.subr.mxu1 %v5958_v54  ;;  %7291 = vmatprep.subr.mxu0 %v5931_v52 }
 0x9ec   :  { %7335 = vmatpush3.msra.mxu1 %v5958_v54  ;;  %7292 = vmatpush3.msra.mxu0 %v5931_v52  ;;  %v6007_v54 = vld [vmem:[%s9796_s4 + $0x2c0] sm:$0xff]  ;;  %v5980_v52 = vld [vmem:[%s9796_s4 + $0x228] sm:$0xff] }
 0x9ed   :  { %7336 = vmatprep.subr.mxu1 %v5957_v50  ;;  %7293 = vmatprep.subr.mxu0 %v5930_v48 }
 0x9ee   :  { %7337 = vmatpush3.msra.mxu1 %v5957_v50  ;;  %7294 = vmatpush3.msra.mxu0 %v5930_v48  ;;  %v6006_v50 = vld [vmem:[%s9796_s4 + $0x2b8] sm:$0xff]  ;;  %v5979_v48 = vld [vmem:[%s9796_s4 + $0x220] sm:$0xff] }
 0x9ef   :  { %7338 = vmatprep.subr.mxu1 %v5956_v62  ;;  %7295 = vmatprep.subr.mxu0 %v5929_v15 }
 0x9f0   :  { %7339 = vmatpush3.msra.mxu1 %v5956_v62  ;;  %7296 = vmatpush3.msra.mxu0 %v5929_v15  ;;  %v6005_v62 = vld [vmem:[%s9796_s4 + $0x2b0] sm:$0xff]  ;;  %v5978_v15 = vld [vmem:[%s9796_s4 + $0x218] sm:$0xff] }
 0x9f1   :  { %7340 = vmatprep.subr.mxu1 %v5955_v4  ;;  %7297 = vmatprep.subr.mxu0 %v5928_v28 }
 0x9f2   :  { %7341 = vmatpush3.msra.mxu1 %v5955_v4  ;;  %7298 = vmatpush3.msra.mxu0 %v5928_v28  ;;  %v6004_v4 = vld [vmem:[%s9796_s4 + $0x2a8] sm:$0xff]  ;;  %v5977_v28 = vld [vmem:[%s9796_s4 + $0x210] sm:$0xff] }
 0x9f3   :  { %7342 = vmatprep.subr.mxu1 %v5954_v7  ;;  %7299 = vmatprep.subr.mxu0 %v5927_v46 }
 0x9f4   :  { %7343 = vmatpush3.msra.mxu1 %v5954_v7  ;;  %7300 = vmatpush3.msra.mxu0 %v5927_v46  ;;  %v6003_v7 = vld [vmem:[%s9796_s4 + $0x2a0] sm:$0xff]  ;;  %v5976_v46 = vld [vmem:[%s9796_s4 + $0x208] sm:$0xff] }
 0x9f5   :  { %7344 = vmatprep.subr.mxu1 %v5953_v8  ;;  %7353 = vmatprep.subr.mxu0 %v9047_v60 }
 0x9f6   :  { %7345 = vmatpush3.msra.mxu1 %v5953_v8  ;;  %v6002_v8 = vld [vmem:[%s9796_s4 + $0x298] sm:$0xff] }
 0x9f7   :  { %7346 = vmatprep.subr.mxu1 %v5952_v41 }
 0x9f8   :  { %7347 = vmatpush3.msra.mxu1 %v5952_v41  ;;  %v5975_v41 = vld [vmem:[%s9796_s4 + $0x200] sm:$0xff] }
 0x9f9   :  { %7348 = vmatprep.subr.mxu1 %v5951_v11 }
 0x9fa   :  { %7349 = vmatpush3.msra.mxu1 %v5951_v11  ;;  %v6001_v11 = vld [vmem:[%s9796_s4 + $0x290] sm:$0xff] }
 0x9fb   :  { %7402 = vmatprep.subr.mxu1 %v9047_v60 }
 0xa8a   :  { %v7205_v21 = vpop.f32.mrf.mxu0 }
 0xa8b   :  { %v3440_v24 = vadd.f32 %v7205_v21, %v3178_v30  ;;  %v6000_v21 = vld [vmem:[%s9796_s4 + $0x288] sm:$0xff] }
 0xa8c   :  { %v3430_v36 = vpop.f32.mrf.mxu0 }
 0xa8d   :  { %v3439_v10 = vadd.f32 %v3430_v36, %v3173_v58  ;;  %v5999_v36 = vld [vmem:[%s9796_s4 + $0x280] sm:$0xff] }
 0xa8e   :  { %v7261_v27 = vpop.f32.mrf.mxu0 }
 0xa90   :  { %v7254_v38 = vpop.f32.mrf.mxu1  ;;  %v3781_v18 = vpop.f32.mrf.mxu0 }
 0xa91   :  { %v9321_v14 = vadd.f32 %v7254_v38, %v3440_v24 }
 0xa92   :  { %v3692_v25 = vpop.f32.mrf.mxu1 }
 0xa93   :  { %v9323_v29 = vadd.f32 %v3692_v25, %v3439_v10 }
 0xa95   :  { %v7268_v33 = vpop.f32.mrf.mxu0  ;;  %v7310_v35 = vpop.f32.mrf.mxu1 }
 0xa96   :  { %v3868_v6 = vadd.f32 %v7268_v33, %v7261_v27 }
 0xa97   :  { %v3862_v37 = vpop.f32.mrf.mxu0  ;;  %v4043_v39 = vpop.f32.mrf.mxu1 }
 0xa98   :  { %v3863_v42 = vadd.f32 %v3862_v37, %v3781_v18 }
 0xa9a   :  { %7301 = vmatprep.mubr.f32.mxu0 %v3863_v42 }
 0xa9b   :  { %v7317_v45 = vpop.f32.mrf.mxu1  ;;  %7302 = vmatmul.mubr.f32.vlgmr.msra.gmra.mxu0 %v3868_v6 }
 0xa9c   :  { %7354 = vmatpush3.msra.mxu0 %v9047_v60  ;;  %7357 = vmatprep.mubr.msk.f32.mxu0 %vm328_vm2, %v5969_v43  ;;  %v4130_v44 = vadd.f32 %v7317_v45, %v7310_v35 }
 0xa9d   :  { %v4124_v16 = vpop.f32.mrf.mxu1  ;;  %7355 = vmatprep.subr.mxu0 %v9049_v2 }
 0xa9e   :  { %v4125_v20 = vadd.f32 %v4124_v16, %v4043_v39  ;;  %7356 = vmatpush3.msra.mxu0 %v9049_v2 }
 0xa9f   :  { %7360 = vmatprep.subr.mxu0 %v9031_v13  ;;  %7358 = vmatmul.mubr.msk.f32.vlgmr.msra.gmra.mxu0 %vm328_vm2, %v5970_v40  ;;  %v6018_v40 = vld [vmem:[%s9795_s22 + $0x68] sm:$0xff] }
 0xaa0   :  { %7350 = vmatprep.mubr.f32.mxu1 %v4125_v20  ;;  %7361 = vmatpush3.msra.mxu0 %v9031_v13 }
 0xaa1   :  { %7351 = vmatmul.mubr.f32.vlgmr.msra.gmra.mxu1 %v4130_v44  ;;  %7362 = vmatprep.subr.mxu0 %v9033_v53 }
 0xaa2   :  { %7403 = vmatpush3.msra.mxu1 %v9047_v60  ;;  %7363 = vmatpush3.msra.mxu0 %v9033_v53 }
 0xaa3   :  { %7404 = vmatprep.subr.mxu1 %v9049_v2  ;;  %7364 = vmatprep.mubr.msk.f32.mxu0 %vm328_vm2, %v5967_v49  ;;  %v6015_v49 = vld [vmem:[%s9794_s21 + $0x60] sm:$0xff] }
 0xaa4   :  { %7405 = vmatpush3.msra.mxu1 %v9049_v2  ;;  %7367 = vmatprep.subr.mxu0 %v5990_v3 }
 0xaa5   :  { %7406 = vmatprep.mubr.msk.f32.mxu1 %vm328_vm2, %v5993_v12  ;;  %7409 = vmatprep.subr.mxu1 %v9031_v13  ;;  %v6041_v12 = vld [vmem:[%s9795_s22 + $0x70] sm:$0xff] }
 0xaa6   :  { %7365 = vmatmul.mubr.msk.f32.vlgmr.msra.gmra.mxu0 %vm328_vm2, %v5968_v1  ;;  %7407 = vmatmul.mubr.msk.f32.vlgmr.msra.gmra.mxu1 %vm328_vm2, %v5994_v55  ;;  %v6016_v1 = vld [vmem:[%s9794_s21 + $0x68] sm:$0xff]  ;;  %v6042_v55 = vld [vmem:[%s9795_s22 + $0x78] sm:$0xff] }
 0xaa7   :  { %7368 = vmatpush3.msra.mxu0 %v5990_v3  ;;  %7410 = vmatpush3.msra.mxu1 %v9031_v13  ;;  %v6038_v3 = vld [vmem:[%s9796_s4 + $0x378] sm:$0xff] }
 0xaa8   :  { %7369 = vmatprep.subr.mxu0 %v5989_v57  ;;  %7411 = vmatprep.subr.mxu1 %v9033_v53 }
 0xaa9   :  { %7370 = vmatpush3.msra.mxu0 %v5989_v57  ;;  %7412 = vmatpush3.msra.mxu1 %v9033_v53  ;;  %v6037_v57 = vld [vmem:[%s9796_s4 + $0x370] sm:$0xff] }
 0xaaa   :  { %7371 = vmatprep.subr.mxu0 %v5988_v51  ;;  %7413 = vmatprep.mubr.msk.f32.mxu1 %vm328_vm2, %v5991_v59  ;;  %v6039_v59 = vld [vmem:[%s9794_s21 + $0x70] sm:$0xff] }
 0xaab   :  { %7416 = vmatprep.subr.mxu1 %v6014_v61  ;;  %7372 = vmatpush3.msra.mxu0 %v5988_v51  ;;  %v6036_v51 = vld [vmem:[%s9796_s4 + $0x368] sm:$0xff] }
 0xaac   :  { %7414 = vmatmul.mubr.msk.f32.vlgmr.msra.gmra.mxu1 %vm328_vm2, %v5992_v63  ;;  %7373 = vmatprep.subr.mxu0 %v5987_v5  ;;  %v6035_v63 = vld [vmem:[%s9796_s4 + $0x360] sm:$0xff] }
 0xaad   :  { %7417 = vmatpush3.msra.mxu1 %v6014_v61  ;;  %7374 = vmatpush3.msra.mxu0 %v5987_v5  ;;  %v6040_v61 = vld [vmem:[%s9794_s21 + $0x78] sm:$0xff] }
 0xaae   :  { %7418 = vmatprep.subr.mxu1 %v6013_v47  ;;  %7375 = vmatprep.subr.mxu0 %v5986_v0  ;;  %v6062_v5 = vld [vmem:[%s9796_s4 + $0x3f8] sm:$0xff] }
 0xaaf   :  { %7419 = vmatpush3.msra.mxu1 %v6013_v47  ;;  %7376 = vmatpush3.msra.mxu0 %v5986_v0  ;;  %v6034_v47 = vld [vmem:[%s9796_s4 + $0x358] sm:$0xff]  ;;  %v6061_v0 = vld [vmem:[%s9796_s4 + $0x3f0] sm:$0xff] }
 0xab0   :  { %7420 = vmatprep.subr.mxu1 %v6012_v9  ;;  %7377 = vmatprep.subr.mxu0 %v5985_v17 }
 0xab1   :  { %7421 = vmatpush3.msra.mxu1 %v6012_v9  ;;  %7378 = vmatpush3.msra.mxu0 %v5985_v17  ;;  %v6033_v9 = vld [vmem:[%s9796_s4 + $0x350] sm:$0xff]  ;;  %v6060_v17 = vld [vmem:[%s9796_s4 + $0x3e8] sm:$0xff] }
 0xab2   :  { %7422 = vmatprep.subr.mxu1 %v6011_v19  ;;  %7379 = vmatprep.subr.mxu0 %v5984_v22 }
 0xab3   :  { %7423 = vmatpush3.msra.mxu1 %v6011_v19  ;;  %7380 = vmatpush3.msra.mxu0 %v5984_v22  ;;  %v6032_v19 = vld [vmem:[%s9796_s4 + $0x348] sm:$0xff]  ;;  %v6059_v22 = vld [vmem:[%s9796_s4 + $0x3e0] sm:$0xff] }
 0xab4   :  { %7424 = vmatprep.subr.mxu1 %v6010_v26  ;;  %7381 = vmatprep.subr.mxu0 %v5983_v23 }
 0xab5   :  { %7425 = vmatpush3.msra.mxu1 %v6010_v26  ;;  %7382 = vmatpush3.msra.mxu0 %v5983_v23  ;;  %v6031_v26 = vld [vmem:[%s9796_s4 + $0x340] sm:$0xff]  ;;  %v6058_v23 = vld [vmem:[%s9796_s4 + $0x3d8] sm:$0xff] }
 0xab6   :  { %7426 = vmatprep.subr.mxu1 %v6009_v31  ;;  %7383 = vmatprep.subr.mxu0 %v5982_v32 }
 0xab7   :  { %7427 = vmatpush3.msra.mxu1 %v6009_v31  ;;  %7384 = vmatpush3.msra.mxu0 %v5982_v32  ;;  %v6030_v31 = vld [vmem:[%s9796_s4 + $0x338] sm:$0xff]  ;;  %v6057_v32 = vld [vmem:[%s9796_s4 + $0x3d0] sm:$0xff] }
 0xab8   :  { %7428 = vmatprep.subr.mxu1 %v6008_v34  ;;  %7385 = vmatprep.subr.mxu0 %v5981_v56 }
 0xab9   :  { %7429 = vmatpush3.msra.mxu1 %v6008_v34  ;;  %7386 = vmatpush3.msra.mxu0 %v5981_v56  ;;  %v6029_v34 = vld [vmem:[%s9796_s4 + $0x330] sm:$0xff]  ;;  %v6056_v56 = vld [vmem:[%s9796_s4 + $0x3c8] sm:$0xff] }
 0xaba   :  { %7430 = vmatprep.subr.mxu1 %v6007_v54  ;;  %7387 = vmatprep.subr.mxu0 %v5980_v52 }
 0xabb   :  { %7431 = vmatpush3.msra.mxu1 %v6007_v54  ;;  %7388 = vmatpush3.msra.mxu0 %v5980_v52  ;;  %v6028_v54 = vld [vmem:[%s9796_s4 + $0x328] sm:$0xff]  ;;  %v6027_v52 = vld [vmem:[%s9796_s4 + $0x320] sm:$0xff] }
 0xabc   :  { %7432 = vmatprep.subr.mxu1 %v6006_v50  ;;  %7389 = vmatprep.subr.mxu0 %v5979_v48 }
 0xabd   :  { %7433 = vmatpush3.msra.mxu1 %v6006_v50  ;;  %7390 = vmatpush3.msra.mxu0 %v5979_v48  ;;  %v6026_v50 = vld [vmem:[%s9796_s4 + $0x318] sm:$0xff]  ;;  %v6025_v48 = vld [vmem:[%s9796_s4 + $0x310] sm:$0xff] }
 0xabe   :  { %7434 = vmatprep.subr.mxu1 %v6005_v62  ;;  %7391 = vmatprep.subr.mxu0 %v5978_v15 }
 0xabf   :  { %7435 = vmatpush3.msra.mxu1 %v6005_v62  ;;  %7392 = vmatpush3.msra.mxu0 %v5978_v15  ;;  %v6024_v62 = vld [vmem:[%s9796_s4 + $0x308] sm:$0xff]  ;;  %v6023_v15 = vld [vmem:[%s9796_s4 + $0x300] sm:$0xff] }
 0xac0   :  { %7436 = vmatprep.subr.mxu1 %v6004_v4  ;;  %7393 = vmatprep.subr.mxu0 %v5977_v28 }
 0xac1   :  { %7437 = vmatpush3.msra.mxu1 %v6004_v4  ;;  %7394 = vmatpush3.msra.mxu0 %v5977_v28  ;;  %v6055_v4 = vld [vmem:[%s9796_s4 + $0x3c0] sm:$0xff]  ;;  %v6054_v28 = vld [vmem:[%s9796_s4 + $0x3b8] sm:$0xff] }
 0xac2   :  { %7438 = vmatprep.subr.mxu1 %v6003_v7  ;;  %7395 = vmatprep.subr.mxu0 %v5976_v46 }
 0xac3   :  { %7439 = vmatpush3.msra.mxu1 %v6003_v7  ;;  %7396 = vmatpush3.msra.mxu0 %v5976_v46  ;;  %v6053_v7 = vld [vmem:[%s9796_s4 + $0x3b0] sm:$0xff]  ;;  %v6052_v46 = vld [vmem:[%s9796_s4 + $0x3a8] sm:$0xff] }
 0xac4   :  { %7440 = vmatprep.subr.mxu1 %v6002_v8  ;;  %7397 = vmatprep.subr.mxu0 %v5975_v41 }
 0xac5   :  { %7441 = vmatpush3.msra.mxu1 %v6002_v8  ;;  %7398 = vmatpush3.msra.mxu0 %v5975_v41  ;;  %v6051_v8 = vld [vmem:[%s9796_s4 + $0x3a0] sm:$0xff]  ;;  %v6050_v41 = vld [vmem:[%s9796_s4 + $0x398] sm:$0xff] }
 0xac6   :  { %7442 = vmatprep.subr.mxu1 %v6001_v11  ;;  %7451 = vmatprep.subr.mxu0 %v9047_v60 }
 0xac7   :  { %7443 = vmatpush3.msra.mxu1 %v6001_v11  ;;  %v6049_v11 = vld [vmem:[%s9796_s4 + $0x390] sm:$0xff] }
 0xac8   :  { %7444 = vmatprep.subr.mxu1 %v6000_v21 }
 0xac9   :  { %7445 = vmatpush3.msra.mxu1 %v6000_v21  ;;  %v6048_v21 = vld [vmem:[%s9796_s4 + $0x388] sm:$0xff] }
 0xaca   :  { %7446 = vmatprep.subr.mxu1 %v5999_v36 }
 0xacb   :  { %7447 = vmatpush3.msra.mxu1 %v5999_v36  ;;  %v6047_v36 = vld [vmem:[%s9796_s4 + $0x380] sm:$0xff] }
 0xacc   :  { %7500 = vmatprep.subr.mxu1 %v9047_v60 }
 0xb5b   :  { %v7303_v30 = vpop.f32.mrf.mxu0 }
 0xb5c   :  { %v3964_v27 = vadd.f32 %v7303_v30, %v9321_v14  ;;  %v6017_v14 = vld [vmem:[%s9795_s22 + $0x60] sm:$0xff]  ;;  %v7662_v30 = vld [vmem:[%s9865_s12 + $0x38] sm:$0xff] }
 0xb5d   :  { %v3954_v24 = vpop.f32.mrf.mxu0 }
 0xb5e   :  { %v3963_v58 = vadd.f32 %v3954_v24, %v9323_v29 }
 0xb5f   :  { %v7359_v38 = vpop.f32.mrf.mxu0 }
 0xb61   :  { %v7352_v10 = vpop.f32.mrf.mxu1  ;;  %v4305_v25 = vpop.f32.mrf.mxu0 }
 0xb62   :  { %v9471_v18 = vadd.f32 %v7352_v10, %v3964_v27 }
 0xb63   :  { %v4216_v33 = vpop.f32.mrf.mxu1 }
 0xb64   :  { %v9473_v35 = vadd.f32 %v4216_v33, %v3963_v58 }
 0xb66   :  { %v7366_v37 = vpop.f32.mrf.mxu0  ;;  %v7408_v39 = vpop.f32.mrf.mxu1 }
 0xb67   :  { %v4392_v45 = vadd.f32 %v7366_v37, %v7359_v38 }
 0xb68   :  { %v4386_v42 = vpop.f32.mrf.mxu0  ;;  %v4567_v6 = vpop.f32.mrf.mxu1 }
 0xb69   :  { %v4387_v43 = vadd.f32 %v4386_v42, %v4305_v25 }
 0xb6b   :  { %7399 = vmatprep.mubr.f32.mxu0 %v4387_v43 }
 0xb6c   :  { %v7415_v29 = vpop.f32.mrf.mxu1  ;;  %7400 = vmatmul.mubr.f32.vlgmr.msra.gmra.mxu0 %v4392_v45 }
 0xb6d   :  { %7452 = vmatpush3.msra.mxu0 %v9047_v60  ;;  %7455 = vmatprep.mubr.msk.f32.mxu0 %vm328_vm2, %v6017_v14  ;;  %v4654_v44 = vadd.f32 %v7415_v29, %v7408_v39 }
 0xb6e   :  { %v4648_v16 = vpop.f32.mrf.mxu1  ;;  %7453 = vmatprep.subr.mxu0 %v9049_v2 }
 0xb6f   :  { %v4649_v20 = vadd.f32 %v4648_v16, %v4567_v6  ;;  %7454 = vmatpush3.msra.mxu0 %v9049_v2 }
 0xb70   :  { %7458 = vmatprep.subr.mxu0 %v9031_v13  ;;  %7456 = vmatmul.mubr.msk.f32.vlgmr.msra.gmra.mxu0 %vm328_vm2, %v6018_v40 }
 0xb71   :  { %7448 = vmatprep.mubr.f32.mxu1 %v4649_v20  ;;  %7459 = vmatpush3.msra.mxu0 %v9031_v13 }
 0xb72   :  { %7449 = vmatmul.mubr.f32.vlgmr.msra.gmra.mxu1 %v4654_v44  ;;  %7460 = vmatprep.subr.mxu0 %v9033_v53 }
 0xb73   :  { %7501 = vmatpush3.msra.mxu1 %v9047_v60  ;;  %7461 = vmatpush3.msra.mxu0 %v9033_v53 }
 0xb74   :  { %7502 = vmatprep.subr.mxu1 %v9049_v2  ;;  %7462 = vmatprep.mubr.msk.f32.mxu0 %vm328_vm2, %v6015_v49  ;;  %v6066_v49 = vld [vmem:[%s9795_s22 + $0x88] sm:$0xff] }
 0xb75   :  { %7503 = vmatpush3.msra.mxu1 %v9049_v2  ;;  %7465 = vmatprep.subr.mxu0 %v6038_v3 }
 0xb76   :  { %7504 = vmatprep.mubr.msk.f32.mxu1 %vm328_vm2, %v6041_v12  ;;  %7507 = vmatprep.subr.mxu1 %v9031_v13  ;;  %v6085_v12 = vld [vmem:[%s9796_s4 + $0x470] sm:$0xff] }
 0xb77   :  { %7463 = vmatmul.mubr.msk.f32.vlgmr.msra.gmra.mxu0 %vm328_vm2, %v6016_v1  ;;  %7505 = vmatmul.mubr.msk.f32.vlgmr.msra.gmra.mxu1 %vm328_vm2, %v6042_v55  ;;  %v6084_v1 = vld [vmem:[%s9796_s4 + $0x468] sm:$0xff] }
 0xb78   :  { %7466 = vmatpush3.msra.mxu0 %v6038_v3  ;;  %7508 = vmatpush3.msra.mxu1 %v9031_v13  ;;  %v6063_v3 = vld [vmem:[%s9794_s21 + $0x80] sm:$0xff]  ;;  %v7664_v55 = vld [vmem:[%s9865_s12 + $0x28] sm:$0xff] }
 0xb79   :  { %7467 = vmatprep.subr.mxu0 %v6037_v57  ;;  %7509 = vmatprep.subr.mxu1 %v9033_v53 }
 0xb7a   :  { %7468 = vmatpush3.msra.mxu0 %v6037_v57  ;;  %7510 = vmatpush3.msra.mxu1 %v9033_v53  ;;  %v6082_v57 = vld [vmem:[%s9796_s4 + $0x458] sm:$0xff] }
 0xb7b   :  { %7469 = vmatprep.subr.mxu0 %v6036_v51  ;;  %7511 = vmatprep.mubr.msk.f32.mxu1 %vm328_vm2, %v6039_v59  ;;  %v7665_v59 = vld [vmem:[%s9865_s12 + $0x20] sm:$0xff] }
 0xb7c   :  { %7470 = vmatpush3.msra.mxu0 %v6036_v51  ;;  %7512 = vmatmul.mubr.msk.f32.vlgmr.msra.gmra.mxu1 %vm328_vm2, %v6040_v61  ;;  %v6081_v51 = vld [vmem:[%s9796_s4 + $0x450] sm:$0xff]  ;;  %v6080_v61 = vld [vmem:[%s9796_s4 + $0x448] sm:$0xff] }
 0xb7d   :  { %7471 = vmatprep.subr.mxu0 %v6035_v63  ;;  %7514 = vmatprep.subr.mxu1 %v6062_v5 }
 0xb7e   :  { %7472 = vmatpush3.msra.mxu0 %v6035_v63  ;;  %7515 = vmatpush3.msra.mxu1 %v6062_v5  ;;  %v6079_v63 = vld [vmem:[%s9796_s4 + $0x440] sm:$0xff]  ;;  %v7666_v5 = vld [vmem:[%s9865_s12 + $0x18] sm:$0xff] }
 0xb7f   :  { %7473 = vmatprep.subr.mxu0 %v6034_v47  ;;  %7516 = vmatprep.subr.mxu1 %v6061_v0 }
 0xb80   :  { %7474 = vmatpush3.msra.mxu0 %v6034_v47  ;;  %7517 = vmatpush3.msra.mxu1 %v6061_v0  ;;  %v6078_v47 = vld [vmem:[%s9796_s4 + $0x438] sm:$0xff]  ;;  %v7667_v0 = vld [vmem:[%s9865_s12 + $0x10] sm:$0xff] }
 0xb81   :  { %7475 = vmatprep.subr.mxu0 %v6033_v9  ;;  %7518 = vmatprep.subr.mxu1 %v6060_v17 }
 0xb82   :  { %7476 = vmatpush3.msra.mxu0 %v6033_v9  ;;  %7519 = vmatpush3.msra.mxu1 %v6060_v17  ;;  %v7668_v9 = vld [vmem:[%s9865_s12 + $0x8] sm:$0xff]  ;;  %v7669_v17 = vld [vmem:[%s9865_s12] sm:$0xff] }
 0xb83   :  { %7477 = vmatprep.subr.mxu0 %v6032_v19  ;;  %7520 = vmatprep.subr.mxu1 %v6059_v22 }
 0xb84   :  { %7478 = vmatpush3.msra.mxu0 %v6032_v19  ;;  %7521 = vmatpush3.msra.mxu1 %v6059_v22  ;;  %v6077_v19 = vld [vmem:[%s9796_s4 + $0x430] sm:$0xff]  ;;  %v6076_v22 = vld [vmem:[%s9796_s4 + $0x428] sm:$0xff] }
 0xb85   :  { %7479 = vmatprep.subr.mxu0 %v6031_v26  ;;  %7522 = vmatprep.subr.mxu1 %v6058_v23 }
 0xb86   :  { %7480 = vmatpush3.msra.mxu0 %v6031_v26  ;;  %7523 = vmatpush3.msra.mxu1 %v6058_v23  ;;  %v6075_v26 = vld [vmem:[%s9796_s4 + $0x420] sm:$0xff]  ;;  %v6074_v23 = vld [vmem:[%s9796_s4 + $0x418] sm:$0xff] }
 0xb87   :  { %7481 = vmatprep.subr.mxu0 %v6030_v31  ;;  %7524 = vmatprep.subr.mxu1 %v6057_v32 }
 0xb88   :  { %7482 = vmatpush3.msra.mxu0 %v6030_v31  ;;  %7525 = vmatpush3.msra.mxu1 %v6057_v32  ;;  %v6073_v31 = vld [vmem:[%s9796_s4 + $0x410] sm:$0xff]  ;;  %v6072_v32 = vld [vmem:[%s9796_s4 + $0x408] sm:$0xff] }
 0xb89   :  { %7483 = vmatprep.subr.mxu0 %v6029_v34  ;;  %7526 = vmatprep.subr.mxu1 %v6056_v56 }
 0xb8a   :  { %7484 = vmatpush3.msra.mxu0 %v6029_v34  ;;  %7527 = vmatpush3.msra.mxu1 %v6056_v56  ;;  %v6071_v34 = vld [vmem:[%s9796_s4 + $0x400] sm:$0xff] }
 0xb8b   :  { %7485 = vmatprep.subr.mxu0 %v6028_v54  ;;  %7528 = vmatprep.subr.mxu1 %v6055_v4 }
 0xb8c   :  { %7486 = vmatpush3.msra.mxu0 %v6028_v54  ;;  %7529 = vmatpush3.msra.mxu1 %v6055_v4 }
 0xb8d   :  { %7487 = vmatprep.subr.mxu0 %v6027_v52  ;;  %7530 = vmatprep.subr.mxu1 %v6054_v28 }
 0xb8e   :  { %7488 = vmatpush3.msra.mxu0 %v6027_v52  ;;  %7531 = vmatpush3.msra.mxu1 %v6054_v28 }
 0xb8f   :  { %7489 = vmatprep.subr.mxu0 %v6026_v50  ;;  %7532 = vmatprep.subr.mxu1 %v6053_v7 }
 0xb90   :  { %7490 = vmatpush3.msra.mxu0 %v6026_v50  ;;  %7533 = vmatpush3.msra.mxu1 %v6053_v7 }
 0xb91   :  { %7491 = vmatprep.subr.mxu0 %v6025_v48  ;;  %7534 = vmatprep.subr.mxu1 %v6052_v46 }
 0xb92   :  { %7492 = vmatpush3.msra.mxu0 %v6025_v48  ;;  %7535 = vmatpush3.msra.mxu1 %v6052_v46 }
 0xb93   :  { %7493 = vmatprep.subr.mxu0 %v6024_v62  ;;  %7536 = vmatprep.subr.mxu1 %v6051_v8 }
 0xb94   :  { %7494 = vmatpush3.msra.mxu0 %v6024_v62  ;;  %7537 = vmatpush3.msra.mxu1 %v6051_v8 }
 0xb95   :  { %7495 = vmatprep.subr.mxu0 %v6023_v15  ;;  %7538 = vmatprep.subr.mxu1 %v6050_v41 }
 0xb96   :  { %7496 = vmatpush3.msra.mxu0 %v6023_v15  ;;  %7539 = vmatpush3.msra.mxu1 %v6050_v41 }
 0xb97   :  { %7549 = vmatprep.subr.mxu0 %v9047_v60  ;;  %7540 = vmatprep.subr.mxu1 %v6049_v11 }
 0xb98   :  { %7541 = vmatpush3.msra.mxu1 %v6049_v11 }
 0xb99   :  { %7542 = vmatprep.subr.mxu1 %v6048_v21 }
 0xb9a   :  { %7543 = vmatpush3.msra.mxu1 %v6048_v21 }
 0xb9b   :  { %7544 = vmatprep.subr.mxu1 %v6047_v36 }
 0xb9c   :  { %7545 = vmatpush3.msra.mxu1 %v6047_v36 }
 0xb9d   :  { %7598 = vmatprep.subr.mxu1 %v7662_v30 }
 0xc2c   :  { %v7401_v27 = vpop.f32.mrf.mxu0 }
 0xc2d   :  { %v4488_v24 = vadd.f32 %v7401_v27, %v9471_v18  ;;  %v6065_v18 = vld [vmem:[%s9795_s22 + $0x80] sm:$0xff] }
 0xc2e   :  { %v4478_v58 = vpop.f32.mrf.mxu0 }
 0xc2f   :  { %v4487_v38 = vadd.f32 %v4478_v58, %v9473_v35  ;;  %v5560_v58 = vld [vmem:[%s9797_s24] sm:$0xff] }
 0xc30   :  { %v7457_v10 = vpop.f32.mrf.mxu0 }
 0xc32   :  { %v7450_v25 = vpop.f32.mrf.mxu1  ;;  %v4829_v37 = vpop.f32.mrf.mxu0 }
 0xc33   :  { %v9623_v33 = vadd.f32 %v7450_v25, %v4488_v24  ;;  %v5561_v24 = vld [vmem:[%s9797_s24 + $0x8] sm:$0xff] }
 0xc34   :  { %v4740_v39 = vpop.f32.mrf.mxu1 }
 0xc35   :  { %v9625_v42 = vadd.f32 %v4740_v39, %v4487_v38  ;;  %v6094_v38 = vld [vmem:[%s9865_s12 + $0x78] sm:$0xff] }
 0xc37   :  { %v7464_v6 = vpop.f32.mrf.mxu0  ;;  %v7506_v43 = vpop.f32.mrf.mxu1 }
 0xc38   :  { %v4916_v40 = vadd.f32 %v7464_v6, %v7457_v10 }
 0xc39   :  { %v4910_v45 = vpop.f32.mrf.mxu0  ;;  %v5091_v14 = vpop.f32.mrf.mxu1 }
 0xc3a   :  { %v4911_v29 = vadd.f32 %v4910_v45, %v4829_v37  ;;  %v6093_v45 = vld [vmem:[%s9865_s12 + $0x70] sm:$0xff] }
 0xc3c   :  { %v7513_v44 = vpop.f32.mrf.mxu1  ;;  %7497 = vmatprep.mubr.f32.mxu0 %v4911_v29  ;;  %v6092_v29 = vld [vmem:[%s9865_s12 + $0x68] sm:$0xff] }
 0xc3d   :  { %7498 = vmatmul.mubr.f32.vlgmr.msra.gmra.mxu0 %v4916_v40  ;;  %v5178_v35 = vadd.f32 %v7513_v44, %v7506_v43  ;;  %v6091_v40 = vld [vmem:[%s9865_s12 + $0x60] sm:$0xff]  ;;  %v6090_v44 = vld [vmem:[%s9865_s12 + $0x58] sm:$0xff] }
 0xc3e   :  { %v5172_v16 = vpop.f32.mrf.mxu1  ;;  %7550 = vmatpush3.msra.mxu0 %v9047_v60  ;;  %7553 = vmatprep.mubr.msk.f32.mxu0 %vm328_vm2, %v6065_v18  ;;  %v6064_v60 = vld [vmem:[%s9794_s21 + $0x88] sm:$0xff] }
 0xc3f   :  { %v5173_v20 = vadd.f32 %v5172_v16, %v5091_v14  ;;  %7551 = vmatprep.subr.mxu0 %v9049_v2  ;;  %v5574_v14 = vld [vmem:[%s9798_s25] sm:$0xff]  ;;  %v5575_v18 = vld [vmem:[%s9798_s25 + $0x8] sm:$0xff] }
 0xc40   :  { %7552 = vmatpush3.msra.mxu0 %v9049_v2  ;;  %v6086_v2 = vld [vmem:[%s9796_s4 + $0x478] sm:$0xff]  ;;  %v6088_v16 = vld [vmem:[%s9865_s12 + $0x48] sm:$0xff] }
 0xc41   :  { %7546 = vmatprep.mubr.f32.mxu1 %v5173_v20  ;;  %7556 = vmatprep.subr.mxu0 %v9031_v13  ;;  %v6087_v20 = vld [vmem:[%s9865_s12 + $0x40] sm:$0xff] }
 0xc42   :  { %7547 = vmatmul.mubr.f32.vlgmr.msra.gmra.mxu1 %v5178_v35  ;;  %7554 = vmatmul.mubr.msk.f32.vlgmr.msra.gmra.mxu0 %vm328_vm2, %v6066_v49  ;;  %v6089_v35 = vld [vmem:[%s9865_s12 + $0x50] sm:$0xff] }
 0xc43   :  { %7557 = vmatpush3.msra.mxu0 %v9031_v13  ;;  %7560 = vmatprep.mubr.msk.f32.mxu0 %vm328_vm2, %v6063_v3  ;;  %v7663_v13 = vld [vmem:[%s9865_s12 + $0x30] sm:$0xff] }
 0xc44   :  { %7558 = vmatprep.subr.mxu0 %v9033_v53  ;;  %7599 = vmatpush3.xpose.msra.mxu1 %v7662_v30 }
 0xc45   :  { %7559 = vmatpush3.msra.mxu0 %v9033_v53  ;;  %7600 = vmatprep.subr.mxu1 %v7663_v13  ;;  %v6083_v53 = vld [vmem:[%s9796_s4 + $0x460] sm:$0xff] }
 0xc46   :  { %7561 = vmatmul.mubr.msk.f32.vlgmr.msra.gmra.mxu0 %vm328_vm2, %v6064_v60  ;;  %7563 = vmatprep.subr.mxu0 %v6086_v2 }
 0xc47   :  { %7564 = vmatpush3.msra.mxu0 %v6086_v2 }
 0xc48   :  { %7565 = vmatprep.subr.mxu0 %v6085_v12  ;;  %7601 = vmatpush3.xpose.msra.mxu1 %v7663_v13 }
 0xc49   :  { %7566 = vmatpush3.msra.mxu0 %v6085_v12  ;;  %7602 = vmatprep.subr.mxu1 %v7664_v55 }
 0xc4a   :  { %7567 = vmatprep.subr.mxu0 %v6084_v1 }
 0xc4b   :  { %7568 = vmatpush3.msra.mxu0 %v6084_v1 }
 0xc4c   :  { %7569 = vmatprep.subr.mxu0 %v6083_v53  ;;  %7603 = vmatpush3.xpose.msra.mxu1 %v7664_v55 }
 0xc4d   :  { %7570 = vmatpush3.msra.mxu0 %v6083_v53  ;;  %7604 = vmatprep.subr.mxu1 %v7665_v59 }
 0xc4e   :  { %7571 = vmatprep.subr.mxu0 %v6082_v57 }
 0xc4f   :  { %7572 = vmatpush3.msra.mxu0 %v6082_v57 }
 0xc50   :  { %7573 = vmatprep.subr.mxu0 %v6081_v51  ;;  %7605 = vmatpush3.xpose.msra.mxu1 %v7665_v59 }
 0xc51   :  { %7574 = vmatpush3.msra.mxu0 %v6081_v51  ;;  %7606 = vmatprep.subr.mxu1 %v7666_v5 }
 0xc52   :  { %7575 = vmatprep.subr.mxu0 %v6080_v61 }
 0xc53   :  { %7576 = vmatpush3.msra.mxu0 %v6080_v61 }
 0xc54   :  { %7577 = vmatprep.subr.mxu0 %v6079_v63  ;;  %7607 = vmatpush3.xpose.msra.mxu1 %v7666_v5 }
 0xc55   :  { %7578 = vmatpush3.msra.mxu0 %v6079_v63  ;;  %7608 = vmatprep.subr.mxu1 %v7667_v0 }
 0xc56   :  { %7579 = vmatprep.subr.mxu0 %v6078_v47 }
 0xc57   :  { %7580 = vmatpush3.msra.mxu0 %v6078_v47 }
 0xc58   :  { %7609 = vmatpush3.xpose.msra.mxu1 %v7667_v0  ;;  %7581 = vmatprep.subr.mxu0 %v6077_v19 }
 0xc59   :  { %7610 = vmatprep.subr.mxu1 %v7668_v9  ;;  %7582 = vmatpush3.msra.mxu0 %v6077_v19 }
 0xc5a   :  { %7583 = vmatprep.subr.mxu0 %v6076_v22 }
 0xc5b   :  { %7584 = vmatpush3.msra.mxu0 %v6076_v22 }
 0xc5c   :  { %7611 = vmatpush3.xpose.msra.mxu1 %v7668_v9  ;;  %7585 = vmatprep.subr.mxu0 %v6075_v26 }
 0xc5d   :  { %7612 = vmatprep.subr.mxu1 %v7669_v17  ;;  %7586 = vmatpush3.msra.mxu0 %v6075_v26 }
 0xc5e   :  { %7587 = vmatprep.subr.mxu0 %v6074_v23 }
 0xc5f   :  { %7588 = vmatpush3.msra.mxu0 %v6074_v23 }
 0xc60   :  { %7613 = vmatpush3.xpose.msra.mxu1 %v7669_v17  ;;  %7589 = vmatprep.subr.mxu0 %v6073_v31 }
 0xc61   :  { %7590 = vmatpush3.msra.mxu0 %v6073_v31 }
 0xc62   :  { %7591 = vmatprep.subr.mxu0 %v6072_v32 }
 0xc63   :  { %7592 = vmatpush3.msra.mxu0 %v6072_v32 }
 0xc64   :  { %7593 = vmatprep.subr.mxu0 %v6071_v34 }
 0xc65   :  { %7594 = vmatpush3.msra.mxu0 %v6071_v34 }
 0xc66   :  { %7617 = vmatprep.subr.mxu0 %v6094_v38 }
 0xcfd   :  { %v7499_v56 = vpop.f32.mrf.mxu0 }
 0xcfe   :  { %v5012_v54 = vadd.f32 %v7499_v56, %v9623_v33 }
 0xcff   :  { %v5002_v52 = vpop.f32.mrf.mxu0 }
 0xd00   :  { %v5011_v50 = vadd.f32 %v5002_v52, %v9625_v42 }
 0xd02   :  { %v7555_v48 = vpop.f32.mrf.mxu0  ;;  %v7548_v46 = vpop.f32.mrf.mxu1 }
 0xd03   :  { %v5274_v41 = vadd.f32 %v7548_v46, %v5012_v54 }
 0xd04   :  { %v5353_v62 = vpop.f32.mrf.mxu0  ;;  %v5264_v8 = vpop.f32.mrf.mxu1 }
 0xd05   :  { %v5273_v21 = vadd.f32 %v5264_v8, %v5011_v50 }
 0xd06   :  { %v7562_v15 = vpop.f32.mrf.mxu0 }
 0xd07   :  { %v5440_v7 = vadd.f32 %v7562_v15, %v7555_v48 }
 0xd08   :  { %v5434_v4 = vpop.f32.mrf.mxu0 }
 0xd09   :  { %v5435_v28 = vadd.f32 %v5434_v4, %v5353_v62 }
 0xd0b   :  { %7595 = vmatprep.mubr.f32.mxu0 %v5435_v28 }
 0xd0c   :  { %7596 = vmatmul.mubr.f32.vlgmr.msra.gmra.mxu0 %v5440_v7 }
 0xd0d   :  { %7618 = vmatpush3.xpose.msra.mxu0 %v6094_v38 }
 0xd0e   :  { %7619 = vmatprep.subr.mxu0 %v6093_v45 }
 0xd11   :  { %7620 = vmatpush3.xpose.msra.mxu0 %v6093_v45 }
 0xd12   :  { %7621 = vmatprep.subr.mxu0 %v6092_v29 }
 0xd15   :  { %7622 = vmatpush3.xpose.msra.mxu0 %v6092_v29 }
 0xd16   :  { %7623 = vmatprep.subr.mxu0 %v6091_v40 }
 0xd19   :  { %7624 = vmatpush3.xpose.msra.mxu0 %v6091_v40 }
 0xd1a   :  { %7625 = vmatprep.subr.mxu0 %v6090_v44 }
 0xd1d   :  { %7626 = vmatpush3.xpose.msra.mxu0 %v6090_v44 }
 0xd1e   :  { %7627 = vmatprep.subr.mxu0 %v6089_v35 }
 0xd21   :  { %7628 = vmatpush3.xpose.msra.mxu0 %v6089_v35 }
 0xd22   :  { %7629 = vmatprep.subr.mxu0 %v6088_v16 }
 0xd25   :  { %7630 = vmatpush3.xpose.msra.mxu0 %v6088_v16 }
 0xd26   :  { %7631 = vmatprep.subr.mxu0 %v6087_v20 }
 0xd29   :  { %7632 = vmatpush3.xpose.msra.mxu0 %v6087_v20 }
 0xdcc   :  { %v7597_v11 = vpop.f32.mrf.mxu0 }
 0xdcd   :  { %v5536_v36 = vadd.f32 %v7597_v11, %v5274_v41 }
 0xdce   :  { %v5526_v30 = vpop.f32.mrf.mxu0 }
 0xdcf   :  { %v5535_v27 = vadd.f32 %v5526_v30, %v5273_v21  ;;  %5539 = vadd.xlane.f32.xlu0 %v5536_v36 }
 0xdd1   :  { %5537 = vadd.xlane.f32.xlu1 %v5535_v27 }
 0xde2   :  { %5569 = vperm.xlu1 %7641, %v5561_v24  }
 0xde5   :  { %5564 = vperm.xlu0 %7640, %v5560_v58  }
 0xe58   :  { %v5540_v10 = vpop.xlane.xlu0 %5539 }
 0xe59   :  { %v5543_v25 = vmul.f32 0.0078125, %v5540_v10 }
 0xe5a   :  { %v5538_v33 = vpop.xlane.xlu1 %5537 }
 0xe5b   :  { %v5545_v37 = vsub.f32 %v5536_v36, %v5543_v25  ;;  %v5542_v39 = vmul.f32 0.0078125, %v5538_v33 }
 0xe5d   :  { %v5544_v42 = vsub.f32 %v5535_v27, %v5542_v39  ;;  %v5547_v6 = vmul.f32 %v5545_v37, %v5545_v37 }
 0xe5e   :  { %v5570_v49 = vpop.permute.xlu1 %5569 }
 0xe5f   :  { %5550 = vadd.xlane.f32.xlu1 %v5547_v6  ;;  %v5546_v43 = vmul.f32 %v5544_v42, %v5544_v42 }
 0xe60   :  { %v5565_v3 = vpop.permute.xlu0 %5564 }
 0xe61   :  { %5548 = vadd.xlane.f32.xlu0 %v5546_v43 }
 0xe70   :  { %5578 = vperm.xlu1 %7641, %v5574_v14  }
 0xe77   :  { %5583 = vperm.xlu0 %7640, %v5575_v18  }
 0xee8   :  { %v5551_v60 = vpop.xlane.xlu1 %5550 }
 0xee9   :  { %v5553_v2 = vmul.f32 0.0078125, %v5551_v60 }
 0xeea   :  { %v5549_v12 = vpop.xlane.xlu0 %5548 }
 0xeeb   :  { %v5555_v13 = vadd.f32 1e-05, %v5553_v2  ;;  %v5552_v1 = vmul.f32 0.0078125, %v5549_v12 }
 0xeec   :  { %v5579_v47 = vpop.permute.xlu1 %5578 }
 0xeed   :  { %7658 = vrsqrt.f32 %v5555_v13  ;;  %v5554_v53 = vadd.f32 1e-05, %v5552_v1 }
 0xeef   :  { %7660 = vrsqrt.f32 %v5554_v53 }
 0xef2   :  { %v5584_v5 = vpop.permute.xlu0 %5583 }
 0xefa   :  { %v7659_v55 = vpop.eup %7658 }
 0xefb   :  { %v5559_v57 = vmul.f32 %v7659_v55, %v5545_v37 }
 0xefc   :  { %v7661_v51 = vpop.eup %7660 }
 0xefd   :  { %v5558_v59 = vmul.f32 %v7661_v51, %v5544_v42  ;;  %v5573_v61 = vmul.f32 %v5570_v49, %v5559_v57 }
 0xeff   :  { %v5572_v63 = vmul.f32 %v5565_v3, %v5558_v59  ;;  %v5587_v0 = vadd.f32 %v5584_v5, %v5573_v61 }
 0xf01   :  { %v5586_v9 = vadd.f32 %v5579_v47, %v5572_v63  ;;  %v5589_v19 = vmax.f32 %v5587_v0, 0.0 }
 0xf03   :  { %v5588_v17 = vmax.f32 %v5586_v9, 0.0 }
 0xf05   :  { %7614 = vmatprep.mubr.f32.mxu1 %v5588_v17  ;;  %7633 = vmatprep.mubr.f32.mxu0 %v5588_v17 }
 0xf06   :  { %7615 = vmatmul.mubr.f32.vlgmr.msra.gmra.mxu1 %v5589_v19  ;;  %7634 = vmatmul.mubr.f32.vlgmr.msra.gmra.mxu0 %v5589_v19 }
 0xfc6   :  { %v7616_v22 = vpop.f32.mrf.mxu1  ;;  %v7635_v26 = vpop.f32.mrf.mxu0 }
 0xfc7   :  { %5666 = vst.msk [vmem:[%s9799_s26 + $0x8] sm:$0xff] %vm105_vm0, %v7616_v22  ;;  %6096 = vst.msk [vmem:[%s9799_s26 + $0x18] sm:$0xff] %vm105_vm0, %v7635_v26 }
 0xfc8   :  { %v5656_v23 = vpop.f32.mrf.mxu1  ;;  %v5741_v31 = vpop.f32.mrf.mxu0 }
 0xfc9   :  { %5665 = vst.msk [vmem:[%s9799_s26] sm:$0xff] %vm105_vm0, %v5656_v23  ;;  %6095 = vst.msk [vmem:[%s9799_s26 + $0x10] sm:$0xff] %vm105_vm0, %v5741_v31 }

</bundles_post_ra>
